<compile_context>
chip_gen: v7x
topology: tpu7x:2x2x1
jax: 0.10.0
libtpu: 0.0.40
codegen_flags: <defaults>
</compile_context>

<pallas_src>
import functools

import jax
import jax.numpy as jnp
from jax.experimental import pallas as pl
from jax.experimental.pallas import tpu as pltpu

EPS = 1e-5            # nn.BatchNorm2d default
EXPANSION = 4
LANE = 128
_VMEM_LIMIT_BYTES = 32 * 1024 * 1024   # <= default scoped VMEM on v5e/v6e/v7x


def _round_up(v, m):
    return (v + m - 1) // m * m


def _write_stats(st_ref, h):
    """One-pass BN statistics: per-channel sum and sum of squares."""
    s = jnp.sum(h, axis=0, keepdims=True)
    ss = jnp.sum(h * h, axis=0, keepdims=True)
    st_ref[0] = jnp.concatenate([s, ss], axis=0)        # (2, C)


# ---------------- kernel 1: conv1 (1x1) + partial BN1 stats ----------------
def _conv1x1_stats_kernel(x_ref, w_ref, o_ref, st_ref):
    h = jnp.dot(x_ref[0], w_ref[...], preferred_element_type=jnp.float32)
    o_ref[0] = h
    _write_stats(st_ref, h)


# ------- kernel 2: bn1 + relu -> 3x3 conv as one im2col matmul + stats -------
def _bn_relu_conv3x3_stats_kernel(h_ref, s_ref, b_ref, w_ref, o_ref, st_ref,
                                  *, H, W):
    P = h_ref.shape[-1]
    HW = H * W
    y = jnp.maximum(h_ref[0] * s_ref[...] + b_ref[...], 0.0)     # f32 (HW, P)
    y3 = y.reshape(H, W, P)
    # zero-padded spatial halo built as a value (no scratch, no full zero-fill,
    # no per-tap masks): contributions outside the image read real zeros.
    zc = jnp.zeros((H, 1, P), jnp.float32)
    zr = jnp.zeros((1, W + 2, P), jnp.float32)
    padv = jnp.concatenate(
        [zr, jnp.concatenate([zc, y3, zc], axis=1), zr], axis=0)  # (H+2,W+2,P)
    taps = [padv[dy:dy + H, dx:dx + W, :].reshape(HW, P)
            for dy in range(3) for dx in range(3)]
    big = jnp.concatenate(taps, axis=-1).astype(w_ref.dtype)      # (HW, 9P)
    h2 = jnp.dot(big, w_ref[...], preferred_element_type=jnp.float32)
    o_ref[0] = h2
    _write_stats(st_ref, h2)


# ------------- kernel 3: bn2 + relu -> conv3 (1x1) + BN3 stats --------------
def _bn_relu_conv1x1_stats_kernel(h_ref, s_ref, b_ref, w_ref, o_ref, st_ref):
    y = jnp.maximum(h_ref[0] * s_ref[...] + b_ref[...], 0.0)      # f32
    h = jnp.dot(y.astype(w_ref.dtype), w_ref[...],
                preferred_element_type=jnp.float32)
    o_ref[0] = h
    _write_stats(st_ref, h)


# ------------------- kernel 4: bn3 + residual add + relu --------------------
def _bn_residual_relu_kernel(h_ref, x_ref, s_ref, b_ref, o_ref):
    o_ref[0] = jnp.maximum(h_ref[0] * s_ref[...] + b_ref[...] + x_ref[0], 0.0)


@functools.partial(jax.jit, static_argnames=("mxu_dtype",))
def bottleneck_forward(x_nchw, params, mxu_dtype=jnp.bfloat16):
    """x_nchw: (N, C, H, W) float32 with C == planes*4. Returns (N, C, H, W)."""
    N, C, H, W = x_nchw.shape
    P = params["w1"].shape[1]
    assert C == EXPANSION * P, "identity bottleneck requires inplanes == 4*planes"
    HW = H * W
    M = N * HW
    Cp = _round_up(C, LANE)
    Pp = _round_up(P, LANE)

    # NCHW -> per-image rows (N, H*W, C); zero-pad channels up to 128 multiples
    # so every matmul / output store is lane-dense.
    x_rows = jnp.transpose(x_nchw, (0, 2, 3, 1)).reshape(N, HW, C)
    x_rows = jnp.pad(x_rows.astype(jnp.float32), ((0, 0), (0, 0), (0, Cp - C)))
    x_mxu = x_rows.astype(mxu_dtype)          # bf16 copy for the MXU (halves DMA)

    # Weights: zero-pad channel dims, cast to the MXU dtype.
    w1 = jnp.pad(params["w1"], ((0, Cp - C), (0, Pp - P))).astype(mxu_dtype)
    w2 = jnp.pad(params["w2"], ((0, 0), (0, Pp - P), (0, Pp - P)))
    w2 = w2.reshape(9 * Pp, Pp).astype(mxu_dtype)   # tap-major rows match im2col
    w3 = jnp.pad(params["w3"], ((0, Pp - P), (0, Cp - C))).astype(mxu_dtype)
    g1 = jnp.pad(params["g1"], ((0, 0), (0, Pp - P)))
    b1 = jnp.pad(params["b1"], ((0, 0), (0, Pp - P)))
    g2 = jnp.pad(params["g2"], ((0, 0), (0, Pp - P)))
    b2 = jnp.pad(params["b2"], ((0, 0), (0, Pp - P)))
    g3 = jnp.pad(params["g3"], ((0, 0), (0, Cp - C)))
    b3 = jnp.pad(params["b3"], ((0, 0), (0, Cp - C)))

    cparams = pltpu.CompilerParams(
        dimension_semantics=("parallel",),          # v7x: 2 TCs split the batch
        vmem_limit_bytes=_VMEM_LIMIT_BYTES)

    row = lambda c: pl.BlockSpec((1, HW, c), lambda n: (n, 0, 0))
    stat = lambda c: pl.BlockSpec((1, 2, c), lambda n: (n, 0, 0))
    full = lambda *s: pl.BlockSpec(s, lambda n: (0,) * len(s))

    def bn_affine(parts, gamma, beta):
        """Fold global batch stats into a per-channel affine (scale, bias)."""
        s = jnp.sum(parts, axis=0)                       # (2, C)
        mean = s[0] / M
        var = jnp.maximum(s[1] / M - mean * mean, 0.0)   # biased (training mode)
        scale = gamma[0] * jax.lax.rsqrt(var + EPS)
        bias = beta[0] - scale * mean
        return scale[None, :], bias[None, :]

    # ---- stage 1: conv1 (1x1) + BN1 partial stats ----
    h1, st1 = pl.pallas_call(
        _conv1x1_stats_kernel,
        grid=(N,),
        in_specs=[row(Cp), full(Cp, Pp)],
        out_specs=(row(Pp), stat(Pp)),
        out_shape=(jax.ShapeDtypeStruct((N, HW, Pp), jnp.float32),
                   jax.ShapeDtypeStruct((N, 2, Pp), jnp.float32)),
        compiler_params=cparams,
    )(x_mxu, w1)
    s1, bb1 = bn_affine(st1, g1, b1)

    # ---- stage 2: bn1 + relu + conv2 (3x3 im2col matmul) + BN2 stats ----
    h2, st2 = pl.pallas_call(
        functools.partial(_bn_relu_conv3x3_stats_kernel, H=H, W=W),
        grid=(N,),
        in_specs=[row(Pp), full(1, Pp), full(1, Pp), full(9 * Pp, Pp)],
        out_specs=(row(Pp), stat(Pp)),
        out_shape=(jax.ShapeDtypeStruct((N, HW, Pp), jnp.float32),
                   jax.ShapeDtypeStruct((N, 2, Pp), jnp.float32)),
        compiler_params=cparams,
    )(h1, s1, bb1, w2)
    s2, bb2 = bn_affine(st2, g2, b2)

    # ---- stage 3: bn2 + relu + conv3 (1x1) + BN3 stats ----
    h3, st3 = pl.pallas_call(
        _bn_relu_conv1x1_stats_kernel,
        grid=(N,),
        in_specs=[row(Pp), full(1, Pp), full(1, Pp), full(Pp, Cp)],
        out_specs=(row(Cp), stat(Cp)),
        out_shape=(jax.ShapeDtypeStruct((N, HW, Cp), jnp.float32),
                   jax.ShapeDtypeStruct((N, 2, Cp), jnp.float32)),
        compiler_params=cparams,
    )(h2, s2, bb2, w3)
    s3, bb3 = bn_affine(st3, g3, b3)

    # ---- stage 4: bn3 + identity residual + relu ----
    out = pl.pallas_call(
        _bn_residual_relu_kernel,
        grid=(N,),
        in_specs=[row(Cp), row(Cp), full(1, Cp), full(1, Cp)],
        out_specs=row(Cp),
        out_shape=jax.ShapeDtypeStruct((N, HW, Cp), jnp.float32),
        compiler_params=cparams,
    )(h3, x_rows, s3, bb3)

    out = out[:, :, :C].reshape(N, H, W, C)
    return jnp.transpose(out, (0, 3, 1, 2))


def init_params(key, inplanes, planes):
    k1, k2, k3 = jax.random.split(key, 3)
    ones = lambda c: jnp.ones((1, c), jnp.float32)    # BN gamma default
    zeros = lambda c: jnp.zeros((1, c), jnp.float32)  # BN beta default
    return {
        # conv1: 1x1, (inplanes -> planes), stored as (Cin, Cout)
        "w1": jax.random.normal(k1, (inplanes, planes), jnp.float32) * 0.1,
        "g1": ones(planes), "b1": zeros(planes),
        # conv2: 3x3, stored as (9, Cin, Cout) with k = ky*3 + kx
        "w2": jax.random.normal(k2, (9, planes, planes), jnp.float32) * 0.1,
        "g2": ones(planes), "b2": zeros(planes),
        # conv3: 1x1, (planes -> planes*4)
        "w3": jax.random.normal(k3, (planes, planes * EXPANSION), jnp.float32) * 0.1,
        "g3": ones(planes * EXPANSION), "b3": zeros(planes * EXPANSION),
    }


def bottleneck_reference(x_nchw, params):
    """Pure-JAX reference mirroring the PyTorch forward (NCHW, training-mode BN)."""
    P = params["w1"].shape[1]

    def bn(h, gamma, beta):
        mean = jnp.mean(h, axis=(0, 2, 3), keepdims=True)
        var = jnp.mean((h - mean) ** 2, axis=(0, 2, 3), keepdims=True)
        g = gamma.reshape(1, -1, 1, 1)
        b = beta.reshape(1, -1, 1, 1)
        return g * (h - mean) / jnp.sqrt(var + EPS) + b

    conv = functools.partial(
        jax.lax.conv_general_dilated,
        dimension_numbers=("NCHW", "OIHW", "NCHW"),
        precision=jax.lax.Precision.HIGHEST)

    w1 = params["w1"].T[:, :, None, None]                               # OIHW
    h = conv(x_nchw, w1, (1, 1), "VALID")
    h = jax.nn.relu(bn(h, params["g1"], params["b1"]))

    w2 = params["w2"].reshape(3, 3, P, P).transpose(3, 2, 0, 1)         # OIHW
    h = conv(h, w2, (1, 1), ((1, 1), (1, 1)))
    h = jax.nn.relu(bn(h, params["g2"], params["b2"]))

    w3 = params["w3"].T[:, :, None, None]                               # OIHW
    h = conv(h, w3, (1, 1), "VALID")
    h = bn(h, params["g3"], params["b3"])
    return jax.nn.relu(h + x_nchw)


if __name__ == "__main__":
    N, H, W = 2, 16, 16
    planes = 4
    inplanes = planes * EXPANSION   # 16 -> identity residual (downsample=None)

    key = jax.random.PRNGKey(0)
    kx, kp = jax.random.split(key)
    x = jax.random.normal(kx, (N, inplanes, H, W), jnp.float32)
    params = init_params(kp, inplanes, planes)

    ref = bottleneck_reference(x, params)

    # Exact-semantics check with f32 matmuls (tight tolerance).
    out_f32 = jax.block_until_ready(
        bottleneck_forward(x, params, mxu_dtype=jnp.float32))
    assert out_f32.shape == ref.shape == (N, inplanes, H, W)
    assert jnp.allclose(out_f32, ref, rtol=2e-3, atol=2e-3), (
        float(jnp.max(jnp.abs(out_f32 - ref))))

    # Default fast path: bf16 operands on the MXU (v6e/v7x advice); elementwise
    # math stays f32.  Looser tolerance accounts for bf16 rounding through
    # three chained convolutions.
    out_bf16 = jax.block_until_ready(bottleneck_forward(x, params))
    assert out_bf16.shape == ref.shape
    assert jnp.allclose(out_bf16, ref, rtol=5e-2, atol=5e-2), (
        float(jnp.max(jnp.abs(out_bf16 - ref))))

    print("KERNEL_OK")
</pallas_src>

<mosaic_0001>
module attributes {stable_mosaic.version = 11 : i64} {
  func.func @_conv1x1_stats_kernel(%arg0: i32, %arg1: memref<1x256x128xf32, #tpu.memory_space<vmem>>, %arg2: memref<128x128xf32, #tpu.memory_space<vmem>>, %arg3: memref<1x256x128xf32, #tpu.memory_space<vmem>>, %arg4: memref<1x2x128xf32, #tpu.memory_space<vmem>>) attributes {dimension_semantics = [#tpu.dimension_semantics<parallel>], iteration_bounds = array<i64: 2>, scalar_prefetch = 0 : i64, scratch_operands = 0 : i64, tpu.core_type = #tpu.core_type<tc>, window_params = [{transform_indices = @transform_0, window_bounds = array<i64: 1, 256, 128>}, {pipeline_mode = #tpu.pipeline_mode<synchronous>, transform_indices = @transform_1, window_bounds = array<i64: 128, 128>}, {transform_indices = @transform_2, window_bounds = array<i64: 1, 256, 128>}, {transform_indices = @transform_3, window_bounds = array<i64: 1, 2, 128>}]} {
    %c0 = arith.constant 0 : index
    %c0_0 = arith.constant 0 : index
    %c0_1 = arith.constant 0 : index
    %0 = vector.load %arg1[%c0, %c0_0, %c0_1] : memref<1x256x128xf32, #tpu.memory_space<vmem>>, vector<1x256x128xf32>
    %1 = vector.shape_cast %0 : vector<1x256x128xf32> to vector<256x128xf32>
    %c0_2 = arith.constant 0 : index
    %c0_3 = arith.constant 0 : index
    %2 = vector.load %arg2[%c0_2, %c0_3] : memref<128x128xf32, #tpu.memory_space<vmem>>, vector<128x128xf32>
    %cst = arith.constant dense<0.000000e+00> : vector<256x128xf32>
    %3 = tpu.matmul %1, %2, %cst {dimension_numbers = #tpu.dot_dimension_numbers<[1], [0], [0], [1], [0, 0, 1, 1], [], []>} : vector<256x128xf32>, vector<128x128xf32>, vector<256x128xf32> -> vector<256x128xf32>
    %c0_4 = arith.constant 0 : index
    %c0_5 = arith.constant 0 : index
    %c0_6 = arith.constant 0 : index
    %4 = vector.load %arg3[%c0_4, %c0_5, %c0_6] : memref<1x256x128xf32, #tpu.memory_space<vmem>>, vector<1x256x128xf32>
    %5 = vector.shape_cast %4 : vector<1x256x128xf32> to vector<256x128xf32>
    %6 = vector.shape_cast %3 : vector<256x128xf32> to vector<1x256x128xf32>
    tpu.vector_store %arg3[%c0_4, %c0_5, %c0_6], %6 {strides = array<i32>} : memref<1x256x128xf32, #tpu.memory_space<vmem>>, vector<1x256x128xf32>,
    %cst_7 = arith.constant dense<0.000000e+00> : vector<128xf32>
    %7 = vector.multi_reduction <add>, %3, %cst_7 [0] : vector<256x128xf32> to vector<128xf32>
    %8 = vector.shape_cast %7 : vector<128xf32> to vector<1x128xf32>
    %9 = arith.mulf %3, %3 : vector<256x128xf32>
    %cst_8 = arith.constant dense<0.000000e+00> : vector<128xf32>
    %10 = vector.multi_reduction <add>, %9, %cst_8 [0] : vector<256x128xf32> to vector<128xf32>
    %11 = vector.shape_cast %10 : vector<128xf32> to vector<1x128xf32>
    %12 = tpu.concatenate %8, %11 in 0 : vector<1x128xf32>, vector<1x128xf32> -> vector<2x128xf32>
    %c0_9 = arith.constant 0 : index
    %c0_10 = arith.constant 0 : index
    %c0_11 = arith.constant 0 : index
    %13 = vector.load %arg4[%c0_9, %c0_10, %c0_11] : memref<1x2x128xf32, #tpu.memory_space<vmem>>, vector<1x2x128xf32>
    %14 = vector.shape_cast %13 : vector<1x2x128xf32> to vector<2x128xf32>
    %15 = vector.shape_cast %12 : vector<2x128xf32> to vector<1x2x128xf32>
    tpu.vector_store %arg4[%c0_9, %c0_10, %c0_11], %15 {strides = array<i32>} : memref<1x2x128xf32, #tpu.memory_space<vmem>>, vector<1x2x128xf32>,
    return
  }
  func.func @transform_0(%arg0: i32) -> (i32, i32, i32) {
    %c0_i32 = arith.constant 0 : i32
    %c0_i32_0 = arith.constant 0 : i32
    %c0_i32_1 = arith.constant 0 : i32
    return %arg0, %c0_i32, %c0_i32_0 : i32, i32, i32
  }
  func.func @transform_1(%arg0: i32) -> (i32, i32) {
    %c0_i32 = arith.constant 0 : i32
    %c0_i32_0 = arith.constant 0 : i32
    %c0_i32_1 = arith.constant 0 : i32
    return %c0_i32, %c0_i32_0 : i32, i32
  }
  func.func @transform_2(%arg0: i32) -> (i32, i32, i32) {
    %c0_i32 = arith.constant 0 : i32
    %c0_i32_0 = arith.constant 0 : i32
    %c0_i32_1 = arith.constant 0 : i32
    return %arg0, %c0_i32, %c0_i32_0 : i32, i32, i32
  }
  func.func @transform_3(%arg0: i32) -> (i32, i32, i32) {
    %c0_i32 = arith.constant 0 : i32
    %c0_i32_0 = arith.constant 0 : i32
    %c0_i32_1 = arith.constant 0 : i32
    return %arg0, %c0_i32, %c0_i32_0 : i32, i32, i32
  }
}

module attributes {stable_mosaic.version = 11 : i64} {
  func.func @_bn_relu_conv3x3_stats_kernel(%arg0: i32, %arg1: memref<1x256x128xf32, #tpu.memory_space<vmem>>, %arg2: memref<1x128xf32, #tpu.memory_space<vmem>>, %arg3: memref<1x128xf32, #tpu.memory_space<vmem>>, %arg4: memref<1152x128xf32, #tpu.memory_space<vmem>>, %arg5: memref<1x256x128xf32, #tpu.memory_space<vmem>>, %arg6: memref<1x2x128xf32, #tpu.memory_space<vmem>>) attributes {dimension_semantics = [#tpu.dimension_semantics<parallel>], iteration_bounds = array<i64: 2>, scalar_prefetch = 0 : i64, scratch_operands = 0 : i64, tpu.core_type = #tpu.core_type<tc>, window_params = [{transform_indices = @transform_0, window_bounds = array<i64: 1, 256, 128>}, {pipeline_mode = #tpu.pipeline_mode<synchronous>, transform_indices = @transform_1, window_bounds = array<i64: 1, 128>}, {pipeline_mode = #tpu.pipeline_mode<synchronous>, transform_indices = @transform_2, window_bounds = array<i64: 1, 128>}, {pipeline_mode = #tpu.pipeline_mode<synchronous>, transform_indices = @transform_3, window_bounds = array<i64: 1152, 128>}, {transform_indices = @transform_4, window_bounds = array<i64: 1, 256, 128>}, {transform_indices = @transform_5, window_bounds = array<i64: 1, 2, 128>}]} {
    %c0 = arith.constant 0 : index
    %c0_0 = arith.constant 0 : index
    %c0_1 = arith.constant 0 : index
    %0 = vector.load %arg1[%c0, %c0_0, %c0_1] : memref<1x256x128xf32, #tpu.memory_space<vmem>>, vector<1x256x128xf32>
    %1 = vector.shape_cast %0 : vector<1x256x128xf32> to vector<256x128xf32>
    %c0_2 = arith.constant 0 : index
    %c0_3 = arith.constant 0 : index
    %2 = vector.load %arg2[%c0_2, %c0_3] : memref<1x128xf32, #tpu.memory_space<vmem>>, vector<1x128xf32>
    %3 = vector.broadcast %2 : vector<1x128xf32> to vector<256x128xf32>
    %4 = arith.mulf %1, %3 : vector<256x128xf32>
    %c0_4 = arith.constant 0 : index
    %c0_5 = arith.constant 0 : index
    %5 = vector.load %arg3[%c0_4, %c0_5] : memref<1x128xf32, #tpu.memory_space<vmem>>, vector<1x128xf32>
    %6 = vector.broadcast %5 : vector<1x128xf32> to vector<256x128xf32>
    %7 = arith.addf %4, %6 : vector<256x128xf32>
    %cst = arith.constant 0.000000e+00 : f32
    %8 = vector.broadcast %cst : f32 to vector<256x128xf32>
    %9 = arith.maximumf %7, %8 : vector<256x128xf32>
    %10 = vector.shape_cast %9 : vector<256x128xf32> to vector<16x16x128xf32>
    %cst_6 = arith.constant 0.000000e+00 : f32
    %11 = vector.broadcast %cst_6 : f32 to vector<16x1x128xf32>
    %cst_7 = arith.constant 0.000000e+00 : f32
    %12 = vector.broadcast %cst_7 : f32 to vector<1x18x128xf32>
    %13 = tpu.concatenate %11, %10, %11 in 1 : vector<16x1x128xf32>, vector<16x16x128xf32>, vector<16x1x128xf32> -> vector<16x18x128xf32>
    %14 = tpu.concatenate %12, %13, %12 in 0 : vector<1x18x128xf32>, vector<16x18x128xf32>, vector<1x18x128xf32> -> vector<18x18x128xf32>
    %15 = vector.extract_strided_slice %14 {offsets = [0, 0, 0], sizes = [16, 16, 128], strides = [1, 1, 1]} : vector<18x18x128xf32> to vector<16x16x128xf32>
    %16 = vector.shape_cast %15 : vector<16x16x128xf32> to vector<256x128xf32>
    %17 = vector.extract_strided_slice %14 {offsets = [0, 1, 0], sizes = [16, 16, 128], strides = [1, 1, 1]} : vector<18x18x128xf32> to vector<16x16x128xf32>
    %18 = vector.shape_cast %17 : vector<16x16x128xf32> to vector<256x128xf32>
    %19 = vector.extract_strided_slice %14 {offsets = [0, 2, 0], sizes = [16, 16, 128], strides = [1, 1, 1]} : vector<18x18x128xf32> to vector<16x16x128xf32>
    %20 = vector.shape_cast %19 : vector<16x16x128xf32> to vector<256x128xf32>
    %21 = vector.extract_strided_slice %14 {offsets = [1, 0, 0], sizes = [16, 16, 128], strides = [1, 1, 1]} : vector<18x18x128xf32> to vector<16x16x128xf32>
    %22 = vector.shape_cast %21 : vector<16x16x128xf32> to vector<256x128xf32>
    %23 = vector.extract_strided_slice %14 {offsets = [1, 1, 0], sizes = [16, 16, 128], strides = [1, 1, 1]} : vector<18x18x128xf32> to vector<16x16x128xf32>
    %24 = vector.shape_cast %23 : vector<16x16x128xf32> to vector<256x128xf32>
    %25 = vector.extract_strided_slice %14 {offsets = [1, 2, 0], sizes = [16, 16, 128], strides = [1, 1, 1]} : vector<18x18x128xf32> to vector<16x16x128xf32>
    %26 = vector.shape_cast %25 : vector<16x16x128xf32> to vector<256x128xf32>
    %27 = vector.extract_strided_slice %14 {offsets = [2, 0, 0], sizes = [16, 16, 128], strides = [1, 1, 1]} : vector<18x18x128xf32> to vector<16x16x128xf32>
    %28 = vector.shape_cast %27 : vector<16x16x128xf32> to vector<256x128xf32>
    %29 = vector.extract_strided_slice %14 {offsets = [2, 1, 0], sizes = [16, 16, 128], strides = [1, 1, 1]} : vector<18x18x128xf32> to vector<16x16x128xf32>
    %30 = vector.shape_cast %29 : vector<16x16x128xf32> to vector<256x128xf32>
    %31 = vector.extract_strided_slice %14 {offsets = [2, 2, 0], sizes = [16, 16, 128], strides = [1, 1, 1]} : vector<18x18x128xf32> to vector<16x16x128xf32>
    %32 = vector.shape_cast %31 : vector<16x16x128xf32> to vector<256x128xf32>
    %33 = tpu.concatenate %16, %18, %20, %22, %24, %26, %28, %30, %32 in 1 : vector<256x128xf32>, vector<256x128xf32>, vector<256x128xf32>, vector<256x128xf32>, vector<256x128xf32>, vector<256x128xf32>, vector<256x128xf32>, vector<256x128xf32>, vector<256x128xf32> -> vector<256x1152xf32>
    %c0_8 = arith.constant 0 : index
    %c0_9 = arith.constant 0 : index
    %34 = vector.load %arg4[%c0_8, %c0_9] : memref<1152x128xf32, #tpu.memory_space<vmem>>, vector<1152x128xf32>
    %cst_10 = arith.constant dense<0.000000e+00> : vector<256x128xf32>
    %35 = tpu.matmul %33, %34, %cst_10 {dimension_numbers = #tpu.dot_dimension_numbers<[1], [0], [0], [1], [0, 0, 1, 1], [], []>} : vector<256x1152xf32>, vector<1152x128xf32>, vector<256x128xf32> -> vector<256x128xf32>
    %c0_11 = arith.constant 0 : index
    %c0_12 = arith.constant 0 : index
    %c0_13 = arith.constant 0 : index
    %36 = vector.load %arg5[%c0_11, %c0_12, %c0_13] : memref<1x256x128xf32, #tpu.memory_space<vmem>>, vector<1x256x128xf32>
    %37 = vector.shape_cast %36 : vector<1x256x128xf32> to vector<256x128xf32>
    %38 = vector.shape_cast %35 : vector<256x128xf32> to vector<1x256x128xf32>
    tpu.vector_store %arg5[%c0_11, %c0_12, %c0_13], %38 {strides = array<i32>} : memref<1x256x128xf32, #tpu.memory_space<vmem>>, vector<1x256x128xf32>,
    %cst_14 = arith.constant dense<0.000000e+00> : vector<128xf32>
    %39 = vector.multi_reduction <add>, %35, %cst_14 [0] : vector<256x128xf32> to vector<128xf32>
    %40 = vector.shape_cast %39 : vector<128xf32> to vector<1x128xf32>
    %41 = arith.mulf %35, %35 : vector<256x128xf32>
    %cst_15 = arith.constant dense<0.000000e+00> : vector<128xf32>
    %42 = vector.multi_reduction <add>, %41, %cst_15 [0] : vector<256x128xf32> to vector<128xf32>
    %43 = vector.shape_cast %42 : vector<128xf32> to vector<1x128xf32>
    %44 = tpu.concatenate %40, %43 in 0 : vector<1x128xf32>, vector<1x128xf32> -> vector<2x128xf32>
    %c0_16 = arith.constant 0 : index
    %c0_17 = arith.constant 0 : index
    %c0_18 = arith.constant 0 : index
    %45 = vector.load %arg6[%c0_16, %c0_17, %c0_18] : memref<1x2x128xf32, #tpu.memory_space<vmem>>, vector<1x2x128xf32>
    %46 = vector.shape_cast %45 : vector<1x2x128xf32> to vector<2x128xf32>
    %47 = vector.shape_cast %44 : vector<2x128xf32> to vector<1x2x128xf32>
    tpu.vector_store %arg6[%c0_16, %c0_17, %c0_18], %47 {strides = array<i32>} : memref<1x2x128xf32, #tpu.memory_space<vmem>>, vector<1x2x128xf32>,
    return
  }
  func.func @transform_0(%arg0: i32) -> (i32, i32, i32) {
    %c0_i32 = arith.constant 0 : i32
    %c0_i32_0 = arith.constant 0 : i32
    %c0_i32_1 = arith.constant 0 : i32
    return %arg0, %c0_i32, %c0_i32_0 : i32, i32, i32
  }
  func.func @transform_1(%arg0: i32) -> (i32, i32) {
    %c0_i32 = arith.constant 0 : i32
    %c0_i32_0 = arith.constant 0 : i32
    %c0_i32_1 = arith.constant 0 : i32
    return %c0_i32, %c0_i32_0 : i32, i32
  }
  func.func @transform_2(%arg0: i32) -> (i32, i32) {
    %c0_i32 = arith.constant 0 : i32
    %c0_i32_0 = arith.constant 0 : i32
    %c0_i32_1 = arith.constant 0 : i32
    return %c0_i32, %c0_i32_0 : i32, i32
  }
  func.func @transform_3(%arg0: i32) -> (i32, i32) {
    %c0_i32 = arith.constant 0 : i32
    %c0_i32_0 = arith.constant 0 : i32
    %c0_i32_1 = arith.constant 0 : i32
    return %c0_i32, %c0_i32_0 : i32, i32
  }
  func.func @transform_4(%arg0: i32) -> (i32, i32, i32) {
    %c0_i32 = arith.constant 0 : i32
    %c0_i32_0 = arith.constant 0 : i32
    %c0_i32_1 = arith.constant 0 : i32
    return %arg0, %c0_i32, %c0_i32_0 : i32, i32, i32
  }
  func.func @transform_5(%arg0: i32) -> (i32, i32, i32) {
    %c0_i32 = arith.constant 0 : i32
    %c0_i32_0 = arith.constant 0 : i32
    %c0_i32_1 = arith.constant 0 : i32
    return %arg0, %c0_i32, %c0_i32_0 : i32, i32, i32
  }
}

module attributes {stable_mosaic.version = 11 : i64} {
  func.func @_bn_residual_relu_kernel(%arg0: i32, %arg1: memref<1x256x128xf32, #tpu.memory_space<vmem>>, %arg2: memref<1x256x128xf32, #tpu.memory_space<vmem>>, %arg3: memref<1x128xf32, #tpu.memory_space<vmem>>, %arg4: memref<1x128xf32, #tpu.memory_space<vmem>>, %arg5: memref<1x256x128xf32, #tpu.memory_space<vmem>>) attributes {dimension_semantics = [#tpu.dimension_semantics<parallel>], iteration_bounds = array<i64: 2>, scalar_prefetch = 0 : i64, scratch_operands = 0 : i64, tpu.core_type = #tpu.core_type<tc>, window_params = [{transform_indices = @transform_0, window_bounds = array<i64: 1, 256, 128>}, {transform_indices = @transform_1, window_bounds = array<i64: 1, 256, 128>}, {pipeline_mode = #tpu.pipeline_mode<synchronous>, transform_indices = @transform_2, window_bounds = array<i64: 1, 128>}, {pipeline_mode = #tpu.pipeline_mode<synchronous>, transform_indices = @transform_3, window_bounds = array<i64: 1, 128>}, {transform_indices = @transform_4, window_bounds = array<i64: 1, 256, 128>}]} {
    %c0 = arith.constant 0 : index
    %c0_0 = arith.constant 0 : index
    %c0_1 = arith.constant 0 : index
    %0 = vector.load %arg1[%c0, %c0_0, %c0_1] : memref<1x256x128xf32, #tpu.memory_space<vmem>>, vector<1x256x128xf32>
    %1 = vector.shape_cast %0 : vector<1x256x128xf32> to vector<256x128xf32>
    %c0_2 = arith.constant 0 : index
    %c0_3 = arith.constant 0 : index
    %2 = vector.load %arg3[%c0_2, %c0_3] : memref<1x128xf32, #tpu.memory_space<vmem>>, vector<1x128xf32>
    %3 = vector.broadcast %2 : vector<1x128xf32> to vector<256x128xf32>
    %4 = arith.mulf %1, %3 : vector<256x128xf32>
    %c0_4 = arith.constant 0 : index
    %c0_5 = arith.constant 0 : index
    %5 = vector.load %arg4[%c0_4, %c0_5] : memref<1x128xf32, #tpu.memory_space<vmem>>, vector<1x128xf32>
    %6 = vector.broadcast %5 : vector<1x128xf32> to vector<256x128xf32>
    %7 = arith.addf %4, %6 : vector<256x128xf32>
    %c0_6 = arith.constant 0 : index
    %c0_7 = arith.constant 0 : index
    %c0_8 = arith.constant 0 : index
    %8 = vector.load %arg2[%c0_6, %c0_7, %c0_8] : memref<1x256x128xf32, #tpu.memory_space<vmem>>, vector<1x256x128xf32>
    %9 = vector.shape_cast %8 : vector<1x256x128xf32> to vector<256x128xf32>
    %10 = arith.addf %7, %9 : vector<256x128xf32>
    %cst = arith.constant 0.000000e+00 : f32
    %11 = vector.broadcast %cst : f32 to vector<256x128xf32>
    %12 = arith.maximumf %10, %11 : vector<256x128xf32>
    %c0_9 = arith.constant 0 : index
    %c0_10 = arith.constant 0 : index
    %c0_11 = arith.constant 0 : index
    %13 = vector.load %arg5[%c0_9, %c0_10, %c0_11] : memref<1x256x128xf32, #tpu.memory_space<vmem>>, vector<1x256x128xf32>
    %14 = vector.shape_cast %13 : vector<1x256x128xf32> to vector<256x128xf32>
    %15 = vector.shape_cast %12 : vector<256x128xf32> to vector<1x256x128xf32>
    tpu.vector_store %arg5[%c0_9, %c0_10, %c0_11], %15 {strides = array<i32>} : memref<1x256x128xf32, #tpu.memory_space<vmem>>, vector<1x256x128xf32>,
    return
  }
  func.func @transform_0(%arg0: i32) -> (i32, i32, i32) {
    %c0_i32 = arith.constant 0 : i32
    %c0_i32_0 = arith.constant 0 : i32
    %c0_i32_1 = arith.constant 0 : i32
    return %arg0, %c0_i32, %c0_i32_0 : i32, i32, i32
  }
  func.func @transform_1(%arg0: i32) -> (i32, i32, i32) {
    %c0_i32 = arith.constant 0 : i32
    %c0_i32_0 = arith.constant 0 : i32
    %c0_i32_1 = arith.constant 0 : i32
    return %arg0, %c0_i32, %c0_i32_0 : i32, i32, i32
  }
  func.func @transform_2(%arg0: i32) -> (i32, i32) {
    %c0_i32 = arith.constant 0 : i32
    %c0_i32_0 = arith.constant 0 : i32
    %c0_i32_1 = arith.constant 0 : i32
    return %c0_i32, %c0_i32_0 : i32, i32
  }
  func.func @transform_3(%arg0: i32) -> (i32, i32) {
    %c0_i32 = arith.constant 0 : i32
    %c0_i32_0 = arith.constant 0 : i32
    %c0_i32_1 = arith.constant 0 : i32
    return %c0_i32, %c0_i32_0 : i32, i32
  }
  func.func @transform_4(%arg0: i32) -> (i32, i32, i32) {
    %c0_i32 = arith.constant 0 : i32
    %c0_i32_0 = arith.constant 0 : i32
    %c0_i32_1 = arith.constant 0 : i32
    return %arg0, %c0_i32, %c0_i32_0 : i32, i32, i32
  }
}

module attributes {stable_mosaic.version = 11 : i64} {
  func.func @_bn_relu_conv1x1_stats_kernel(%arg0: i32, %arg1: memref<1x256x128xf32, #tpu.memory_space<vmem>>, %arg2: memref<1x128xf32, #tpu.memory_space<vmem>>, %arg3: memref<1x128xf32, #tpu.memory_space<vmem>>, %arg4: memref<128x128xf32, #tpu.memory_space<vmem>>, %arg5: memref<1x256x128xf32, #tpu.memory_space<vmem>>, %arg6: memref<1x2x128xf32, #tpu.memory_space<vmem>>) attributes {dimension_semantics = [#tpu.dimension_semantics<parallel>], iteration_bounds = array<i64: 2>, scalar_prefetch = 0 : i64, scratch_operands = 0 : i64, tpu.core_type = #tpu.core_type<tc>, window_params = [{transform_indices = @transform_0, window_bounds = array<i64: 1, 256, 128>}, {pipeline_mode = #tpu.pipeline_mode<synchronous>, transform_indices = @transform_1, window_bounds = array<i64: 1, 128>}, {pipeline_mode = #tpu.pipeline_mode<synchronous>, transform_indices = @transform_2, window_bounds = array<i64: 1, 128>}, {pipeline_mode = #tpu.pipeline_mode<synchronous>, transform_indices = @transform_3, window_bounds = array<i64: 128, 128>}, {transform_indices = @transform_4, window_bounds = array<i64: 1, 256, 128>}, {transform_indices = @transform_5, window_bounds = array<i64: 1, 2, 128>}]} {
    %c0 = arith.constant 0 : index
    %c0_0 = arith.constant 0 : index
    %c0_1 = arith.constant 0 : index
    %0 = vector.load %arg1[%c0, %c0_0, %c0_1] : memref<1x256x128xf32, #tpu.memory_space<vmem>>, vector<1x256x128xf32>
    %1 = vector.shape_cast %0 : vector<1x256x128xf32> to vector<256x128xf32>
    %c0_2 = arith.constant 0 : index
    %c0_3 = arith.constant 0 : index
    %2 = vector.load %arg2[%c0_2, %c0_3] : memref<1x128xf32, #tpu.memory_space<vmem>>, vector<1x128xf32>
    %3 = vector.broadcast %2 : vector<1x128xf32> to vector<256x128xf32>
    %4 = arith.mulf %1, %3 : vector<256x128xf32>
    %c0_4 = arith.constant 0 : index
    %c0_5 = arith.constant 0 : index
    %5 = vector.load %arg3[%c0_4, %c0_5] : memref<1x128xf32, #tpu.memory_space<vmem>>, vector<1x128xf32>
    %6 = vector.broadcast %5 : vector<1x128xf32> to vector<256x128xf32>
    %7 = arith.addf %4, %6 : vector<256x128xf32>
    %cst = arith.constant 0.000000e+00 : f32
    %8 = vector.broadcast %cst : f32 to vector<256x128xf32>
    %9 = arith.maximumf %7, %8 : vector<256x128xf32>
    %c0_6 = arith.constant 0 : index
    %c0_7 = arith.constant 0 : index
    %10 = vector.load %arg4[%c0_6, %c0_7] : memref<128x128xf32, #tpu.memory_space<vmem>>, vector<128x128xf32>
    %cst_8 = arith.constant dense<0.000000e+00> : vector<256x128xf32>
    %11 = tpu.matmul %9, %10, %cst_8 {dimension_numbers = #tpu.dot_dimension_numbers<[1], [0], [0], [1], [0, 0, 1, 1], [], []>} : vector<256x128xf32>, vector<128x128xf32>, vector<256x128xf32> -> vector<256x128xf32>
    %c0_9 = arith.constant 0 : index
    %c0_10 = arith.constant 0 : index
    %c0_11 = arith.constant 0 : index
    %12 = vector.load %arg5[%c0_9, %c0_10, %c0_11] : memref<1x256x128xf32, #tpu.memory_space<vmem>>, vector<1x256x128xf32>
    %13 = vector.shape_cast %12 : vector<1x256x128xf32> to vector<256x128xf32>
    %14 = vector.shape_cast %11 : vector<256x128xf32> to vector<1x256x128xf32>
    tpu.vector_store %arg5[%c0_9, %c0_10, %c0_11], %14 {strides = array<i32>} : memref<1x256x128xf32, #tpu.memory_space<vmem>>, vector<1x256x128xf32>,
    %cst_12 = arith.constant dense<0.000000e+00> : vector<128xf32>
    %15 = vector.multi_reduction <add>, %11, %cst_12 [0] : vector<256x128xf32> to vector<128xf32>
    %16 = vector.shape_cast %15 : vector<128xf32> to vector<1x128xf32>
    %17 = arith.mulf %11, %11 : vector<256x128xf32>
    %cst_13 = arith.constant dense<0.000000e+00> : vector<128xf32>
    %18 = vector.multi_reduction <add>, %17, %cst_13 [0] : vector<256x128xf32> to vector<128xf32>
    %19 = vector.shape_cast %18 : vector<128xf32> to vector<1x128xf32>
    %20 = tpu.concatenate %16, %19 in 0 : vector<1x128xf32>, vector<1x128xf32> -> vector<2x128xf32>
    %c0_14 = arith.constant 0 : index
    %c0_15 = arith.constant 0 : index
    %c0_16 = arith.constant 0 : index
    %21 = vector.load %arg6[%c0_14, %c0_15, %c0_16] : memref<1x2x128xf32, #tpu.memory_space<vmem>>, vector<1x2x128xf32>
    %22 = vector.shape_cast %21 : vector<1x2x128xf32> to vector<2x128xf32>
    %23 = vector.shape_cast %20 : vector<2x128xf32> to vector<1x2x128xf32>
    tpu.vector_store %arg6[%c0_14, %c0_15, %c0_16], %23 {strides = array<i32>} : memref<1x2x128xf32, #tpu.memory_space<vmem>>, vector<1x2x128xf32>,
    return
  }
  func.func @transform_0(%arg0: i32) -> (i32, i32, i32) {
    %c0_i32 = arith.constant 0 : i32
    %c0_i32_0 = arith.constant 0 : i32
    %c0_i32_1 = arith.constant 0 : i32
    return %arg0, %c0_i32, %c0_i32_0 : i32, i32, i32
  }
  func.func @transform_1(%arg0: i32) -> (i32, i32) {
    %c0_i32 = arith.constant 0 : i32
    %c0_i32_0 = arith.constant 0 : i32
    %c0_i32_1 = arith.constant 0 : i32
    return %c0_i32, %c0_i32_0 : i32, i32
  }
  func.func @transform_2(%arg0: i32) -> (i32, i32) {
    %c0_i32 = arith.constant 0 : i32
    %c0_i32_0 = arith.constant 0 : i32
    %c0_i32_1 = arith.constant 0 : i32
    return %c0_i32, %c0_i32_0 : i32, i32
  }
  func.func @transform_3(%arg0: i32) -> (i32, i32) {
    %c0_i32 = arith.constant 0 : i32
    %c0_i32_0 = arith.constant 0 : i32
    %c0_i32_1 = arith.constant 0 : i32
    return %c0_i32, %c0_i32_0 : i32, i32
  }
  func.func @transform_4(%arg0: i32) -> (i32, i32, i32) {
    %c0_i32 = arith.constant 0 : i32
    %c0_i32_0 = arith.constant 0 : i32
    %c0_i32_1 = arith.constant 0 : i32
    return %arg0, %c0_i32, %c0_i32_0 : i32, i32, i32
  }
  func.func @transform_5(%arg0: i32) -> (i32, i32, i32) {
    %c0_i32 = arith.constant 0 : i32
    %c0_i32_0 = arith.constant 0 : i32
    %c0_i32_1 = arith.constant 0 : i32
    return %arg0, %c0_i32, %c0_i32_0 : i32, i32, i32
  }
}

</mosaic_0001>

<bundles_post_ra>
// kernel: bottleneck_forward.4
= control target key start
LH: loop header
LB: loop body
LE: loop exit
PB: predicated region body
PF: predicated region fallthrough
CT: control target
= control target key end

     0   :  { %s908_s12 = smov 0   ;;  %s1130_s0 = inlined_call_operand.vmem [shape: f32[2,256,128], index: 0, kind: input, shape index: {}]   ;;  %s1131_s1 = inlined_call_operand.vmem [shape: f32[128,128], index: 1, kind: input, shape index: {}]   ;;  %s1132_s2 = inlined_call_operand.vmem [shape: f32[2,256,128], index: 2, kind: output, shape index: {0}]   ;;  %s1133_s3 = inlined_call_operand.vmem [shape: f32[2,2,128], index: 3, kind: output, shape index: {1}]  }
   0x1 LB: > { %s682_s13 = sadd.s32 4294967295, %s886_s12   ;;  %p686_p0 = scmp.ge.s32.totalorder %s886_s12, 1  ;;  %s886_s12 = sphi %s908_s12, %s14_s12  }
   0x2   : > { %p140_p1 = scmp.lt.s32.totalorder %s886_s12, 3 }
   0x4   : > { %p141_p2 = pnand %p686_p0, %p140_p1 }
   0x5   : > { %v214_v0 = vld [vmem:[%s1131_s1] sm:$0xff] (!%p141_p2)  ;;  %v215_v1 = vld [vmem:[%s1131_s1 + $0x8] sm:$0xff] (!%p141_p2)  ;;  %v216_v2 = vld [vmem:[%s1131_s1 + $0x10] sm:$0xff] (!%p141_p2)  ;;  %p168_p3 = scmp.lt.s32.totalorder (!%p141_p2), %s682_s13, 1  ;;  %vm593_vm0 = vcmask (!%p141_p2), 1040384  }
   0x6   : > { %144 = sbr.rel (%p141_p2) target bundleno = 333 (0x14d), region = 28  ;;  %v824_v3 = vpack.c.bf16 (!%p141_p2), %v215_v1, %v214_v0  ;;  %v217_v4 = vld [vmem:[%s1131_s1 + $0x18] sm:$0xff] (!%p141_p2)  ;;  %v218_v6 = vld [vmem:[%s1131_s1 + $0x20] sm:$0xff] (!%p141_p2)  ;;  %v219_v7 = vld [vmem:[%s1131_s1 + $0x28] sm:$0xff] (!%p141_p2) }
   0x7   : > { %v828_v5 = vpack.c.bf16 (!%p141_p2), %v217_v4, %v216_v2  ;;  %v832_v8 = vpack.c.bf16 (!%p141_p2), %v219_v7, %v218_v6  ;;  %v220_v9 = vld [vmem:[%s1131_s1 + $0x30] sm:$0xff] (!%p141_p2)  ;;  %v221_v10 = vld [vmem:[%s1131_s1 + $0x38] sm:$0xff] (!%p141_p2)  ;;  %v222_v13 = vld [vmem:[%s1131_s1 + $0x40] sm:$0xff] (!%p141_p2) }
   0x8   : > { %825 = vmatprep.subr.bf16.mxu0 (!%p141_p2), %v824_v3  ;;  %856 = vmatprep.subr.bf16.mxu1 (!%p141_p2), %v824_v3  ;;  %v836_v12 = vpack.c.bf16 (!%p141_p2), %v221_v10, %v220_v9  ;;  %v223_v14 = vld [vmem:[%s1131_s1 + $0x48] sm:$0xff] (!%p141_p2)  ;;  %v224_v17 = vld [vmem:[%s1131_s1 + $0x50] sm:$0xff] (!%p141_p2)  ;;  %v225_v18 = vld [vmem:[%s1131_s1 + $0x58] sm:$0xff] (!%p141_p2) }
   0x9   : > { %827 = vmatpush3.bf16.msra.mxu0 (!%p141_p2), %v824_v3  ;;  %864 = vmatpush3.bf16.msra.mxu1 (!%p141_p2), %v824_v3  ;;  %v840_v16 = vpack.c.bf16 (!%p141_p2), %v223_v14, %v222_v13  ;;  %v844_v19 = vpack.c.bf16 (!%p141_p2), %v225_v18, %v224_v17  ;;  %v226_v20 = vld [vmem:[%s1131_s1 + $0x60] sm:$0xff] (!%p141_p2)  ;;  %v227_v21 = vld [vmem:[%s1131_s1 + $0x68] sm:$0xff] (!%p141_p2)  ;;  %v228_v23 = vld [vmem:[%s1131_s1 + $0x70] sm:$0xff] (!%p141_p2) }
   0xa   : > { %829 = vmatprep.subr.bf16.mxu0 (!%p141_p2), %v828_v5  ;;  %857 = vmatprep.subr.bf16.mxu1 (!%p141_p2), %v828_v5  ;;  %v848_v22 = vpack.c.bf16 (!%p141_p2), %v227_v21, %v226_v20  ;;  %v229_v24 = vld [vmem:[%s1131_s1 + $0x78] sm:$0xff] (!%p141_p2) }
   0xb   : > { %v852_v25 = vpack.c.bf16 (!%p141_p2), %v229_v24, %v228_v23 }
   0xd   : > { %s1135_s13 = smov (!%p168_p3, %s682_s13), 1  ;;  %831 = vmatpush3.bf16.msra.mxu0 %v828_v5  ;;  %865 = vmatpush3.bf16.msra.mxu1 %v828_v5 }
   0xe   : > { %s694_s26 = sshll.u32 %s1135_s13, 8  ;;  %833 = vmatprep.subr.bf16.mxu0 %v832_v8  ;;  %858 = vmatprep.subr.bf16.mxu1 %v832_v8 }
   0xf   : > { %s942_s29 = scalar_lea.vmem %s1130_s0, %s694_s26  ;;  %s1011_s28 = scalar_lea.vmem %s1132_s2, %s694_s26 }
  0x10   : > { %v182_v11 = vld [vmem:[%s942_s29] sm:$0xff]  ;;  %v183_v26 = vld [vmem:[%s942_s29 + $0x8] sm:$0xff]  ;;  %v184_v28 = vld [vmem:[%s942_s29 + $0x10] sm:$0xff]  ;;  %s691_s26 = sshll.u32 %s1135_s13, 1 }
  0x11   : > { %776 = vmatprep.mubr.f32.mxu0 %v182_v11  ;;  %v198_v15 = vld [vmem:[%s942_s29 + $0x80] sm:$0xff]  ;;  %835 = vmatpush3.bf16.msra.mxu0 %v832_v8  ;;  %v199_v27 = vld [vmem:[%s942_s29 + $0x88] sm:$0xff]  ;;  %v200_v29 = vld [vmem:[%s942_s29 + $0x90] sm:$0xff]  ;;  %s181_s4 = scalar_lea.vmem %s1133_s3, %s691_s26 }
  0x12   : > { %866 = vmatpush3.bf16.msra.mxu1 %v832_v8  ;;  %837 = vmatprep.subr.bf16.mxu0 %v836_v12  ;;  %v185_v30 = vld [vmem:[%s942_s29 + $0x18] sm:$0xff]  ;;  %v186_v32 = vld [vmem:[%s942_s29 + $0x20] sm:$0xff]  ;;  %v187_v34 = vld [vmem:[%s942_s29 + $0x28] sm:$0xff] }
  0x13   : > { %859 = vmatprep.subr.bf16.mxu1 %v836_v12  ;;  %800 = vmatprep.mubr.f32.mxu1 %v198_v15  ;;  %v201_v31 = vld [vmem:[%s942_s29 + $0x98] sm:$0xff]  ;;  %v202_v33 = vld [vmem:[%s942_s29 + $0xa0] sm:$0xff]  ;;  %v203_v35 = vld [vmem:[%s942_s29 + $0xa8] sm:$0xff] }
  0x14   : > { %v188_v36 = vld [vmem:[%s942_s29 + $0x30] sm:$0xff]  ;;  %v189_v38 = vld [vmem:[%s942_s29 + $0x38] sm:$0xff]  ;;  %v190_v40 = vld [vmem:[%s942_s29 + $0x40] sm:$0xff] }
  0x15   : > { %839 = vmatpush3.bf16.msra.mxu0 %v836_v12  ;;  %v204_v37 = vld [vmem:[%s942_s29 + $0xb0] sm:$0xff]  ;;  %v205_v39 = vld [vmem:[%s942_s29 + $0xb8] sm:$0xff]  ;;  %v206_v41 = vld [vmem:[%s942_s29 + $0xc0] sm:$0xff] }
  0x16   : > { %867 = vmatpush3.bf16.msra.mxu1 %v836_v12  ;;  %841 = vmatprep.subr.bf16.mxu0 %v840_v16  ;;  %v191_v42 = vld [vmem:[%s942_s29 + $0x48] sm:$0xff]  ;;  %v192_v44 = vld [vmem:[%s942_s29 + $0x50] sm:$0xff]  ;;  %v193_v46 = vld [vmem:[%s942_s29 + $0x58] sm:$0xff] }
  0x17   : > { %860 = vmatprep.subr.bf16.mxu1 %v840_v16  ;;  %v207_v43 = vld [vmem:[%s942_s29 + $0xc8] sm:$0xff]  ;;  %v208_v45 = vld [vmem:[%s942_s29 + $0xd0] sm:$0xff]  ;;  %v209_v47 = vld [vmem:[%s942_s29 + $0xd8] sm:$0xff] }
  0x18   : > { %v194_v48 = vld [vmem:[%s942_s29 + $0x60] sm:$0xff]  ;;  %v195_v50 = vld [vmem:[%s942_s29 + $0x68] sm:$0xff]  ;;  %v196_v52 = vld [vmem:[%s942_s29 + $0x70] sm:$0xff] }
  0x19   : > { %843 = vmatpush3.bf16.msra.mxu0 %v840_v16  ;;  %v210_v49 = vld [vmem:[%s942_s29 + $0xe0] sm:$0xff]  ;;  %v211_v51 = vld [vmem:[%s942_s29 + $0xe8] sm:$0xff]  ;;  %v212_v53 = vld [vmem:[%s942_s29 + $0xf0] sm:$0xff] }
  0x1a   : > { %868 = vmatpush3.bf16.msra.mxu1 %v840_v16  ;;  %845 = vmatprep.subr.bf16.mxu0 %v844_v19  ;;  %v197_v54 = vld [vmem:[%s942_s29 + $0x78] sm:$0xff] }
  0x1b   : > { %861 = vmatprep.subr.bf16.mxu1 %v844_v19  ;;  %v213_v55 = vld [vmem:[%s942_s29 + $0xf8] sm:$0xff] }
  0x1d   : > { %847 = vmatpush3.bf16.msra.mxu0 %v844_v19 }
  0x1e   : > { %869 = vmatpush3.bf16.msra.mxu1 %v844_v19  ;;  %849 = vmatprep.subr.bf16.mxu0 %v848_v22 }
  0x1f   : > { %862 = vmatprep.subr.bf16.mxu1 %v848_v22 }
  0x21   : > { %851 = vmatpush3.bf16.msra.mxu0 %v848_v22 }
  0x22   : > { %870 = vmatpush3.bf16.msra.mxu1 %v848_v22  ;;  %853 = vmatprep.subr.bf16.mxu0 %v852_v25 }
  0x23   : > { %863 = vmatprep.subr.bf16.mxu1 %v852_v25 }
  0x25   : > { %855 = vmatpush3.bf16.msra.mxu0 %v852_v25 }
  0x26   : > { %871 = vmatpush3.bf16.msra.mxu1 %v852_v25 }
  0x28   : > { %777 = vmatmul.mubr.f32.vlgmr.msra.gmra.mrb[0].mxu0 %v183_v26 }
  0x29   : > { %801 = vmatmul.mubr.f32.vlgmr.msra.gmra.mrb[0].mxu1 %v199_v27  ;;  %779 = vmatprep.mubr.f32.mxu0 %v184_v28 }
  0x2a   : > { %803 = vmatprep.mubr.f32.mxu1 %v200_v29 }
  0x2c   : > { %780 = vmatmul.mubr.f32.gmra.mrb[2].mxu0 %v185_v30 }
  0x2d   : > { %804 = vmatmul.mubr.f32.gmra.mrb[2].mxu1 %v201_v31  ;;  %782 = vmatprep.mubr.f32.mxu0 %v186_v32 }
  0x2e   : > { %806 = vmatprep.mubr.f32.mxu1 %v202_v33 }
  0x30   : > { %783 = vmatmul.mubr.f32.gmra.mrb[4].mxu0 %v187_v34 }
  0x31   : > { %807 = vmatmul.mubr.f32.gmra.mrb[4].mxu1 %v203_v35  ;;  %785 = vmatprep.mubr.f32.mxu0 %v188_v36 }
  0x32   : > { %809 = vmatprep.mubr.f32.mxu1 %v204_v37 }
  0x34   : > { %786 = vmatmul.mubr.f32.gmra.mrb[6].mxu0 %v189_v38 }
  0x35   : > { %810 = vmatmul.mubr.f32.gmra.mrb[6].mxu1 %v205_v39  ;;  %788 = vmatprep.mubr.f32.mxu0 %v190_v40 }
  0x36   : > { %812 = vmatprep.mubr.f32.mxu1 %v206_v41 }
  0x38   : > { %789 = vmatmul.mubr.f32.gmra.mrb[8].mxu0 %v191_v42 }
  0x39   : > { %813 = vmatmul.mubr.f32.gmra.mrb[8].mxu1 %v207_v43  ;;  %791 = vmatprep.mubr.f32.mxu0 %v192_v44 }
  0x3a   : > { %815 = vmatprep.mubr.f32.mxu1 %v208_v45 }
  0x3c   : > { %792 = vmatmul.mubr.f32.gmra.mrb[10].mxu0 %v193_v46 }
  0x3d   : > { %816 = vmatmul.mubr.f32.gmra.mrb[10].mxu1 %v209_v47  ;;  %794 = vmatprep.mubr.f32.mxu0 %v194_v48 }
  0x3e   : > { %818 = vmatprep.mubr.f32.mxu1 %v210_v49 }
  0x40   : > { %795 = vmatmul.mubr.f32.gmra.mrb[12].mxu0 %v195_v50 }
  0x41   : > { %819 = vmatmul.mubr.f32.gmra.mrb[12].mxu1 %v211_v51  ;;  %797 = vmatprep.mubr.f32.mxu0 %v196_v52 }
  0x42   : > { %821 = vmatprep.mubr.f32.mxu1 %v212_v53 }
  0x44   : > { %798 = vmatmul.mubr.f32.gmra.mrb[14].mxu0 %v197_v54 }
  0x45   : > { %822 = vmatmul.mubr.f32.gmra.mrb[14].mxu1 %v213_v55 }
  0xfb   : > { %v778_v56 = vpop.f32.mrb[0].mxu0 }
  0xfc   : > { %v1013_v57 = vpop.f32.mrb[0].mxu1  ;;  %456 = vst [vmem:[%s1011_s28 + $0x8] sm:$0xff] %v778_v56  ;;  %v525_v58 = vmul.f32 %v778_v56, %v778_v56  ;;  %v296_v59 = vpop.f32.mrb[1].mxu0 }
  0xfd   : > { %472 = vst [vmem:[%s1011_s28 + $0x88] sm:$0xff] %v1013_v57  ;;  %v1018_v60 = vpop.f32.mrb[1].mxu1  ;;  %455 = vst [vmem:[%s1011_s28] sm:$0xff] %v296_v59  ;;  %v487_v61 = vadd.f32 %v778_v56, %v296_v59  ;;  %v524_v62 = vmul.f32 %v296_v59, %v296_v59 }
  0xfe   : > { %471 = vst [vmem:[%s1011_s28 + $0x80] sm:$0xff] %v1018_v60 }
  0xff   : > { %v556_v63 = vadd.f32 %v525_v58, %v524_v62  ;;  %v781_v0 = vpop.f32.mrb[2].mxu0 }
 0x100   : > { %v1023_v1 = vpop.f32.mrb[2].mxu1  ;;  %458 = vst [vmem:[%s1011_s28 + $0x18] sm:$0xff] %v781_v0  ;;  %v306_v2 = vpop.f32.mrb[3].mxu0  ;;  %v527_v6 = vmul.f32 %v781_v0, %v781_v0 }
 0x101   : > { %474 = vst [vmem:[%s1011_s28 + $0x98] sm:$0xff] %v1023_v1  ;;  %v1028_v3 = vpop.f32.mrb[3].mxu1  ;;  %457 = vst [vmem:[%s1011_s28 + $0x10] sm:$0xff] %v306_v2  ;;  %v488_v4 = vadd.f32 %v487_v61, %v306_v2  ;;  %v526_v5 = vmul.f32 %v306_v2, %v306_v2 }
 0x102   : > { %473 = vst [vmem:[%s1011_s28 + $0x90] sm:$0xff] %v1028_v3 }
 0x103   : > { %v557_v7 = vadd.f32 %v556_v63, %v526_v5  ;;  %v784_v8 = vpop.f32.mrb[4].mxu0  ;;  %v489_v9 = vadd.f32 %v781_v0, %v488_v4 }
 0x104   : > { %v1033_v10 = vpop.f32.mrb[4].mxu1  ;;  %460 = vst [vmem:[%s1011_s28 + $0x28] sm:$0xff] %v784_v8  ;;  %v316_v11 = vpop.f32.mrb[5].mxu0  ;;  %v529_v16 = vmul.f32 %v784_v8, %v784_v8 }
 0x105   : > { %476 = vst [vmem:[%s1011_s28 + $0xa8] sm:$0xff] %v1033_v10  ;;  %v1038_v12 = vpop.f32.mrb[5].mxu1  ;;  %459 = vst [vmem:[%s1011_s28 + $0x20] sm:$0xff] %v316_v11  ;;  %v490_v13 = vadd.f32 %v489_v9, %v316_v11  ;;  %v528_v14 = vmul.f32 %v316_v11, %v316_v11  ;;  %v558_v15 = vadd.f32 %v557_v7, %v527_v6 }
 0x106   : > { %475 = vst [vmem:[%s1011_s28 + $0xa0] sm:$0xff] %v1038_v12  ;;  %v540_v9 = vmul.f32 %v1018_v60, %v1018_v60 }
 0x107   : > { %v559_v17 = vadd.f32 %v558_v15, %v528_v14  ;;  %v787_v18 = vpop.f32.mrb[6].mxu0  ;;  %v491_v19 = vadd.f32 %v784_v8, %v490_v13  ;;  %v541_v14 = vmul.f32 %v1013_v57, %v1013_v57 }
 0x108   : > { %v1043_v20 = vpop.f32.mrb[6].mxu1  ;;  %462 = vst [vmem:[%s1011_s28 + $0x38] sm:$0xff] %v787_v18  ;;  %v326_v21 = vpop.f32.mrb[7].mxu0  ;;  %v531_v26 = vmul.f32 %v787_v18, %v787_v18 }
 0x109   : > { %478 = vst [vmem:[%s1011_s28 + $0xb8] sm:$0xff] %v1043_v20  ;;  %v1048_v22 = vpop.f32.mrb[7].mxu1  ;;  %461 = vst [vmem:[%s1011_s28 + $0x30] sm:$0xff] %v326_v21  ;;  %v492_v23 = vadd.f32 %v491_v19, %v326_v21  ;;  %v530_v24 = vmul.f32 %v326_v21, %v326_v21  ;;  %v560_v25 = vadd.f32 %v559_v17, %v529_v16 }
 0x10a   : > { %477 = vst [vmem:[%s1011_s28 + $0xb0] sm:$0xff] %v1048_v22  ;;  %v542_v17 = vmul.f32 %v1028_v3, %v1028_v3  ;;  %v543_v21 = vmul.f32 %v1023_v1, %v1023_v1 }
 0x10b   : > { %v561_v27 = vadd.f32 %v560_v25, %v530_v24  ;;  %v790_v28 = vpop.f32.mrb[8].mxu0  ;;  %v493_v29 = vadd.f32 %v787_v18, %v492_v23 }
 0x10c   : > { %v1053_v30 = vpop.f32.mrb[8].mxu1  ;;  %464 = vst [vmem:[%s1011_s28 + $0x48] sm:$0xff] %v790_v28  ;;  %v336_v31 = vpop.f32.mrb[9].mxu0  ;;  %v533_v36 = vmul.f32 %v790_v28, %v790_v28 }
 0x10d   : > { %480 = vst [vmem:[%s1011_s28 + $0xc8] sm:$0xff] %v1053_v30  ;;  %v1058_v32 = vpop.f32.mrb[9].mxu1  ;;  %463 = vst [vmem:[%s1011_s28 + $0x40] sm:$0xff] %v336_v31  ;;  %v494_v33 = vadd.f32 %v493_v29, %v336_v31  ;;  %v532_v34 = vmul.f32 %v336_v31, %v336_v31  ;;  %v562_v35 = vadd.f32 %v561_v27, %v531_v26 }
 0x10e   : > { %479 = vst [vmem:[%s1011_s28 + $0xc0] sm:$0xff] %v1058_v32 }
 0x10f   : > { %v563_v37 = vadd.f32 %v562_v35, %v532_v34  ;;  %v793_v38 = vpop.f32.mrb[10].mxu0  ;;  %v495_v39 = vadd.f32 %v790_v28, %v494_v33 }
 0x110   : > { %v1063_v40 = vpop.f32.mrb[10].mxu1  ;;  %466 = vst [vmem:[%s1011_s28 + $0x58] sm:$0xff] %v793_v38  ;;  %v346_v41 = vpop.f32.mrb[11].mxu0  ;;  %v535_v46 = vmul.f32 %v793_v38, %v793_v38 }
 0x111   : > { %482 = vst [vmem:[%s1011_s28 + $0xd8] sm:$0xff] %v1063_v40  ;;  %v1068_v42 = vpop.f32.mrb[11].mxu1  ;;  %465 = vst [vmem:[%s1011_s28 + $0x50] sm:$0xff] %v346_v41  ;;  %v496_v43 = vadd.f32 %v495_v39, %v346_v41  ;;  %v534_v44 = vmul.f32 %v346_v41, %v346_v41  ;;  %v564_v45 = vadd.f32 %v563_v37, %v533_v36 }
 0x112   : > { %481 = vst [vmem:[%s1011_s28 + $0xd0] sm:$0xff] %v1068_v42 }
 0x113   : > { %v565_v47 = vadd.f32 %v564_v45, %v534_v44  ;;  %v796_v48 = vpop.f32.mrb[12].mxu0  ;;  %v497_v49 = vadd.f32 %v793_v38, %v496_v43 }
 0x114   : > { %v1073_v50 = vpop.f32.mrb[12].mxu1  ;;  %468 = vst [vmem:[%s1011_s28 + $0x68] sm:$0xff] %v796_v48  ;;  %v356_v51 = vpop.f32.mrb[13].mxu0  ;;  %v537_v56 = vmul.f32 %v796_v48, %v796_v48 }
 0x115   : > { %484 = vst [vmem:[%s1011_s28 + $0xe8] sm:$0xff] %v1073_v50  ;;  %v436_v52 = vpop.f32.mrb[13].mxu1  ;;  %467 = vst [vmem:[%s1011_s28 + $0x60] sm:$0xff] %v356_v51  ;;  %v498_v53 = vadd.f32 %v497_v49, %v356_v51  ;;  %v536_v54 = vmul.f32 %v356_v51, %v356_v51  ;;  %v566_v55 = vadd.f32 %v565_v47, %v535_v46 }
 0x116   : > { %483 = vst [vmem:[%s1011_s28 + $0xe0] sm:$0xff] %v436_v52  ;;  %v553_v47 = vmul.f32 %v1073_v50, %v1073_v50 }
 0x117   : > { %v567_v58 = vadd.f32 %v566_v55, %v536_v54  ;;  %v799_v59 = vpop.f32.mrb[14].mxu0  ;;  %v499_v61 = vadd.f32 %v796_v48, %v498_v53 }
 0x118   : > { %v823_v62 = vpop.f32.mrb[14].mxu1  ;;  %470 = vst [vmem:[%s1011_s28 + $0x78] sm:$0xff] %v799_v59  ;;  %v366_v63 = vpop.f32.mrb[15].mxu0  ;;  %v539_v6 = vmul.f32 %v799_v59, %v799_v59 }
 0x119   : > { %486 = vst [vmem:[%s1011_s28 + $0xf8] sm:$0xff] %v823_v62  ;;  %v446_v0 = vpop.f32.mrb[15].mxu1  ;;  %469 = vst [vmem:[%s1011_s28 + $0x70] sm:$0xff] %v366_v63  ;;  %v500_v2 = vadd.f32 %v499_v61, %v366_v63  ;;  %v538_v4 = vmul.f32 %v366_v63, %v366_v63  ;;  %v568_v5 = vadd.f32 %v567_v58, %v537_v56 }
 0x11a   : > { %485 = vst [vmem:[%s1011_s28 + $0xf0] sm:$0xff] %v446_v0  ;;  %v554_v49 = vmul.f32 %v446_v0, %v446_v0  ;;  %v555_v53 = vmul.f32 %v823_v62, %v823_v62 }
 0x11b   : > { %v501_v7 = vadd.f32 %v799_v59, %v500_v2  ;;  %v569_v8 = vadd.f32 %v568_v5, %v538_v4 }
 0x11d   : > { %v570_v11 = vadd.f32 %v569_v8, %v539_v6  ;;  %v502_v13 = vadd.f32 %v501_v7, %v1018_v60  ;;  %v544_v60 = vmul.f32 %v1038_v12, %v1038_v12 }
 0x11f   : > { %v571_v15 = vadd.f32 %v570_v11, %v540_v9  ;;  %v503_v16 = vadd.f32 %v1013_v57, %v502_v13  ;;  %v545_v57 = vmul.f32 %v1033_v10, %v1033_v10 }
 0x121   : > { %v504_v18 = vadd.f32 %v503_v16, %v1028_v3  ;;  %v572_v19 = vadd.f32 %v571_v15, %v541_v14  ;;  %v546_v3 = vmul.f32 %v1048_v22, %v1048_v22 }
 0x123   : > { %v573_v23 = vadd.f32 %v572_v19, %v542_v17  ;;  %v505_v24 = vadd.f32 %v1023_v1, %v504_v18  ;;  %v547_v1 = vmul.f32 %v1043_v20, %v1043_v20 }
 0x125   : > { %v506_v25 = vadd.f32 %v505_v24, %v1038_v12  ;;  %v574_v26 = vadd.f32 %v573_v23, %v543_v21  ;;  %v548_v12 = vmul.f32 %v1058_v32, %v1058_v32 }
 0x127   : > { %v575_v27 = vadd.f32 %v574_v26, %v544_v60  ;;  %v507_v28 = vadd.f32 %v1033_v10, %v506_v25  ;;  %v549_v10 = vmul.f32 %v1053_v30, %v1053_v30 }
 0x129   : > { %v508_v29 = vadd.f32 %v507_v28, %v1048_v22  ;;  %v576_v31 = vadd.f32 %v575_v27, %v545_v57  ;;  %v550_v22 = vmul.f32 %v1068_v42, %v1068_v42 }
 0x12b   : > { %v577_v33 = vadd.f32 %v576_v31, %v546_v3  ;;  %v509_v34 = vadd.f32 %v1043_v20, %v508_v29  ;;  %v551_v20 = vmul.f32 %v1063_v40, %v1063_v40 }
 0x12d   : > { %v510_v35 = vadd.f32 %v509_v34, %v1058_v32  ;;  %v578_v36 = vadd.f32 %v577_v33, %v547_v1  ;;  %v552_v32 = vmul.f32 %v436_v52, %v436_v52 }
 0x12f   : > { %v579_v37 = vadd.f32 %v578_v36, %v548_v12  ;;  %v511_v38 = vadd.f32 %v1053_v30, %v510_v35 }
 0x131   : > { %v512_v39 = vadd.f32 %v511_v38, %v1068_v42  ;;  %v580_v41 = vadd.f32 %v579_v37, %v549_v10 }
 0x133   : > { %v581_v43 = vadd.f32 %v580_v41, %v550_v22  ;;  %v513_v44 = vadd.f32 %v1063_v40, %v512_v39 }
 0x135   : > { %v514_v45 = vadd.f32 %v513_v44, %v436_v52  ;;  %v582_v46 = vadd.f32 %v581_v43, %v551_v20 }
 0x137   : > { %v583_v48 = vadd.f32 %v582_v46, %v552_v32  ;;  %v515_v30 = vadd.f32 %v1073_v50, %v514_v45 }
 0x139   : > { %v516_v51 = vadd.f32 %v515_v30, %v446_v0  ;;  %v584_v42 = vadd.f32 %v583_v48, %v553_v47 }
 0x13b   : > { %v517_v54 = vadd.f32 %v823_v62, %v516_v51  ;;  %v585_v55 = vadd.f32 %v584_v42, %v554_v49 }
 0x13d   : > { %v518_v56 = vrot.slane %v517_v54, 4  ;;  %v586_v58 = vadd.f32 %v585_v55, %v555_v53 }
 0x13f   : > { %v519_v59 = vadd.f32 %v518_v56, %v517_v54  ;;  %v587_v40 = vrot.slane %v586_v58, 4 }
 0x141   : > { %v520_v61 = vrot.slane %v519_v59, 2  ;;  %v588_v52 = vadd.f32 %v587_v40, %v586_v58 }
 0x143   : > { %v521_v63 = vadd.f32 %v520_v61, %v519_v59  ;;  %v589_v2 = vrot.slane %v588_v52, 2 }
 0x145   : > { %v522_v4 = vrot.slane %v521_v63, 1  ;;  %v590_v5 = vadd.f32 %v589_v2, %v588_v52 }
 0x147   : > { %v591_v6 = vrot.slane %v590_v5, 1  ;;  %v523_v50 = vadd.f32 %v522_v4, %v521_v63 }
 0x149   : > { %v592_v62 = vadd.f32 %v591_v6, %v590_v5 }
 0x14b   : > { %v594_v0 = vsel %vm593_vm0, %v523_v50, %v592_v62 }
 0x14c   : > { %595 = vst [vmem:[%s181_s4] sm:$0x3] %v594_v0 }
 0x14d PF: > { %s14_s12 = sadd.s32 1, %s886_s12  }
 0x14e   : > { %p11_p4 = scmp.ge.s32.totalorder %s14_s12, 4  }
 0x150   :  { %13 = sbr.rel (!%p11_p4) target bundleno = 1 (0x1), region = 70 }

// kernel: bottleneck_forward.7
= control target key start
LH: loop header
LB: loop body
LE: loop exit
PB: predicated region body
PF: predicated region fallthrough
CT: control target
= control target key end

     0   :  { %s582_s15 = smov 0   ;;  %s783_s0 = inlined_call_operand.vmem [shape: f32[2,256,128], index: 0, kind: input, shape index: {}]   ;;  %s784_s1 = inlined_call_operand.vmem [shape: f32[2,256,128], index: 1, kind: input, shape index: {}]   ;;  %s785_s2 = inlined_call_operand.vmem [shape: f32[1,128], index: 2, kind: input, shape index: {}]   ;;  %s786_s3 = inlined_call_operand.vmem [shape: f32[1,128], index: 3, kind: input, shape index: {}]   ;;  %s787_s4 = inlined_call_operand.vmem [shape: f32[2,256,128], index: 4, kind: output, shape index: {}]  }
   0x1 LB: > { %s523_s16 = sadd.s32 4294967295, %s555_s15   ;;  %p527_p0 = scmp.ge.s32.totalorder %s555_s15, 1  ;;  %s555_s15 = sphi %s582_s15, %s14_s15  }
   0x2   : > { %p172_p1 = scmp.lt.s32.totalorder %s555_s15, 3 }
   0x4   : > { %p173_p2 = pnand %p527_p0, %p172_p1 }
   0x5   : > { %p203_p3 = scmp.lt.s32.totalorder (!%p173_p2), %s523_s16, 1  ;;  %v595_v0 = vld [vmem:[%s785_s2] ss:$0 sm:$0xff] (!%p173_p2) }
   0x6   : > { %176 = sbr.rel (%p173_p2) target bundleno = 55 (0x37), region = 36  ;;  %v613_v2 = vld [vmem:[%s786_s3] ss:$0 sm:$0xff] (!%p173_p2) }
   0xd   : > { %s789_s16 = smov (!%p203_p3, %s523_s16), 1 }
   0xe   : > { %s590_s17 = sshll.u32 %s789_s16, 8 }
   0xf   : > { %s601_s22 = scalar_lea.vmem %s783_s0, %s590_s17  ;;  %s607_s25 = scalar_lea.vmem %s784_s1, %s590_s17 }
  0x10   : > { %v218_v1 = vld [vmem:[%s601_s22] sm:$0xff]  ;;  %v219_v3 = vld [vmem:[%s601_s22 + $0x8] sm:$0xff]  ;;  %v220_v7 = vld [vmem:[%s601_s22 + $0x10] sm:$0xff]  ;;  %s643_s30 = scalar_lea.vmem %s787_s4, %s590_s17 }
  0x11   : > { %v257_v4 = vmul.f32 %v595_v0, %v218_v1  ;;  %v328_v5 = vld [vmem:[%s607_s25] sm:$0xff]  ;;  %v258_v6 = vmul.f32 %v595_v0, %v219_v3  ;;  %v329_v8 = vld [vmem:[%s607_s25 + $0x8] sm:$0xff]  ;;  %v259_v9 = vmul.f32 %v595_v0, %v220_v7  ;;  %v221_v10 = vld [vmem:[%s601_s22 + $0x18] sm:$0xff] }
  0x12   : > { %v222_v11 = vld [vmem:[%s601_s22 + $0x20] sm:$0xff]  ;;  %v330_v14 = vld [vmem:[%s607_s25 + $0x10] sm:$0xff]  ;;  %v260_v15 = vmul.f32 %v595_v0, %v221_v10  ;;  %v331_v16 = vld [vmem:[%s607_s25 + $0x18] sm:$0xff] }
  0x13   : > { %v296_v12 = vadd.f32 %v613_v2, %v257_v4  ;;  %v297_v13 = vadd.f32 %v613_v2, %v258_v6  ;;  %v261_v17 = vmul.f32 %v595_v0, %v222_v11  ;;  %v223_v18 = vld [vmem:[%s601_s22 + $0x28] sm:$0xff]  ;;  %v298_v19 = vadd.f32 %v613_v2, %v259_v9  ;;  %v332_v20 = vld [vmem:[%s607_s25 + $0x20] sm:$0xff]  ;;  %v224_v22 = vld [vmem:[%s601_s22 + $0x30] sm:$0xff] }
  0x14   : > { %v262_v21 = vmul.f32 %v595_v0, %v223_v18  ;;  %v225_v23 = vld [vmem:[%s601_s22 + $0x38] sm:$0xff]  ;;  %v299_v26 = vadd.f32 %v613_v2, %v260_v15  ;;  %v333_v28 = vld [vmem:[%s607_s25 + $0x28] sm:$0xff]  ;;  %v263_v31 = vmul.f32 %v595_v0, %v224_v22  ;;  %v226_v33 = vld [vmem:[%s601_s22 + $0x40] sm:$0xff] }
  0x15   : > { %v360_v24 = vadd.f32 %v328_v5, %v296_v12  ;;  %v361_v25 = vadd.f32 %v329_v8, %v297_v13  ;;  %v300_v27 = vadd.f32 %v613_v2, %v261_v17  ;;  %v362_v29 = vadd.f32 %v330_v14, %v298_v19  ;;  %v227_v34 = vld [vmem:[%s601_s22 + $0x48] sm:$0xff]  ;;  %v334_v39 = vld [vmem:[%s607_s25 + $0x30] sm:$0xff]  ;;  %v335_v40 = vld [vmem:[%s607_s25 + $0x38] sm:$0xff] }
  0x16   : > { %v301_v30 = vadd.f32 %v613_v2, %v262_v21  ;;  %v264_v32 = vmul.f32 %v595_v0, %v225_v23  ;;  %v363_v37 = vadd.f32 %v331_v16, %v299_v26  ;;  %v228_v41 = vld [vmem:[%s601_s22 + $0x50] sm:$0xff]  ;;  %v302_v44 = vadd.f32 %v613_v2, %v263_v31  ;;  %v229_v46 = vld [vmem:[%s601_s22 + $0x58] sm:$0xff]  ;;  %v230_v47 = vld [vmem:[%s601_s22 + $0x60] sm:$0xff] }
  0x17   : > { %v392_v35 = vmax.f32 %v360_v24, 0.0  ;;  %v393_v36 = vmax.f32 %v361_v25, 0.0  ;;  %v364_v38 = vadd.f32 %v332_v20, %v300_v27  ;;  %v394_v42 = vmax.f32 %v362_v29, 0.0  ;;  %v231_v52 = vld [vmem:[%s601_s22 + $0x68] sm:$0xff]  ;;  %v336_v56 = vld [vmem:[%s607_s25 + $0x40] sm:$0xff]  ;;  %v338_v61 = vld [vmem:[%s607_s25 + $0x50] sm:$0xff] }
  0x18   : > { %v365_v43 = vadd.f32 %v333_v28, %v301_v30  ;;  %v303_v45 = vadd.f32 %v613_v2, %v264_v32  ;;  %v395_v48 = vmax.f32 %v363_v37, 0.0  ;;  %v265_v50 = vmul.f32 %v595_v0, %v226_v33  ;;  %v337_v57 = vld [vmem:[%s607_s25 + $0x48] sm:$0xff]  ;;  %v232_v1 = vld [vmem:[%s601_s22 + $0x70] sm:$0xff]  ;;  %v233_v3 = vld [vmem:[%s601_s22 + $0x78] sm:$0xff] }
  0x19   : > { %424 = vst [vmem:[%s643_s30] sm:$0xff] %v392_v35  ;;  %425 = vst [vmem:[%s643_s30 + $0x8] sm:$0xff] %v393_v36  ;;  %v396_v49 = vmax.f32 %v364_v38, 0.0  ;;  %v266_v51 = vmul.f32 %v595_v0, %v227_v34  ;;  %v366_v54 = vadd.f32 %v334_v39, %v302_v44  ;;  %v267_v58 = vmul.f32 %v595_v0, %v228_v41  ;;  %v339_v7 = vld [vmem:[%s607_s25 + $0x58] sm:$0xff]  ;;  %v340_v8 = vld [vmem:[%s607_s25 + $0x60] sm:$0xff] }
  0x1a   : > { %426 = vst [vmem:[%s643_s30 + $0x10] sm:$0xff] %v394_v42  ;;  %v397_v53 = vmax.f32 %v365_v43, 0.0  ;;  %v367_v55 = vadd.f32 %v335_v40, %v303_v45  ;;  %427 = vst [vmem:[%s643_s30 + $0x18] sm:$0xff] %v395_v48  ;;  %v304_v59 = vadd.f32 %v613_v2, %v265_v50  ;;  %v268_v62 = vmul.f32 %v595_v0, %v229_v46  ;;  %v341_v14 = vld [vmem:[%s607_s25 + $0x68] sm:$0xff]  ;;  %v234_v19 = vld [vmem:[%s601_s22 + $0x80] sm:$0xff] }
  0x1b   : > { %428 = vst [vmem:[%s643_s30 + $0x20] sm:$0xff] %v396_v49  ;;  %v305_v60 = vadd.f32 %v613_v2, %v266_v51  ;;  %v269_v63 = vmul.f32 %v595_v0, %v230_v47  ;;  %v398_v4 = vmax.f32 %v366_v54, 0.0  ;;  %v306_v6 = vadd.f32 %v613_v2, %v267_v58  ;;  %v235_v20 = vld [vmem:[%s601_s22 + $0x88] sm:$0xff]  ;;  %v342_v25 = vld [vmem:[%s607_s25 + $0x70] sm:$0xff]  ;;  %v343_v26 = vld [vmem:[%s607_s25 + $0x78] sm:$0xff] }
  0x1c   : > { %429 = vst [vmem:[%s643_s30 + $0x28] sm:$0xff] %v397_v53  ;;  %v399_v5 = vmax.f32 %v367_v55, 0.0  ;;  %v270_v9 = vmul.f32 %v595_v0, %v231_v52  ;;  %v368_v10 = vadd.f32 %v336_v56, %v304_v59  ;;  %v307_v12 = vadd.f32 %v613_v2, %v268_v62  ;;  %v236_v27 = vld [vmem:[%s601_s22 + $0x90] sm:$0xff]  ;;  %v237_v32 = vld [vmem:[%s601_s22 + $0x98] sm:$0xff]  ;;  %v238_v33 = vld [vmem:[%s601_s22 + $0xa0] sm:$0xff] }
  0x1d   : > { %v369_v11 = vadd.f32 %v337_v57, %v305_v60  ;;  %v308_v13 = vadd.f32 %v613_v2, %v269_v63  ;;  %430 = vst [vmem:[%s643_s30 + $0x30] sm:$0xff] %v398_v4  ;;  %v370_v15 = vadd.f32 %v338_v61, %v306_v6  ;;  %v271_v17 = vmul.f32 %v595_v0, %v232_v1  ;;  %v239_v38 = vld [vmem:[%s601_s22 + $0xa8] sm:$0xff]  ;;  %v344_v42 = vld [vmem:[%s607_s25 + $0x80] sm:$0xff]  ;;  %v346_v47 = vld [vmem:[%s607_s25 + $0x90] sm:$0xff] }
  0x1e   : > { %431 = vst [vmem:[%s643_s30 + $0x38] sm:$0xff] %v399_v5  ;;  %v309_v16 = vadd.f32 %v613_v2, %v270_v9  ;;  %v272_v18 = vmul.f32 %v595_v0, %v233_v3  ;;  %v400_v21 = vmax.f32 %v368_v10, 0.0  ;;  %v371_v23 = vadd.f32 %v339_v7, %v307_v12  ;;  %v345_v43 = vld [vmem:[%s607_s25 + $0x88] sm:$0xff]  ;;  %v240_v50 = vld [vmem:[%s601_s22 + $0xb0] sm:$0xff]  ;;  %v241_v51 = vld [vmem:[%s601_s22 + $0xb8] sm:$0xff] }
  0x1f   : > { %v401_v22 = vmax.f32 %v369_v11, 0.0  ;;  %v372_v24 = vadd.f32 %v340_v8, %v308_v13  ;;  %v402_v28 = vmax.f32 %v370_v15, 0.0  ;;  %v310_v30 = vadd.f32 %v613_v2, %v271_v17  ;;  %v347_v55 = vld [vmem:[%s607_s25 + $0x98] sm:$0xff]  ;;  %v348_v56 = vld [vmem:[%s607_s25 + $0xa0] sm:$0xff]  ;;  %v349_v62 = vld [vmem:[%s607_s25 + $0xa8] sm:$0xff] }
  0x20   : > { %v373_v29 = vadd.f32 %v341_v14, %v309_v16  ;;  %v311_v31 = vadd.f32 %v613_v2, %v272_v18  ;;  %432 = vst [vmem:[%s643_s30 + $0x40] sm:$0xff] %v400_v21  ;;  %v403_v34 = vmax.f32 %v371_v23, 0.0  ;;  %v273_v36 = vmul.f32 %v595_v0, %v234_v19  ;;  %v242_v5 = vld [vmem:[%s601_s22 + $0xc0] sm:$0xff]  ;;  %v243_v6 = vld [vmem:[%s601_s22 + $0xc8] sm:$0xff]  ;;  %v350_v11 = vld [vmem:[%s607_s25 + $0xb0] sm:$0xff] }
  0x21   : > { %433 = vst [vmem:[%s643_s30 + $0x48] sm:$0xff] %v401_v22  ;;  %v404_v35 = vmax.f32 %v372_v24, 0.0  ;;  %v274_v37 = vmul.f32 %v595_v0, %v235_v20  ;;  %434 = vst [vmem:[%s643_s30 + $0x50] sm:$0xff] %v402_v28  ;;  %v374_v40 = vadd.f32 %v342_v25, %v310_v30  ;;  %v275_v44 = vmul.f32 %v595_v0, %v236_v27  ;;  %v351_v12 = vld [vmem:[%s607_s25 + $0xb8] sm:$0xff]  ;;  %v244_v13 = vld [vmem:[%s601_s22 + $0xd0] sm:$0xff] }
  0x22   : > { %v405_v39 = vmax.f32 %v373_v29, 0.0  ;;  %v375_v41 = vadd.f32 %v343_v26, %v311_v31  ;;  %435 = vst [vmem:[%s643_s30 + $0x58] sm:$0xff] %v403_v34  ;;  %v312_v45 = vadd.f32 %v613_v2, %v273_v36  ;;  %v276_v48 = vmul.f32 %v595_v0, %v237_v32  ;;  %v245_v18 = vld [vmem:[%s601_s22 + $0xd8] sm:$0xff]  ;;  %v246_v19 = vld [vmem:[%s601_s22 + $0xe0] sm:$0xff]  ;;  %v247_v24 = vld [vmem:[%s601_s22 + $0xe8] sm:$0xff] }
  0x23   : > { %436 = vst [vmem:[%s643_s30 + $0x60] sm:$0xff] %v404_v35  ;;  %v313_v46 = vadd.f32 %v613_v2, %v274_v37  ;;  %v277_v49 = vmul.f32 %v595_v0, %v238_v33  ;;  %v406_v52 = vmax.f32 %v374_v40, 0.0  ;;  %v314_v54 = vadd.f32 %v613_v2, %v275_v44  ;;  %v352_v28 = vld [vmem:[%s607_s25 + $0xc0] sm:$0xff]  ;;  %v353_v29 = vld [vmem:[%s607_s25 + $0xc8] sm:$0xff]  ;;  %v354_v33 = vld [vmem:[%s607_s25 + $0xd0] sm:$0xff] }
  0x24   : > { %437 = vst [vmem:[%s643_s30 + $0x68] sm:$0xff] %v405_v39  ;;  %v407_v53 = vmax.f32 %v375_v41, 0.0  ;;  %v278_v57 = vmul.f32 %v595_v0, %v239_v38  ;;  %v376_v58 = vadd.f32 %v344_v42, %v312_v45  ;;  %v315_v60 = vadd.f32 %v613_v2, %v276_v48  ;;  %v248_v36 = vld [vmem:[%s601_s22 + $0xf0] sm:$0xff]  ;;  %v249_v37 = vld [vmem:[%s601_s22 + $0xf8] sm:$0xff]  ;;  %v356_v42 = vld [vmem:[%s607_s25 + $0xe0] sm:$0xff] }
  0x25   : > { %v377_v59 = vadd.f32 %v345_v43, %v313_v46  ;;  %v316_v61 = vadd.f32 %v613_v2, %v277_v49  ;;  %438 = vst [vmem:[%s643_s30 + $0x70] sm:$0xff] %v406_v52  ;;  %v378_v63 = vadd.f32 %v346_v47, %v314_v54  ;;  %v279_v3 = vmul.f32 %v595_v0, %v240_v50  ;;  %v355_v41 = vld [vmem:[%s607_s25 + $0xd8] sm:$0xff]  ;;  %v357_v48 = vld [vmem:[%s607_s25 + $0xe8] sm:$0xff] }
  0x26   : > { %439 = vst [vmem:[%s643_s30 + $0x78] sm:$0xff] %v407_v53  ;;  %v317_v1 = vadd.f32 %v613_v2, %v278_v57  ;;  %v280_v4 = vmul.f32 %v595_v0, %v241_v51  ;;  %v408_v7 = vmax.f32 %v376_v58, 0.0  ;;  %v379_v9 = vadd.f32 %v347_v55, %v315_v60  ;;  %v358_v57 = vld [vmem:[%s607_s25 + $0xf0] sm:$0xff]  ;;  %v359_v58 = vld [vmem:[%s607_s25 + $0xf8] sm:$0xff] }
  0x27   : > { %v409_v8 = vmax.f32 %v377_v59, 0.0  ;;  %v380_v10 = vadd.f32 %v348_v56, %v316_v61  ;;  %v410_v14 = vmax.f32 %v378_v63, 0.0  ;;  %v318_v16 = vadd.f32 %v613_v2, %v279_v3 }
  0x28   : > { %v381_v15 = vadd.f32 %v349_v62, %v317_v1  ;;  %v319_v17 = vadd.f32 %v613_v2, %v280_v4  ;;  %440 = vst [vmem:[%s643_s30 + $0x80] sm:$0xff] %v408_v7  ;;  %v411_v20 = vmax.f32 %v379_v9, 0.0  ;;  %v281_v22 = vmul.f32 %v595_v0, %v242_v5 }
  0x29   : > { %441 = vst [vmem:[%s643_s30 + $0x88] sm:$0xff] %v409_v8  ;;  %v412_v21 = vmax.f32 %v380_v10, 0.0  ;;  %v282_v23 = vmul.f32 %v595_v0, %v243_v6  ;;  %442 = vst [vmem:[%s643_s30 + $0x90] sm:$0xff] %v410_v14  ;;  %v382_v26 = vadd.f32 %v350_v11, %v318_v16  ;;  %v283_v30 = vmul.f32 %v595_v0, %v244_v13 }
  0x2a   : > { %v413_v25 = vmax.f32 %v381_v15, 0.0  ;;  %v383_v27 = vadd.f32 %v351_v12, %v319_v17  ;;  %443 = vst [vmem:[%s643_s30 + $0x98] sm:$0xff] %v411_v20  ;;  %v320_v31 = vadd.f32 %v613_v2, %v281_v22  ;;  %v284_v34 = vmul.f32 %v595_v0, %v245_v18 }
  0x2b   : > { %444 = vst [vmem:[%s643_s30 + $0xa0] sm:$0xff] %v412_v21  ;;  %v321_v32 = vadd.f32 %v613_v2, %v282_v23  ;;  %v285_v35 = vmul.f32 %v595_v0, %v246_v19  ;;  %v414_v38 = vmax.f32 %v382_v26, 0.0  ;;  %v322_v40 = vadd.f32 %v613_v2, %v283_v30 }
  0x2c   : > { %445 = vst [vmem:[%s643_s30 + $0xa8] sm:$0xff] %v413_v25  ;;  %v415_v39 = vmax.f32 %v383_v27, 0.0  ;;  %v286_v43 = vmul.f32 %v595_v0, %v247_v24  ;;  %v384_v44 = vadd.f32 %v352_v28, %v320_v31  ;;  %v323_v46 = vadd.f32 %v613_v2, %v284_v34 }
  0x2d   : > { %v385_v45 = vadd.f32 %v353_v29, %v321_v32  ;;  %v324_v47 = vadd.f32 %v613_v2, %v285_v35  ;;  %446 = vst [vmem:[%s643_s30 + $0xb0] sm:$0xff] %v414_v38  ;;  %v386_v49 = vadd.f32 %v354_v33, %v322_v40  ;;  %v287_v51 = vmul.f32 %v595_v0, %v248_v36 }
  0x2e   : > { %447 = vst [vmem:[%s643_s30 + $0xb8] sm:$0xff] %v415_v39  ;;  %v325_v50 = vadd.f32 %v613_v2, %v286_v43  ;;  %v288_v52 = vmul.f32 %v595_v0, %v249_v37  ;;  %v416_v53 = vmax.f32 %v384_v44, 0.0  ;;  %v387_v55 = vadd.f32 %v355_v41, %v323_v46 }
  0x2f   : > { %v417_v54 = vmax.f32 %v385_v45, 0.0  ;;  %v388_v56 = vadd.f32 %v356_v42, %v324_v47  ;;  %v418_v59 = vmax.f32 %v386_v49, 0.0  ;;  %v326_v61 = vadd.f32 %v613_v2, %v287_v51 }
  0x30   : > { %v389_v60 = vadd.f32 %v357_v48, %v325_v50  ;;  %v327_v62 = vadd.f32 %v613_v2, %v288_v52  ;;  %448 = vst [vmem:[%s643_s30 + $0xc0] sm:$0xff] %v416_v53  ;;  %v419_v0 = vmax.f32 %v387_v55, 0.0 }
  0x31   : > { %449 = vst [vmem:[%s643_s30 + $0xc8] sm:$0xff] %v417_v54  ;;  %v420_v63 = vmax.f32 %v388_v56, 0.0  ;;  %450 = vst [vmem:[%s643_s30 + $0xd0] sm:$0xff] %v418_v59  ;;  %v390_v3 = vadd.f32 %v358_v57, %v326_v61 }
  0x32   : > { %v421_v1 = vmax.f32 %v389_v60, 0.0  ;;  %v391_v4 = vadd.f32 %v359_v58, %v327_v62  ;;  %451 = vst [vmem:[%s643_s30 + $0xd8] sm:$0xff] %v419_v0 }
  0x33   : > { %452 = vst [vmem:[%s643_s30 + $0xe0] sm:$0xff] %v420_v63  ;;  %v422_v5 = vmax.f32 %v390_v3, 0.0 }
  0x34   : > { %453 = vst [vmem:[%s643_s30 + $0xe8] sm:$0xff] %v421_v1  ;;  %v423_v6 = vmax.f32 %v391_v4, 0.0 }
  0x35   : > { %454 = vst [vmem:[%s643_s30 + $0xf0] sm:$0xff] %v422_v5 }
  0x36   : > { %455 = vst [vmem:[%s643_s30 + $0xf8] sm:$0xff] %v423_v6 }
  0x37 PF: > { %s14_s15 = sadd.s32 1, %s555_s15  }
  0x38   : > { %p11_p4 = scmp.ge.s32.totalorder %s14_s15, 4  }
  0x3a   :  { %13 = sbr.rel (!%p11_p4) target bundleno = 1 (0x1), region = 69 }

// kernel: bottleneck_forward.6
= control target key start
LH: loop header
LB: loop body
LE: loop exit
PB: predicated region body
PF: predicated region fallthrough
CT: control target
= control target key end

     0   :  { %s1084_s18 = smov 0   ;;  %s1380_s0 = inlined_call_operand.vmem [shape: f32[2,256,128], index: 0, kind: input, shape index: {}]   ;;  %s1381_s1 = inlined_call_operand.vmem [shape: f32[1,128], index: 1, kind: input, shape index: {}]   ;;  %s1382_s2 = inlined_call_operand.vmem [shape: f32[1,128], index: 2, kind: input, shape index: {}]   ;;  %s1383_s3 = inlined_call_operand.vmem [shape: f32[128,128], index: 3, kind: input, shape index: {}]   ;;  %s1384_s4 = inlined_call_operand.vmem [shape: f32[2,256,128], index: 4, kind: output, shape index: {0}]   ;;  %s1385_s5 = inlined_call_operand.vmem [shape: f32[2,2,128], index: 5, kind: output, shape index: {1}]  }
   0x1 LB: > { %s846_s19 = sadd.s32 4294967295, %s1052_s18   ;;  %p850_p0 = scmp.ge.s32.totalorder %s1052_s18, 1  ;;  %s1052_s18 = sphi %s1084_s18, %s16_s18  }
   0x2   : > { %p190_p1 = scmp.lt.s32.totalorder %s1052_s18, 3 }
   0x4   : > { %p191_p2 = pnand %p850_p0, %p190_p1 }
   0x5   : > { %v378_v0 = vld [vmem:[%s1383_s3] sm:$0xff] (!%p191_p2)  ;;  %v379_v1 = vld [vmem:[%s1383_s3 + $0x8] sm:$0xff] (!%p191_p2)  ;;  %v380_v2 = vld [vmem:[%s1383_s3 + $0x10] sm:$0xff] (!%p191_p2)  ;;  %p222_p3 = scmp.lt.s32.totalorder (!%p191_p2), %s846_s19, 1  ;;  %vm757_vm0 = vcmask (!%p191_p2), 1040384  }
   0x6   : > { %194 = sbr.rel (%p191_p2) target bundleno = 333 (0x14d), region = 36  ;;  %v990_v3 = vpack.c.bf16 (!%p191_p2), %v379_v1, %v378_v0  ;;  %v381_v4 = vld [vmem:[%s1383_s3 + $0x18] sm:$0xff] (!%p191_p2)  ;;  %v382_v6 = vld [vmem:[%s1383_s3 + $0x20] sm:$0xff] (!%p191_p2)  ;;  %v383_v7 = vld [vmem:[%s1383_s3 + $0x28] sm:$0xff] (!%p191_p2) }
   0x7   : > { %v994_v5 = vpack.c.bf16 (!%p191_p2), %v381_v4, %v380_v2  ;;  %v998_v8 = vpack.c.bf16 (!%p191_p2), %v383_v7, %v382_v6  ;;  %v384_v9 = vld [vmem:[%s1383_s3 + $0x30] sm:$0xff] (!%p191_p2)  ;;  %v1126_v10 = vld [vmem:[%s1381_s1] ss:$0 sm:$0xff] (!%p191_p2)  ;;  %v385_v11 = vld [vmem:[%s1383_s3 + $0x38] sm:$0xff] (!%p191_p2) }
   0x8   : > { %991 = vmatprep.subr.bf16.mxu0 (!%p191_p2), %v990_v3  ;;  %1022 = vmatprep.subr.bf16.mxu1 (!%p191_p2), %v990_v3  ;;  %v1135_v13 = vld [vmem:[%s1382_s2] ss:$0 sm:$0xff] (!%p191_p2)  ;;  %v1002_v15 = vpack.c.bf16 (!%p191_p2), %v385_v11, %v384_v9  ;;  %v387_v18 = vld [vmem:[%s1383_s3 + $0x48] sm:$0xff] (!%p191_p2)  ;;  %v388_v21 = vld [vmem:[%s1383_s3 + $0x50] sm:$0xff] (!%p191_p2) }
   0x9   : > { %993 = vmatpush3.bf16.msra.mxu0 (!%p191_p2), %v990_v3  ;;  %1030 = vmatpush3.bf16.msra.mxu1 (!%p191_p2), %v990_v3  ;;  %v386_v17 = vld [vmem:[%s1383_s3 + $0x40] sm:$0xff] (!%p191_p2)  ;;  %v389_v22 = vld [vmem:[%s1383_s3 + $0x58] sm:$0xff] (!%p191_p2)  ;;  %v391_v26 = vld [vmem:[%s1383_s3 + $0x68] sm:$0xff] (!%p191_p2) }
   0xa   : > { %995 = vmatprep.subr.bf16.mxu0 (!%p191_p2), %v994_v5  ;;  %1023 = vmatprep.subr.bf16.mxu1 (!%p191_p2), %v994_v5  ;;  %v1006_v20 = vpack.c.bf16 (!%p191_p2), %v387_v18, %v386_v17  ;;  %v1010_v24 = vpack.c.bf16 (!%p191_p2), %v389_v22, %v388_v21  ;;  %v390_v25 = vld [vmem:[%s1383_s3 + $0x60] sm:$0xff] (!%p191_p2)  ;;  %v392_v34 = vld [vmem:[%s1383_s3 + $0x70] sm:$0xff] (!%p191_p2)  ;;  %v393_v35 = vld [vmem:[%s1383_s3 + $0x78] sm:$0xff] (!%p191_p2) }
   0xb   : > { %v1014_v30 = vpack.c.bf16 (!%p191_p2), %v391_v26, %v390_v25  ;;  %v1018_v44 = vpack.c.bf16 (!%p191_p2), %v393_v35, %v392_v34 }
   0xd   : > { %s1387_s19 = smov (!%p222_p3, %s846_s19), 1  ;;  %997 = vmatpush3.bf16.msra.mxu0 %v994_v5  ;;  %1031 = vmatpush3.bf16.msra.mxu1 %v994_v5 }
   0xe   : > { %s860_s7 = sshll.u32 %s1387_s19, 8  ;;  %999 = vmatprep.subr.bf16.mxu0 %v998_v8  ;;  %1024 = vmatprep.subr.bf16.mxu1 %v998_v8 }
   0xf   : > { %s1121_s12 = scalar_lea.vmem %s1380_s0, %s860_s7  ;;  %s1261_s15 = scalar_lea.vmem %s1384_s4, %s860_s7 }
  0x10   : > { %v236_v12 = vld [vmem:[%s1121_s12] sm:$0xff]  ;;  %v237_v28 = vld [vmem:[%s1121_s12 + $0x8] sm:$0xff]  ;;  %v238_v31 = vld [vmem:[%s1121_s12 + $0x10] sm:$0xff]  ;;  %s855_s7 = sshll.u32 %s1387_s19, 1 }
  0x11   : > { %v275_v14 = vmul.f32 %v1126_v10, %v236_v12  ;;  %1001 = vmatpush3.bf16.msra.mxu0 %v998_v8  ;;  %1032 = vmatpush3.bf16.msra.mxu1 %v998_v8  ;;  %v252_v23 = vld [vmem:[%s1121_s12 + $0x80] sm:$0xff]  ;;  %v253_v29 = vld [vmem:[%s1121_s12 + $0x88] sm:$0xff]  ;;  %v254_v33 = vld [vmem:[%s1121_s12 + $0x90] sm:$0xff]  ;;  %v276_v36 = vmul.f32 %v1126_v10, %v237_v28  ;;  %v277_v41 = vmul.f32 %v1126_v10, %v238_v31  ;;  %s235_s20 = scalar_lea.vmem %s1385_s5, %s855_s7 }
  0x12   : > { %1003 = vmatprep.subr.bf16.mxu0 %v1002_v15  ;;  %1025 = vmatprep.subr.bf16.mxu1 %v1002_v15  ;;  %v291_v27 = vmul.f32 %v1126_v10, %v252_v23  ;;  %v239_v37 = vld [vmem:[%s1121_s12 + $0x18] sm:$0xff]  ;;  %v240_v38 = vld [vmem:[%s1121_s12 + $0x20] sm:$0xff]  ;;  %v292_v40 = vmul.f32 %v1126_v10, %v253_v29  ;;  %v293_v42 = vmul.f32 %v1126_v10, %v254_v33  ;;  %v241_v49 = vld [vmem:[%s1121_s12 + $0x28] sm:$0xff] }
  0x13   : > { %v314_v16 = vadd.f32 %v1135_v13, %v275_v14  ;;  %v255_v43 = vld [vmem:[%s1121_s12 + $0x98] sm:$0xff]  ;;  %v256_v45 = vld [vmem:[%s1121_s12 + $0xa0] sm:$0xff]  ;;  %v278_v46 = vmul.f32 %v1126_v10, %v239_v37  ;;  %v279_v47 = vmul.f32 %v1126_v10, %v240_v38  ;;  %v315_v48 = vadd.f32 %v1135_v13, %v276_v36  ;;  %v242_v50 = vld [vmem:[%s1121_s12 + $0x30] sm:$0xff] }
  0x14   : > { %v330_v32 = vadd.f32 %v1135_v13, %v291_v27  ;;  %v331_v51 = vadd.f32 %v1135_v13, %v292_v40  ;;  %v294_v52 = vmul.f32 %v1126_v10, %v255_v43  ;;  %v316_v53 = vadd.f32 %v1135_v13, %v277_v41  ;;  %v257_v56 = vld [vmem:[%s1121_s12 + $0xa8] sm:$0xff]  ;;  %v258_v57 = vld [vmem:[%s1121_s12 + $0xb0] sm:$0xff]  ;;  %v243_v63 = vld [vmem:[%s1121_s12 + $0x38] sm:$0xff] }
  0x15   : > { %v346_v19 = vmax.f32 %v314_v16, 0.0  ;;  %1005 = vmatpush3.bf16.msra.mxu0 %v1002_v15  ;;  %1033 = vmatpush3.bf16.msra.mxu1 %v1002_v15  ;;  %v332_v54 = vadd.f32 %v1135_v13, %v293_v42  ;;  %v295_v55 = vmul.f32 %v1126_v10, %v256_v45  ;;  %v317_v58 = vadd.f32 %v1135_v13, %v278_v46  ;;  %v259_v7 = vld [vmem:[%s1121_s12 + $0xb8] sm:$0xff]  ;;  %v244_v8 = vld [vmem:[%s1121_s12 + $0x40] sm:$0xff]  ;;  %v245_v17 = vld [vmem:[%s1121_s12 + $0x48] sm:$0xff] }
  0x16   : > { %1007 = vmatprep.subr.bf16.mxu0 %v1006_v20  ;;  %1026 = vmatprep.subr.bf16.mxu1 %v1006_v20  ;;  %v362_v39 = vmax.f32 %v330_v32, 0.0  ;;  %v318_v59 = vadd.f32 %v1135_v13, %v279_v47  ;;  %v280_v60 = vmul.f32 %v1126_v10, %v241_v49  ;;  %v281_v61 = vmul.f32 %v1126_v10, %v242_v50  ;;  %v260_v9 = vld [vmem:[%s1121_s12 + $0xc0] sm:$0xff]  ;;  %v246_v22 = vld [vmem:[%s1121_s12 + $0x50] sm:$0xff]  ;;  %v261_v26 = vld [vmem:[%s1121_s12 + $0xc8] sm:$0xff] }
  0x17   : > { %942 = vmatprep.mubr.f32.mxu0 %v346_v19  ;;  %v347_v62 = vmax.f32 %v315_v48, 0.0  ;;  %v363_v0 = vmax.f32 %v331_v51, 0.0  ;;  %v333_v1 = vadd.f32 %v1135_v13, %v294_v52  ;;  %v296_v2 = vmul.f32 %v1126_v10, %v257_v56  ;;  %v262_v27 = vld [vmem:[%s1121_s12 + $0xd0] sm:$0xff]  ;;  %v247_v33 = vld [vmem:[%s1121_s12 + $0x58] sm:$0xff]  ;;  %v248_v34 = vld [vmem:[%s1121_s12 + $0x60] sm:$0xff] }
  0x18   : > { %966 = vmatprep.mubr.f32.mxu1 %v362_v39  ;;  %v348_v3 = vmax.f32 %v316_v53, 0.0  ;;  %v364_v4 = vmax.f32 %v332_v54, 0.0  ;;  %v334_v5 = vadd.f32 %v1135_v13, %v295_v55  ;;  %v297_v6 = vmul.f32 %v1126_v10, %v258_v57  ;;  %v263_v42 = vld [vmem:[%s1121_s12 + $0xd8] sm:$0xff]  ;;  %v264_v43 = vld [vmem:[%s1121_s12 + $0xe0] sm:$0xff]  ;;  %v249_v49 = vld [vmem:[%s1121_s12 + $0x68] sm:$0xff] }
  0x19   : > { %1009 = vmatpush3.bf16.msra.mxu0 %v1006_v20  ;;  %1034 = vmatpush3.bf16.msra.mxu1 %v1006_v20  ;;  %v349_v11 = vmax.f32 %v317_v58, 0.0  ;;  %v319_v12 = vadd.f32 %v1135_v13, %v280_v60  ;;  %v320_v14 = vadd.f32 %v1135_v13, %v281_v61  ;;  %v282_v15 = vmul.f32 %v1126_v10, %v243_v63  ;;  %v250_v54 = vld [vmem:[%s1121_s12 + $0x70] sm:$0xff]  ;;  %v265_v58 = vld [vmem:[%s1121_s12 + $0xe8] sm:$0xff] }
  0x1a   : > { %1011 = vmatprep.subr.bf16.mxu0 %v1010_v24  ;;  %1027 = vmatprep.subr.bf16.mxu1 %v1010_v24  ;;  %v350_v16 = vmax.f32 %v318_v59, 0.0  ;;  %v365_v18 = vmax.f32 %v333_v1, 0.0  ;;  %v335_v19 = vadd.f32 %v1135_v13, %v296_v2  ;;  %v298_v20 = vmul.f32 %v1126_v10, %v259_v7  ;;  %v266_v59 = vld [vmem:[%s1121_s12 + $0xf0] sm:$0xff] }
  0x1b   : > { %v283_v21 = vmul.f32 %v1126_v10, %v244_v8  ;;  %v366_v23 = vmax.f32 %v334_v5, 0.0  ;;  %v299_v25 = vmul.f32 %v1126_v10, %v260_v9  ;;  %v351_v28 = vmax.f32 %v319_v12, 0.0  ;;  %v251_v5 = vld [vmem:[%s1121_s12 + $0x78] sm:$0xff] }
  0x1c   : > { %v352_v29 = vmax.f32 %v320_v14, 0.0  ;;  %v284_v31 = vmul.f32 %v1126_v10, %v245_v17  ;;  %v285_v32 = vmul.f32 %v1126_v10, %v246_v22  ;;  %v367_v35 = vmax.f32 %v335_v19, 0.0  ;;  %v267_v9 = vld [vmem:[%s1121_s12 + $0xf8] sm:$0xff] }
  0x1d   : > { %1013 = vmatpush3.bf16.msra.mxu0 %v1010_v24  ;;  %1035 = vmatpush3.bf16.msra.mxu1 %v1010_v24  ;;  %v336_v24 = vadd.f32 %v1135_v13, %v297_v6  ;;  %v337_v36 = vadd.f32 %v1135_v13, %v298_v20  ;;  %v300_v37 = vmul.f32 %v1126_v10, %v261_v26 }
  0x1e   : > { %1015 = vmatprep.subr.bf16.mxu0 %v1014_v30  ;;  %1028 = vmatprep.subr.bf16.mxu1 %v1014_v30  ;;  %v322_v38 = vadd.f32 %v1135_v13, %v283_v21  ;;  %v338_v40 = vadd.f32 %v1135_v13, %v299_v25  ;;  %v301_v41 = vmul.f32 %v1126_v10, %v262_v27 }
  0x1f   : > { %v368_v39 = vmax.f32 %v336_v24, 0.0  ;;  %v323_v45 = vadd.f32 %v1135_v13, %v284_v31  ;;  %v286_v46 = vmul.f32 %v1126_v10, %v247_v33  ;;  %v287_v47 = vmul.f32 %v1126_v10, %v248_v34 }
  0x20   : > { %v324_v48 = vadd.f32 %v1135_v13, %v285_v32  ;;  %v369_v50 = vmax.f32 %v337_v36, 0.0  ;;  %v339_v51 = vadd.f32 %v1135_v13, %v300_v37  ;;  %v302_v52 = vmul.f32 %v1126_v10, %v263_v42 }
  0x21   : > { %1017 = vmatpush3.bf16.msra.mxu0 %v1014_v30  ;;  %1036 = vmatpush3.bf16.msra.mxu1 %v1014_v30  ;;  %v321_v30 = vadd.f32 %v1135_v13, %v282_v15  ;;  %v354_v53 = vmax.f32 %v322_v38, 0.0  ;;  %v370_v55 = vmax.f32 %v338_v40, 0.0  ;;  %v340_v56 = vadd.f32 %v1135_v13, %v301_v41 }
  0x22   : > { %1019 = vmatprep.subr.bf16.mxu0 %v1018_v44  ;;  %1029 = vmatprep.subr.bf16.mxu1 %v1018_v44  ;;  %v303_v57 = vmul.f32 %v1126_v10, %v264_v43  ;;  %v355_v60 = vmax.f32 %v323_v45, 0.0  ;;  %v325_v61 = vadd.f32 %v1135_v13, %v286_v46  ;;  %v288_v63 = vmul.f32 %v1126_v10, %v249_v49 }
  0x23   : > { %v371_v1 = vmax.f32 %v339_v51, 0.0  ;;  %v341_v2 = vadd.f32 %v1135_v13, %v302_v52  ;;  %v372_v6 = vmax.f32 %v340_v56, 0.0  ;;  %v305_v8 = vmul.f32 %v1126_v10, %v266_v59 }
  0x24   : > { %v342_v7 = vadd.f32 %v1135_v13, %v303_v57  ;;  %v327_v12 = vadd.f32 %v1135_v13, %v288_v63  ;;  %v290_v14 = vmul.f32 %v1126_v10, %v251_v5  ;;  %v306_v17 = vmul.f32 %v1126_v10, %v267_v9 }
  0x25   : > { %1021 = vmatpush3.bf16.msra.mxu0 %v1018_v44  ;;  %1037 = vmatpush3.bf16.msra.mxu1 %v1018_v44  ;;  %v353_v44 = vmax.f32 %v321_v30, 0.0  ;;  %v373_v15 = vmax.f32 %v341_v2, 0.0  ;;  %v344_v21 = vadd.f32 %v1135_v13, %v305_v8 }
  0x26   : > { %v374_v20 = vmax.f32 %v342_v7, 0.0  ;;  %v359_v22 = vmax.f32 %v327_v12, 0.0  ;;  %v345_v25 = vadd.f32 %v1135_v13, %v306_v17 }
  0x28   : > { %943 = vmatmul.mubr.f32.vlgmr.msra.gmra.mrb[0].mxu0 %v347_v62  ;;  %967 = vmatmul.mubr.f32.vlgmr.msra.gmra.mrb[0].mxu1 %v363_v0  ;;  %v326_v62 = vadd.f32 %v1135_v13, %v287_v47  ;;  %v289_v0 = vmul.f32 %v1126_v10, %v250_v54 }
  0x29   : > { %945 = vmatprep.mubr.f32.mxu0 %v348_v3  ;;  %969 = vmatprep.mubr.f32.mxu1 %v364_v4  ;;  %v304_v3 = vmul.f32 %v1126_v10, %v265_v58  ;;  %v356_v4 = vmax.f32 %v324_v48, 0.0  ;;  %v376_v10 = vmax.f32 %v344_v21, 0.0 }
  0x2a   : > { %v328_v19 = vadd.f32 %v1135_v13, %v289_v0 }
  0x2c   : > { %946 = vmatmul.mubr.f32.gmra.mrb[2].mxu0 %v349_v11  ;;  %970 = vmatmul.mubr.f32.gmra.mrb[2].mxu1 %v365_v18  ;;  %v357_v11 = vmax.f32 %v325_v61, 0.0  ;;  %v358_v18 = vmax.f32 %v326_v62, 0.0  ;;  %v360_v26 = vmax.f32 %v328_v19, 0.0 }
  0x2d   : > { %948 = vmatprep.mubr.f32.mxu0 %v350_v16  ;;  %972 = vmatprep.mubr.f32.mxu1 %v366_v23  ;;  %v343_v16 = vadd.f32 %v1135_v13, %v304_v3  ;;  %v329_v23 = vadd.f32 %v1135_v13, %v290_v14 }
  0x2f   : > { %v375_v24 = vmax.f32 %v343_v16, 0.0  ;;  %v361_v27 = vmax.f32 %v329_v23, 0.0 }
  0x30   : > { %949 = vmatmul.mubr.f32.gmra.mrb[4].mxu0 %v351_v28  ;;  %973 = vmatmul.mubr.f32.gmra.mrb[4].mxu1 %v367_v35  ;;  %v377_v28 = vmax.f32 %v345_v25, 0.0 }
  0x31   : > { %951 = vmatprep.mubr.f32.mxu0 %v352_v29  ;;  %975 = vmatprep.mubr.f32.mxu1 %v368_v39 }
  0x34   : > { %952 = vmatmul.mubr.f32.gmra.mrb[6].mxu0 %v353_v44  ;;  %976 = vmatmul.mubr.f32.gmra.mrb[6].mxu1 %v369_v50 }
  0x35   : > { %954 = vmatprep.mubr.f32.mxu0 %v354_v53  ;;  %978 = vmatprep.mubr.f32.mxu1 %v370_v55 }
  0x38   : > { %955 = vmatmul.mubr.f32.gmra.mrb[8].mxu0 %v355_v60  ;;  %979 = vmatmul.mubr.f32.gmra.mrb[8].mxu1 %v371_v1 }
  0x39   : > { %957 = vmatprep.mubr.f32.mxu0 %v356_v4  ;;  %981 = vmatprep.mubr.f32.mxu1 %v372_v6 }
  0x3c   : > { %958 = vmatmul.mubr.f32.gmra.mrb[10].mxu0 %v357_v11  ;;  %982 = vmatmul.mubr.f32.gmra.mrb[10].mxu1 %v373_v15 }
  0x3d   : > { %960 = vmatprep.mubr.f32.mxu0 %v358_v18  ;;  %984 = vmatprep.mubr.f32.mxu1 %v374_v20 }
  0x40   : > { %961 = vmatmul.mubr.f32.gmra.mrb[12].mxu0 %v359_v22  ;;  %985 = vmatmul.mubr.f32.gmra.mrb[12].mxu1 %v375_v24 }
  0x41   : > { %963 = vmatprep.mubr.f32.mxu0 %v360_v26  ;;  %987 = vmatprep.mubr.f32.mxu1 %v376_v10 }
  0x44   : > { %964 = vmatmul.mubr.f32.gmra.mrb[14].mxu0 %v361_v27  ;;  %988 = vmatmul.mubr.f32.gmra.mrb[14].mxu1 %v377_v28 }
  0xfb   : > { %v944_v13 = vpop.f32.mrb[0].mxu0  ;;  %v1263_v29 = vpop.f32.mrb[0].mxu1 }
  0xfc   : > { %620 = vst [vmem:[%s1261_s15 + $0x8] sm:$0xff] %v944_v13  ;;  %v689_v30 = vmul.f32 %v944_v13, %v944_v13  ;;  %v460_v31 = vpop.f32.mrb[1].mxu0  ;;  %636 = vst [vmem:[%s1261_s15 + $0x88] sm:$0xff] %v1263_v29  ;;  %v1268_v32 = vpop.f32.mrb[1].mxu1 }
  0xfd   : > { %619 = vst [vmem:[%s1261_s15] sm:$0xff] %v460_v31  ;;  %v651_v33 = vadd.f32 %v944_v13, %v460_v31  ;;  %v688_v34 = vmul.f32 %v460_v31, %v460_v31  ;;  %635 = vst [vmem:[%s1261_s15 + $0x80] sm:$0xff] %v1268_v32 }
  0xff   : > { %v720_v35 = vadd.f32 %v689_v30, %v688_v34  ;;  %v947_v36 = vpop.f32.mrb[2].mxu0  ;;  %v1273_v37 = vpop.f32.mrb[2].mxu1 }
 0x100   : > { %622 = vst [vmem:[%s1261_s15 + $0x18] sm:$0xff] %v947_v36  ;;  %v470_v38 = vpop.f32.mrb[3].mxu0  ;;  %638 = vst [vmem:[%s1261_s15 + $0x98] sm:$0xff] %v1273_v37  ;;  %v1278_v39 = vpop.f32.mrb[3].mxu1  ;;  %v691_v42 = vmul.f32 %v947_v36, %v947_v36 }
 0x101   : > { %621 = vst [vmem:[%s1261_s15 + $0x10] sm:$0xff] %v470_v38  ;;  %v652_v40 = vadd.f32 %v651_v33, %v470_v38  ;;  %v690_v41 = vmul.f32 %v470_v38, %v470_v38  ;;  %637 = vst [vmem:[%s1261_s15 + $0x90] sm:$0xff] %v1278_v39 }
 0x103   : > { %v721_v43 = vadd.f32 %v720_v35, %v690_v41  ;;  %v950_v44 = vpop.f32.mrb[4].mxu0  ;;  %v653_v45 = vadd.f32 %v947_v36, %v652_v40  ;;  %v1283_v46 = vpop.f32.mrb[4].mxu1 }
 0x104   : > { %624 = vst [vmem:[%s1261_s15 + $0x28] sm:$0xff] %v950_v44  ;;  %v480_v47 = vpop.f32.mrb[5].mxu0  ;;  %640 = vst [vmem:[%s1261_s15 + $0xa8] sm:$0xff] %v1283_v46  ;;  %v1288_v48 = vpop.f32.mrb[5].mxu1  ;;  %v693_v52 = vmul.f32 %v950_v44, %v950_v44 }
 0x105   : > { %623 = vst [vmem:[%s1261_s15 + $0x20] sm:$0xff] %v480_v47  ;;  %v654_v49 = vadd.f32 %v653_v45, %v480_v47  ;;  %v692_v50 = vmul.f32 %v480_v47, %v480_v47  ;;  %v722_v51 = vadd.f32 %v721_v43, %v691_v42  ;;  %639 = vst [vmem:[%s1261_s15 + $0xa0] sm:$0xff] %v1288_v48 }
 0x106   : > { %v704_v45 = vmul.f32 %v1268_v32, %v1268_v32 }
 0x107   : > { %v723_v53 = vadd.f32 %v722_v51, %v692_v50  ;;  %v953_v54 = vpop.f32.mrb[6].mxu0  ;;  %v655_v55 = vadd.f32 %v950_v44, %v654_v49  ;;  %v1293_v56 = vpop.f32.mrb[6].mxu1  ;;  %v705_v50 = vmul.f32 %v1263_v29, %v1263_v29 }
 0x108   : > { %626 = vst [vmem:[%s1261_s15 + $0x38] sm:$0xff] %v953_v54  ;;  %v490_v57 = vpop.f32.mrb[7].mxu0  ;;  %642 = vst [vmem:[%s1261_s15 + $0xb8] sm:$0xff] %v1293_v56  ;;  %v1298_v58 = vpop.f32.mrb[7].mxu1  ;;  %v695_v62 = vmul.f32 %v953_v54, %v953_v54 }
 0x109   : > { %625 = vst [vmem:[%s1261_s15 + $0x30] sm:$0xff] %v490_v57  ;;  %v656_v59 = vadd.f32 %v655_v55, %v490_v57  ;;  %v694_v60 = vmul.f32 %v490_v57, %v490_v57  ;;  %v724_v61 = vadd.f32 %v723_v53, %v693_v52  ;;  %641 = vst [vmem:[%s1261_s15 + $0xb0] sm:$0xff] %v1298_v58 }
 0x10a   : > { %v706_v53 = vmul.f32 %v1278_v39, %v1278_v39  ;;  %v707_v57 = vmul.f32 %v1273_v37, %v1273_v37 }
 0x10b   : > { %v725_v63 = vadd.f32 %v724_v61, %v694_v60  ;;  %v956_v0 = vpop.f32.mrb[8].mxu0  ;;  %v657_v1 = vadd.f32 %v953_v54, %v656_v59  ;;  %v1303_v2 = vpop.f32.mrb[8].mxu1 }
 0x10c   : > { %628 = vst [vmem:[%s1261_s15 + $0x48] sm:$0xff] %v956_v0  ;;  %v500_v3 = vpop.f32.mrb[9].mxu0  ;;  %644 = vst [vmem:[%s1261_s15 + $0xc8] sm:$0xff] %v1303_v2  ;;  %v1308_v4 = vpop.f32.mrb[9].mxu1  ;;  %v697_v8 = vmul.f32 %v956_v0, %v956_v0 }
 0x10d   : > { %627 = vst [vmem:[%s1261_s15 + $0x40] sm:$0xff] %v500_v3  ;;  %v658_v5 = vadd.f32 %v657_v1, %v500_v3  ;;  %v696_v6 = vmul.f32 %v500_v3, %v500_v3  ;;  %v726_v7 = vadd.f32 %v725_v63, %v695_v62  ;;  %643 = vst [vmem:[%s1261_s15 + $0xc0] sm:$0xff] %v1308_v4 }
 0x10f   : > { %v727_v9 = vadd.f32 %v726_v7, %v696_v6  ;;  %v959_v11 = vpop.f32.mrb[10].mxu0  ;;  %v659_v12 = vadd.f32 %v956_v0, %v658_v5  ;;  %v1313_v14 = vpop.f32.mrb[10].mxu1 }
 0x110   : > { %630 = vst [vmem:[%s1261_s15 + $0x58] sm:$0xff] %v959_v11  ;;  %v510_v15 = vpop.f32.mrb[11].mxu0  ;;  %646 = vst [vmem:[%s1261_s15 + $0xd8] sm:$0xff] %v1313_v14  ;;  %v1318_v16 = vpop.f32.mrb[11].mxu1  ;;  %v699_v20 = vmul.f32 %v959_v11, %v959_v11 }
 0x111   : > { %629 = vst [vmem:[%s1261_s15 + $0x50] sm:$0xff] %v510_v15  ;;  %v660_v17 = vadd.f32 %v659_v12, %v510_v15  ;;  %v698_v18 = vmul.f32 %v510_v15, %v510_v15  ;;  %v728_v19 = vadd.f32 %v727_v9, %v697_v8  ;;  %645 = vst [vmem:[%s1261_s15 + $0xd0] sm:$0xff] %v1318_v16 }
 0x113   : > { %v729_v21 = vadd.f32 %v728_v19, %v698_v18  ;;  %v962_v22 = vpop.f32.mrb[12].mxu0  ;;  %v661_v23 = vadd.f32 %v959_v11, %v660_v17  ;;  %v1323_v24 = vpop.f32.mrb[12].mxu1 }
 0x114   : > { %632 = vst [vmem:[%s1261_s15 + $0x68] sm:$0xff] %v962_v22  ;;  %v520_v25 = vpop.f32.mrb[13].mxu0  ;;  %648 = vst [vmem:[%s1261_s15 + $0xe8] sm:$0xff] %v1323_v24  ;;  %v600_v26 = vpop.f32.mrb[13].mxu1  ;;  %v701_v13 = vmul.f32 %v962_v22, %v962_v22 }
 0x115   : > { %631 = vst [vmem:[%s1261_s15 + $0x60] sm:$0xff] %v520_v25  ;;  %v662_v10 = vadd.f32 %v661_v23, %v520_v25  ;;  %v700_v27 = vmul.f32 %v520_v25, %v520_v25  ;;  %v730_v28 = vadd.f32 %v729_v21, %v699_v20  ;;  %647 = vst [vmem:[%s1261_s15 + $0xe0] sm:$0xff] %v600_v26 }
 0x116   : > { %v717_v21 = vmul.f32 %v1323_v24, %v1323_v24 }
 0x117   : > { %v731_v30 = vadd.f32 %v730_v28, %v700_v27  ;;  %v965_v31 = vpop.f32.mrb[14].mxu0  ;;  %v663_v33 = vadd.f32 %v962_v22, %v662_v10  ;;  %v989_v34 = vpop.f32.mrb[14].mxu1 }
 0x118   : > { %634 = vst [vmem:[%s1261_s15 + $0x78] sm:$0xff] %v965_v31  ;;  %v530_v35 = vpop.f32.mrb[15].mxu0  ;;  %650 = vst [vmem:[%s1261_s15 + $0xf8] sm:$0xff] %v989_v34  ;;  %v610_v36 = vpop.f32.mrb[15].mxu1  ;;  %v703_v42 = vmul.f32 %v965_v31, %v965_v31  ;;  %v719_v10 = vmul.f32 %v989_v34, %v989_v34 }
 0x119   : > { %633 = vst [vmem:[%s1261_s15 + $0x70] sm:$0xff] %v530_v35  ;;  %v664_v38 = vadd.f32 %v663_v33, %v530_v35  ;;  %v702_v40 = vmul.f32 %v530_v35, %v530_v35  ;;  %v732_v41 = vadd.f32 %v731_v30, %v701_v13  ;;  %649 = vst [vmem:[%s1261_s15 + $0xf0] sm:$0xff] %v610_v36 }
 0x11a   : > { %v718_v23 = vmul.f32 %v610_v36, %v610_v36 }
 0x11b   : > { %v665_v43 = vadd.f32 %v965_v31, %v664_v38  ;;  %v733_v44 = vadd.f32 %v732_v41, %v702_v40 }
 0x11d   : > { %v734_v47 = vadd.f32 %v733_v44, %v703_v42  ;;  %v666_v49 = vadd.f32 %v665_v43, %v1268_v32  ;;  %v708_v32 = vmul.f32 %v1288_v48, %v1288_v48 }
 0x11f   : > { %v735_v51 = vadd.f32 %v734_v47, %v704_v45  ;;  %v667_v52 = vadd.f32 %v1263_v29, %v666_v49  ;;  %v709_v29 = vmul.f32 %v1283_v46, %v1283_v46 }
 0x121   : > { %v668_v54 = vadd.f32 %v667_v52, %v1278_v39  ;;  %v736_v55 = vadd.f32 %v735_v51, %v705_v50  ;;  %v710_v39 = vmul.f32 %v1298_v58, %v1298_v58 }
 0x123   : > { %v737_v59 = vadd.f32 %v736_v55, %v706_v53  ;;  %v669_v60 = vadd.f32 %v1273_v37, %v668_v54  ;;  %v711_v37 = vmul.f32 %v1293_v56, %v1293_v56 }
 0x125   : > { %v670_v61 = vadd.f32 %v669_v60, %v1288_v48  ;;  %v738_v62 = vadd.f32 %v737_v59, %v707_v57  ;;  %v712_v48 = vmul.f32 %v1308_v4, %v1308_v4 }
 0x127   : > { %v739_v63 = vadd.f32 %v738_v62, %v708_v32  ;;  %v671_v0 = vadd.f32 %v1283_v46, %v670_v61  ;;  %v713_v46 = vmul.f32 %v1303_v2, %v1303_v2 }
 0x129   : > { %v672_v1 = vadd.f32 %v671_v0, %v1298_v58  ;;  %v740_v3 = vadd.f32 %v739_v63, %v709_v29  ;;  %v714_v58 = vmul.f32 %v1318_v16, %v1318_v16 }
 0x12b   : > { %v741_v5 = vadd.f32 %v740_v3, %v710_v39  ;;  %v673_v6 = vadd.f32 %v1293_v56, %v672_v1  ;;  %v715_v56 = vmul.f32 %v1313_v14, %v1313_v14 }
 0x12d   : > { %v674_v7 = vadd.f32 %v673_v6, %v1308_v4  ;;  %v742_v8 = vadd.f32 %v741_v5, %v711_v37  ;;  %v716_v4 = vmul.f32 %v600_v26, %v600_v26 }
 0x12f   : > { %v743_v9 = vadd.f32 %v742_v8, %v712_v48  ;;  %v675_v11 = vadd.f32 %v1303_v2, %v674_v7 }
 0x131   : > { %v676_v12 = vadd.f32 %v675_v11, %v1318_v16  ;;  %v744_v15 = vadd.f32 %v743_v9, %v713_v46 }
 0x133   : > { %v745_v17 = vadd.f32 %v744_v15, %v714_v58  ;;  %v677_v18 = vadd.f32 %v1313_v14, %v676_v12 }
 0x135   : > { %v678_v19 = vadd.f32 %v677_v18, %v600_v26  ;;  %v746_v20 = vadd.f32 %v745_v17, %v715_v56 }
 0x137   : > { %v747_v22 = vadd.f32 %v746_v20, %v716_v4  ;;  %v679_v2 = vadd.f32 %v1323_v24, %v678_v19 }
 0x139   : > { %v680_v25 = vadd.f32 %v679_v2, %v610_v36  ;;  %v748_v16 = vadd.f32 %v747_v22, %v717_v21 }
 0x13b   : > { %v681_v27 = vadd.f32 %v989_v34, %v680_v25  ;;  %v749_v28 = vadd.f32 %v748_v16, %v718_v23 }
 0x13d   : > { %v682_v13 = vrot.slane %v681_v27, 4  ;;  %v750_v30 = vadd.f32 %v749_v28, %v719_v10 }
 0x13f   : > { %v683_v31 = vadd.f32 %v682_v13, %v681_v27  ;;  %v751_v14 = vrot.slane %v750_v30, 4 }
 0x141   : > { %v684_v33 = vrot.slane %v683_v31, 2  ;;  %v752_v26 = vadd.f32 %v751_v14, %v750_v30 }
 0x143   : > { %v685_v35 = vadd.f32 %v684_v33, %v683_v31  ;;  %v753_v38 = vrot.slane %v752_v26, 2 }
 0x145   : > { %v686_v40 = vrot.slane %v685_v35, 1  ;;  %v754_v41 = vadd.f32 %v753_v38, %v752_v26 }
 0x147   : > { %v755_v42 = vrot.slane %v754_v41, 1  ;;  %v687_v24 = vadd.f32 %v686_v40, %v685_v35 }
 0x149   : > { %v756_v34 = vadd.f32 %v755_v42, %v754_v41 }
 0x14b   : > { %v758_v36 = vsel %vm757_vm0, %v687_v24, %v756_v34 }
 0x14c   : > { %759 = vst [vmem:[%s235_s20] sm:$0x3] %v758_v36 }
 0x14d PF: > { %s16_s18 = sadd.s32 1, %s1052_s18  }
 0x14e   : > { %p13_p4 = scmp.ge.s32.totalorder %s16_s18, 4  }
 0x150   :  { %15 = sbr.rel (!%p13_p4) target bundleno = 1 (0x1), region = 78 }

// kernel: bottleneck_forward.5
= control target key start
LH: loop header
LB: loop body
LE: loop exit
PB: predicated region body
PF: predicated region fallthrough
CT: control target
= control target key end

     0   :  { %s2979_s18 = smov 0   ;;  %s4912_s0 = inlined_call_operand.vmem [shape: f32[2,256,128], index: 0, kind: input, shape index: {}]   ;;  %s4913_s1 = inlined_call_operand.vmem [shape: f32[1,128], index: 1, kind: input, shape index: {}]   ;;  %s4914_s2 = inlined_call_operand.vmem [shape: f32[1,128], index: 2, kind: input, shape index: {}]   ;;  %s4915_s3 = inlined_call_operand.vmem [shape: f32[1152,128], index: 3, kind: input, shape index: {}]   ;;  %s4916_s4 = inlined_call_operand.vmem [shape: f32[2,256,128], index: 4, kind: output, shape index: {0}]   ;;  %s4917_s5 = inlined_call_operand.vmem [shape: f32[2,2,128], index: 5, kind: output, shape index: {1}]  }
   0x1 LB: > { %s2299_s19 = sadd.s32 4294967295, %s2945_s18   ;;  %p2303_p0 = scmp.ge.s32.totalorder %s2945_s18, 1  ;;  %s2945_s18 = sphi %s2979_s18, %s16_s18  }
   0x2   : > { %p190_p1 = scmp.lt.s32.totalorder %s2945_s18, 3 }
   0x4   : > { %p191_p2 = pnand %p2303_p0, %p190_p1 }
   0x6   : > { %194 = sbr.rel (%p191_p2) target bundleno = 646 (0x286), region = 36 }
   0xd   : > { %v804_v0 = vld [vmem:[%s4915_s3] sm:$0xff]  ;;  %v805_v1 = vld [vmem:[%s4915_s3 + $0x8] sm:$0xff]  ;;  %v4920_v3 = vmov 0.0|0.0   ;;  %v806_v6 = vld [vmem:[%s4915_s3 + $0x10] sm:$0xff]  ;;  %v4918_v8 = vmov 0.0   ;;  %p222_p3 = scmp.lt.s32.totalorder %s2299_s19, 1 }
   0xe   : > { %v836_v2 = vld [vmem:[%s4915_s3 + $0x100] sm:$0xff]  ;;  %2535 = vmatprep.subr.bf16.mxu1 %v4920_v3  ;;  %2583 = vmatprep.subr.bf16.mxu0 %v4920_v3  ;;  %v2536_v4 = vpack.c.bf16 %v805_v1, %v804_v0  ;;  %v837_v5 = vld [vmem:[%s4915_s3 + $0x108] sm:$0xff]  ;;  %v807_v7 = vld [vmem:[%s4915_s3 + $0x18] sm:$0xff]  ;;  %v3008_v9 = vrot.slane %v4918_v8, 1  ;;  %vm410_vm0 = vcmask 1040384   ;;  %vm570_vm2 = vcmask 1046528  }
   0xf   : > { %v2584_v10 = vpack.c.bf16 %v837_v5, %v836_v2  ;;  %v838_v11 = vld [vmem:[%s4915_s3 + $0x110] sm:$0xff]  ;;  %v839_v12 = vld [vmem:[%s4915_s3 + $0x118] sm:$0xff]  ;;  %v2539_v13 = vpack.c.bf16 %v807_v7, %v806_v6  ;;  %v808_v15 = vld [vmem:[%s4915_s3 + $0x20] sm:$0xff]  ;;  %s5122_s19 = smov (!%p222_p3, %s2299_s19), 1  ;;  %vm679_vm3 = vcmask 1045504  }
  0x10   : > { %5007 = vst [vmem:[#allocation2_spill] sm:$0xff] %v3008_v9  ;;  %2537 = vmatpush1.bf16.msra.mxu1 %v2536_v4  ;;  %1012 = vmatprep.mubr.f32.mxu1 %v3008_v9  ;;  %v2587_v14 = vpack.c.bf16 %v839_v12, %v838_v11  ;;  %v809_v16 = vld [vmem:[%s4915_s3 + $0x28] sm:$0xff]  ;;  %v840_v17 = vld [vmem:[%s4915_s3 + $0x120] sm:$0xff]  ;;  %v810_v21 = vld [vmem:[%s4915_s3 + $0x30] sm:$0xff]  ;;  %s2405_s12 = sshll.u32 %s5122_s19, 8 }
  0x11   : > { %2585 = vmatpush1.bf16.msra.mxu0 %v2584_v10  ;;  %2538 = vmatprep.subr.bf16.mxu1 %v4920_v3  ;;  %v841_v18 = vld [vmem:[%s4915_s3 + $0x128] sm:$0xff]  ;;  %v2542_v19 = vpack.c.bf16 %v809_v16, %v808_v15  ;;  %v811_v22 = vld [vmem:[%s4915_s3 + $0x38] sm:$0xff]  ;;  %v842_v23 = vld [vmem:[%s4915_s3 + $0x130] sm:$0xff]  ;;  %s3085_s25 = scalar_lea.vmem %s4912_s0, %s2405_s12  ;;  %s4669_s21 = scalar_lea.vmem %s4916_s4, %s2405_s12 }
  0x12   : > { %2586 = vmatprep.subr.bf16.mxu0 %v4920_v3  ;;  %v2590_v20 = vpack.c.bf16 %v841_v18, %v840_v17  ;;  %v843_v24 = vld [vmem:[%s4915_s3 + $0x138] sm:$0xff]  ;;  %v2545_v25 = vpack.c.bf16 %v811_v22, %v810_v21  ;;  %v812_v27 = vld [vmem:[%s4915_s3 + $0x40] sm:$0xff]  ;;  %v813_v28 = vld [vmem:[%s4915_s3 + $0x48] sm:$0xff]  ;;  %s2308_s12 = sshll.u32 %s5122_s19, 1 }
  0x13   : > { %v2593_v26 = vpack.c.bf16 %v843_v24, %v842_v23  ;;  %v844_v29 = vld [vmem:[%s4915_s3 + $0x140] sm:$0xff]  ;;  %v845_v30 = vld [vmem:[%s4915_s3 + $0x148] sm:$0xff]  ;;  %v2548_v31 = vpack.c.bf16 %v813_v28, %v812_v27  ;;  %v814_v33 = vld [vmem:[%s4915_s3 + $0x50] sm:$0xff]  ;;  %s235_s24 = scalar_lea.vmem %s4917_s5, %s2308_s12 }
  0x14   : > { %2540 = vmatpush1.bf16.msra.mxu1 %v2539_v13  ;;  %v2596_v32 = vpack.c.bf16 %v845_v30, %v844_v29  ;;  %v815_v34 = vld [vmem:[%s4915_s3 + $0x58] sm:$0xff]  ;;  %v846_v35 = vld [vmem:[%s4915_s3 + $0x150] sm:$0xff]  ;;  %v816_v39 = vld [vmem:[%s4915_s3 + $0x60] sm:$0xff] }
  0x15   : > { %2588 = vmatpush1.bf16.msra.mxu0 %v2587_v14  ;;  %2541 = vmatprep.subr.bf16.mxu1 %v4920_v3  ;;  %v847_v36 = vld [vmem:[%s4915_s3 + $0x158] sm:$0xff]  ;;  %v2551_v37 = vpack.c.bf16 %v815_v34, %v814_v33  ;;  %v817_v40 = vld [vmem:[%s4915_s3 + $0x68] sm:$0xff]  ;;  %v848_v41 = vld [vmem:[%s4915_s3 + $0x160] sm:$0xff] }
  0x16   : > { %2589 = vmatprep.subr.bf16.mxu0 %v4920_v3  ;;  %v2599_v38 = vpack.c.bf16 %v847_v36, %v846_v35  ;;  %v849_v42 = vld [vmem:[%s4915_s3 + $0x168] sm:$0xff]  ;;  %v236_v43 = vld [vmem:[%s3085_s25] sm:$0xff]  ;;  %v2554_v47 = vpack.c.bf16 %v817_v40, %v816_v39  ;;  %v818_v49 = vld [vmem:[%s4915_s3 + $0x70] sm:$0xff] }
  0x17   : > { %v3105_v44 = vld [vmem:[%s4913_s1] ss:$0 sm:$0xff]  ;;  %v2602_v48 = vpack.c.bf16 %v849_v42, %v848_v41  ;;  %v819_v50 = vld [vmem:[%s4915_s3 + $0x78] sm:$0xff]  ;;  %v850_v52 = vld [vmem:[%s4915_s3 + $0x170] sm:$0xff] }
  0x18   : > { %2543 = vmatpush1.bf16.msra.mxu1 %v2542_v19  ;;  %v275_v45 = vmul.f32 %v3105_v44, %v236_v43  ;;  %v3111_v46 = vld [vmem:[%s4914_s2] ss:$0 sm:$0xff]  ;;  %v851_v53 = vld [vmem:[%s4915_s3 + $0x178] sm:$0xff]  ;;  %v2557_v55 = vpack.c.bf16 %v819_v50, %v818_v49  ;;  %vm3129_vm1 = vmneg %vm410_vm0 }
  0x19   : > { %2591 = vmatpush1.bf16.msra.mxu0 %v2590_v20  ;;  %2544 = vmatprep.subr.bf16.mxu1 %v4920_v3  ;;  %v2605_v57 = vpack.c.bf16 %v851_v53, %v850_v52  ;;  %v820_v58 = vld [vmem:[%s4915_s3 + $0x80] sm:$0xff]  ;;  %v821_v59 = vld [vmem:[%s4915_s3 + $0x88] sm:$0xff]  ;;  %v822_v1 = vld [vmem:[%s4915_s3 + $0x90] sm:$0xff] }
  0x1a   : > { %2592 = vmatprep.subr.bf16.mxu0 %v4920_v3  ;;  %v314_v51 = vadd.f32 %v3111_v46, %v275_v45  ;;  %v852_v61 = vld [vmem:[%s4915_s3 + $0x180] sm:$0xff]  ;;  %v853_v62 = vld [vmem:[%s4915_s3 + $0x188] sm:$0xff]  ;;  %v2560_v63 = vpack.c.bf16 %v821_v59, %v820_v58  ;;  %v823_v2 = vld [vmem:[%s4915_s3 + $0x98] sm:$0xff] }
  0x1b   : > { %v2608_v0 = vpack.c.bf16 %v853_v62, %v852_v61  ;;  %v854_v4 = vld [vmem:[%s4915_s3 + $0x190] sm:$0xff]  ;;  %v855_v5 = vld [vmem:[%s4915_s3 + $0x198] sm:$0xff]  ;;  %v2563_v6 = vpack.c.bf16 %v823_v2, %v822_v1  ;;  %v824_v10 = vld [vmem:[%s4915_s3 + $0xa0] sm:$0xff] }
  0x1c   : > { %2546 = vmatpush1.bf16.msra.mxu1 %v2545_v25  ;;  %v346_v54 = vmax.f32 %v314_v51, 0.0  ;;  %v2611_v7 = vpack.c.bf16 %v855_v5, %v854_v4  ;;  %v825_v11 = vld [vmem:[%s4915_s3 + $0xa8] sm:$0xff]  ;;  %v856_v12 = vld [vmem:[%s4915_s3 + $0x1a0] sm:$0xff]  ;;  %v826_v16 = vld [vmem:[%s4915_s3 + $0xb0] sm:$0xff] }
  0x1d   : > { %2594 = vmatpush1.bf16.msra.mxu0 %v2593_v26  ;;  %2547 = vmatprep.subr.bf16.mxu1 %v4920_v3  ;;  %v857_v13 = vld [vmem:[%s4915_s3 + $0x1a8] sm:$0xff]  ;;  %v2566_v14 = vpack.c.bf16 %v825_v11, %v824_v10  ;;  %v827_v17 = vld [vmem:[%s4915_s3 + $0xb8] sm:$0xff]  ;;  %v858_v18 = vld [vmem:[%s4915_s3 + $0x1b0] sm:$0xff]  ;;  %v3284_v11 = vrot.slane %v4918_v8, 2 }
  0x1e   : > { %2595 = vmatprep.subr.bf16.mxu0 %v4920_v3  ;;  %v3140_v60 = vrot.slane %v346_v54, 7  ;;  %v2614_v15 = vpack.c.bf16 %v857_v13, %v856_v12  ;;  %v859_v19 = vld [vmem:[%s4915_s3 + $0x1b8] sm:$0xff]  ;;  %v237_v20 = vld [vmem:[%s3085_s25 + $0x8] sm:$0xff]  ;;  %v2569_v21 = vpack.c.bf16 %v827_v17, %v826_v16  ;;  %v828_v23 = vld [vmem:[%s4915_s3 + $0xc0] sm:$0xff] }
  0x1f   : > { %v2617_v22 = vpack.c.bf16 %v859_v19, %v858_v18  ;;  %v829_v24 = vld [vmem:[%s4915_s3 + $0xc8] sm:$0xff]  ;;  %v860_v25 = vld [vmem:[%s4915_s3 + $0x1c0] sm:$0xff]  ;;  %v276_v27 = vmul.f32 %v3105_v44, %v237_v20  ;;  %v830_v30 = vld [vmem:[%s4915_s3 + $0xd0] sm:$0xff]  ;;  %5010 = vst [vmem:[#allocation3_spill] sm:$0xff] %v3284_v11 }
  0x20   : > { %2549 = vmatpush1.bf16.msra.mxu1 %v2548_v31  ;;  %2342 = vmatprep.mubr.msk.f32.mxu0 %vm3129_vm1, %v3140_v60  ;;  %v861_v26 = vld [vmem:[%s4915_s3 + $0x1c8] sm:$0xff]  ;;  %v2572_v28 = vpack.c.bf16 %v829_v24, %v828_v23  ;;  %v831_v31 = vld [vmem:[%s4915_s3 + $0xd8] sm:$0xff]  ;;  %v238_v40 = vld [vmem:[%s3085_s25 + $0x10] sm:$0xff]  ;;  %v507_v2 = vsel %vm410_vm0, 0.0, %v3140_v60 }
  0x21   : > { %2597 = vmatpush1.bf16.msra.mxu0 %v2596_v32  ;;  %2550 = vmatprep.subr.bf16.mxu1 %v4920_v3  ;;  %v2620_v29 = vpack.c.bf16 %v861_v26, %v860_v25  ;;  %v862_v32 = vld [vmem:[%s4915_s3 + $0x1d0] sm:$0xff]  ;;  %v863_v33 = vld [vmem:[%s4915_s3 + $0x1d8] sm:$0xff]  ;;  %v315_v34 = vadd.f32 %v3111_v46, %v276_v27  ;;  %v2575_v36 = vpack.c.bf16 %v831_v31, %v830_v30  ;;  %v833_v39 = vld [vmem:[%s4915_s3 + $0xe8] sm:$0xff]  ;;  %v682_v31 = vrot.slane %v507_v2, 2 }
  0x22   : > { %2598 = vmatprep.subr.bf16.mxu0 %v4920_v3  ;;  %v239_v35 = vld [vmem:[%s3085_s25 + $0x18] sm:$0xff]  ;;  %v864_v41 = vld [vmem:[%s4915_s3 + $0x1e0] sm:$0xff]  ;;  %v865_v42 = vld [vmem:[%s4915_s3 + $0x1e8] sm:$0xff] }
  0x23   : > { %v347_v43 = vmax.f32 %v315_v34, 0.0  ;;  %v278_v45 = vmul.f32 %v3105_v44, %v239_v35  ;;  %v2626_v49 = vpack.c.bf16 %v865_v42, %v864_v41  ;;  %v834_v50 = vld [vmem:[%s4915_s3 + $0xf0] sm:$0xff]  ;;  %v835_v51 = vld [vmem:[%s4915_s3 + $0xf8] sm:$0xff]  ;;  %v240_v61 = vld [vmem:[%s3085_s25 + $0x20] sm:$0xff] }
  0x24   : > { %2552 = vmatpush1.bf16.msra.mxu1 %v2551_v37  ;;  %v2623_v37 = vpack.c.bf16 %v863_v33, %v862_v32  ;;  %v866_v52 = vld [vmem:[%s4915_s3 + $0x1f0] sm:$0xff]  ;;  %v867_v53 = vld [vmem:[%s4915_s3 + $0x1f8] sm:$0xff]  ;;  %v2581_v58 = vpack.c.bf16 %v835_v51, %v834_v50  ;;  %v901_v10 = vld [vmem:[%s4915_s3 + $0x308] sm:$0xff] }
  0x25   : > { %2600 = vmatpush1.bf16.msra.mxu0 %v2599_v38  ;;  %2553 = vmatprep.subr.bf16.mxu1 %v4920_v3  ;;  %v832_v38 = vld [vmem:[%s4915_s3 + $0xe0] sm:$0xff]  ;;  %v412_v54 = vrot.slane %v347_v43, 7  ;;  %v2629_v62 = vpack.c.bf16 %v867_v53, %v866_v52  ;;  %v870_v16 = vld [vmem:[%s4915_s3 + $0x210] sm:$0xff]  ;;  %v871_v17 = vld [vmem:[%s4915_s3 + $0x218] sm:$0xff] }
  0x26   : > { %2601 = vmatprep.subr.bf16.mxu0 %v4920_v3  ;;  %v243_v18 = vld [vmem:[%s3085_s25 + $0x38] sm:$0xff]  ;;  %v902_v24 = vld [vmem:[%s4915_s3 + $0x310] sm:$0xff]  ;;  %v2635_v27 = vpack.c.bf16 %v871_v17, %v870_v16  ;;  %v872_v34 = vld [vmem:[%s4915_s3 + $0x220] sm:$0xff] }
  0x27   : > { %v3271_v1 = vsel %vm410_vm0, %v3140_v60, %v412_v54  ;;  %v3297_v19 = vsel %vm410_vm0, %v412_v54, 0.0  ;;  %v903_v25 = vld [vmem:[%s4915_s3 + $0x318] sm:$0xff]  ;;  %v873_v35 = vld [vmem:[%s4915_s3 + $0x228] sm:$0xff]  ;;  %v904_v42 = vld [vmem:[%s4915_s3 + $0x320] sm:$0xff] }
  0x28   : > { %2555 = vmatpush1.bf16.msra.mxu1 %v2554_v47  ;;  %v2578_v47 = vpack.c.bf16 %v833_v39, %v832_v38  ;;  %v683_v32 = vrot.slane %v3271_v1, 2  ;;  %v576_v33 = vrot.slane %v3297_v19, 1  ;;  %v3338_v39 = vpack.c.bf16 %v903_v25, %v902_v24  ;;  %v905_v43 = vld [vmem:[%s4915_s3 + $0x328] sm:$0xff]  ;;  %v874_v52 = vld [vmem:[%s4915_s3 + $0x230] sm:$0xff]  ;;  %v875_v53 = vld [vmem:[%s4915_s3 + $0x238] sm:$0xff] }
  0x29   : > { %2603 = vmatpush1.bf16.msra.mxu0 %v2602_v48  ;;  %2556 = vmatprep.subr.bf16.mxu1 %v4920_v3  ;;  %v277_v48 = vmul.f32 %v3105_v44, %v238_v40  ;;  %v877_v16 = vld [vmem:[%s4915_s3 + $0x248] sm:$0xff] }
  0x2a   : > { %2604 = vmatprep.subr.bf16.mxu0 %v4920_v3 }
  0x2b   : > { %v316_v59 = vadd.f32 %v3111_v46, %v277_v48  ;;  %v3356_v48 = vsel %vm679_vm3, %v682_v31, %v683_v32 }
  0x2c   : > { %2558 = vmatpush1.bf16.msra.mxu1 %v2557_v55  ;;  %v317_v55 = vadd.f32 %v3111_v46, %v278_v45  ;;  %v685_v45 = vrot.slane %v3297_v19, 2 }
  0x2d   : > { %2606 = vmatpush1.bf16.msra.mxu0 %v2605_v57  ;;  %2559 = vmatprep.subr.bf16.mxu1 %v4920_v3  ;;  %v241_v57 = vld [vmem:[%s3085_s25 + $0x28] sm:$0xff]  ;;  %v348_v12 = vmax.f32 %v316_v59, 0.0 }
  0x2e   : > { %2607 = vmatprep.subr.bf16.mxu0 %v4920_v3  ;;  %v349_v4 = vmax.f32 %v317_v55, 0.0  ;;  %v280_v5 = vmul.f32 %v3105_v44, %v241_v57 }
  0x2f   : > { %v3312_v26 = vrot.slane %v348_v12, 7 }
  0x30   : > { %2561 = vmatpush1.bf16.msra.mxu1 %v2560_v63  ;;  %v868_v63 = vld [vmem:[%s4915_s3 + $0x200] sm:$0xff]  ;;  %v415_v20 = vrot.slane %v349_v4, 7  ;;  %v2641_v4 = vpack.c.bf16 %v875_v53, %v874_v52 }
  0x31   : > { %2609 = vmatpush1.bf16.msra.mxu0 %v2608_v0  ;;  %2562 = vmatprep.subr.bf16.mxu1 %v4920_v3  ;;  %v869_v0 = vld [vmem:[%s4915_s3 + $0x208] sm:$0xff]  ;;  %5011 = vst [vmem:[#allocation4_spill] sm:$0xff] %v3312_v26 }
  0x32   : > { %2610 = vmatprep.subr.bf16.mxu0 %v4920_v3  ;;  %v2632_v13 = vpack.c.bf16 %v869_v0, %v868_v63  ;;  %v3371_v54 = vsel %vm410_vm0, %v415_v20, 0.0  ;;  %v906_v63 = vld [vmem:[%s4915_s3 + $0x330] sm:$0xff]  ;;  %v907_v0 = vld [vmem:[%s4915_s3 + $0x338] sm:$0xff] }
  0x34   : > { %2564 = vmatpush1.bf16.msra.mxu1 %v2563_v6  ;;  %v279_v6 = vmul.f32 %v3105_v44, %v240_v61 }
  0x35   : > { %2612 = vmatpush1.bf16.msra.mxu0 %v2611_v7  ;;  %2565 = vmatprep.subr.bf16.mxu1 %v4920_v3  ;;  %v900_v7 = vld [vmem:[%s4915_s3 + $0x300] sm:$0xff] }
  0x36   : > { %2613 = vmatprep.subr.bf16.mxu0 %v4920_v3  ;;  %v318_v23 = vadd.f32 %v3111_v46, %v279_v6  ;;  %v3398_v6 = vsel %vm679_vm3, %v683_v32, %v685_v45 }
  0x38   : > { %2567 = vmatpush1.bf16.msra.mxu1 %v2566_v14  ;;  %v573_v14 = vrot.slane %v507_v2, 1  ;;  %v350_v40 = vmax.f32 %v318_v23, 0.0  ;;  %v909_v23 = vld [vmem:[%s4915_s3 + $0x348] sm:$0xff] }
  0x39   : > { %2615 = vmatpush1.bf16.msra.mxu0 %v2614_v15  ;;  %2568 = vmatprep.subr.bf16.mxu1 %v4920_v3  ;;  %v574_v15 = vrot.slane %v3271_v1, 1 }
  0x3a   : > { %2616 = vmatprep.subr.bf16.mxu0 %v4920_v3  ;;  %v3380_v59 = vrot.slane %v350_v40, 7 }
  0x3b   : > { %v3318_v30 = vsel %vm570_vm2, %v573_v14, %v574_v15 }
  0x3c   : > { %2570 = vmatpush1.bf16.msra.mxu1 %v2569_v21  ;;  %v319_v21 = vadd.f32 %v3111_v46, %v280_v5  ;;  %5013 = vst [vmem:[#allocation6_spill] sm:$0xff] %v3380_v59  ;;  %v244_v5 = vld [vmem:[%s3085_s25 + $0x40] sm:$0xff]  ;;  %v3406_v12 = vsel %vm410_vm0, 0.0, %v3380_v59 }
  0x3d   : > { %2618 = vmatpush1.bf16.msra.mxu0 %v2617_v22  ;;  %2571 = vmatprep.subr.bf16.mxu1 %v4920_v3  ;;  %v3300_v22 = vpack.c.bf16 %v901_v10, %v900_v7  ;;  %v581_v10 = vrot.slane %v3371_v54, 1  ;;  %v583_v25 = vrot.slane %v3406_v12, 1  ;;  %v692_v45 = vrot.slane %v3406_v12, 2 }
  0x3e   : > { %2619 = vmatprep.subr.bf16.mxu0 %v4920_v3  ;;  %v351_v38 = vmax.f32 %v319_v21, 0.0  ;;  %v908_v21 = vld [vmem:[%s4915_s3 + $0x340] sm:$0xff] }
  0x40   : > { %2573 = vmatpush1.bf16.msra.mxu1 %v2572_v28  ;;  %v242_v28 = vld [vmem:[%s3085_s25 + $0x30] sm:$0xff]  ;;  %v418_v55 = vrot.slane %v351_v38, 7 }
  0x41   : > { %2621 = vmatpush1.bf16.msra.mxu0 %v2620_v29  ;;  %2574 = vmatprep.subr.bf16.mxu1 %v4920_v3  ;;  %v282_v29 = vmul.f32 %v3105_v44, %v243_v18  ;;  %v281_v41 = vmul.f32 %v3105_v44, %v242_v28  ;;  %v3421_v18 = vpack.c.bf16 %v907_v0, %v906_v63  ;;  %v880_v63 = vld [vmem:[%s4915_s3 + $0x260] sm:$0xff]  ;;  %v881_v0 = vld [vmem:[%s4915_s3 + $0x268] sm:$0xff] }
  0x42   : > { %2622 = vmatprep.subr.bf16.mxu0 %v4920_v3 }
  0x43   : > { %v321_v57 = vadd.f32 %v3111_v46, %v282_v29  ;;  %v320_v61 = vadd.f32 %v3111_v46, %v281_v41  ;;  %v3447_v29 = vsel %vm410_vm0, %v418_v55, 0.0  ;;  %v247_v41 = vld [vmem:[%s3085_s25 + $0x58] sm:$0xff] }
  0x44   : > { %2576 = vmatpush1.bf16.msra.mxu1 %v2575_v36  ;;  %v3331_v36 = vsel %vm410_vm0, %v3312_v26, %v415_v20  ;;  %v283_v20 = vmul.f32 %v3105_v44, %v244_v5  ;;  %v912_v5 = vld [vmem:[%s4915_s3 + $0x360] sm:$0xff] }
  0x45   : > { %2624 = vmatpush1.bf16.msra.mxu0 %v2623_v37  ;;  %2577 = vmatprep.subr.bf16.mxu1 %v4920_v3  ;;  %5012 = vst [vmem:[#allocation5_spill] sm:$0xff] %v3331_v36  ;;  %v3335_v37 = vsel %vm410_vm0, 0.0, %v3312_v26  ;;  %v579_v51 = vrot.slane %v3331_v36, 1  ;;  %v688_v2 = vrot.slane %v3331_v36, 2  ;;  %v353_v14 = vmax.f32 %v321_v57, 0.0 }
  0x46   : > { %2625 = vmatprep.subr.bf16.mxu0 %v4920_v3  ;;  %v578_v50 = vrot.slane %v3335_v37, 1  ;;  %v352_v19 = vmax.f32 %v320_v61, 0.0  ;;  %v322_v40 = vadd.f32 %v3111_v46, %v283_v20  ;;  %v2650_v20 = vpack.c.bf16 %v881_v0, %v880_v63 }
  0x47   : > { %v421_v32 = vrot.slane %v353_v14, 7 }
  0x48   : > { %2579 = vmatpush1.bf16.msra.mxu1 %v2578_v47  ;;  %v2638_v47 = vpack.c.bf16 %v873_v35, %v872_v34  ;;  %v3401_v7 = vsel %vm570_vm2, %v578_v50, %v579_v51  ;;  %v878_v34 = vld [vmem:[%s4915_s3 + $0x250] sm:$0xff]  ;;  %v879_v35 = vld [vmem:[%s4915_s3 + $0x258] sm:$0xff]  ;;  %v3463_v38 = vrot.slane %v352_v19, 7  ;;  %v586_v50 = vrot.slane %v3447_v29, 1 }
  0x49   : > { %2627 = vmatpush1.bf16.msra.mxu0 %v2626_v49  ;;  %2580 = vmatprep.subr.bf16.mxu1 %v4920_v3  ;;  %v3359_v49 = vsel %vm570_vm2, %v574_v15, %v576_v33  ;;  %v876_v15 = vld [vmem:[%s4915_s3 + $0x240] sm:$0xff]  ;;  %v3530_v19 = vsel %vm410_vm0, %v421_v32, 0.0 }
  0x4a   : > { %2628 = vmatprep.subr.bf16.mxu0 %v4920_v3  ;;  %v2644_v31 = vpack.c.bf16 %v877_v16, %v876_v15  ;;  %5015 = vst [vmem:[#allocation8_spill] sm:$0xff] %v3463_v38  ;;  %v3493_v57 = vsel %vm410_vm0, %v3463_v38, %v421_v32  ;;  %v695_v15 = vrot.slane %v3447_v29, 2  ;;  %v249_v32 = vld [vmem:[%s3085_s25 + $0x68] sm:$0xff] }
  0x4b   : > { %5016 = vst [vmem:[#allocation9_spill] sm:$0xff] %v3493_v57 }
  0x4c   : > { %2582 = vmatpush1.bf16.msra.mxu1 %v2581_v58  ;;  %v3375_v58 = vpack.c.bf16 %v905_v43, %v904_v42  ;;  %v910_v42 = vld [vmem:[%s4915_s3 + $0x350] sm:$0xff]  ;;  %v911_v43 = vld [vmem:[%s4915_s3 + $0x358] sm:$0xff] }
  0x4d   : > { %2630 = vmatpush1.bf16.msra.mxu0 %v2629_v62  ;;  %2759 = vmatprep.subr.bf16.mxu1 %v4920_v3  ;;  %v245_v62 = vld [vmem:[%s3085_s25 + $0x48] sm:$0xff] }
  0x4e   : > { %2631 = vmatprep.subr.bf16.mxu0 %v4920_v3  ;;  %v284_v17 = vmul.f32 %v3105_v44, %v245_v62  ;;  %v286_v62 = vmul.f32 %v3105_v44, %v247_v41  ;;  %v591_v41 = vrot.slane %v3530_v19, 1 }
  0x4f   : > { %1013 = vmatmul.mubr.f32.vlgmr.msra.gmra.mrb[0].mxu1 %v4918_v8 }
  0x50   : > { %1238 = vmatmul.mubr.f32.vlgmr.msra.gmra.mrb[0].mxu0 %v3284_v11  ;;  %1017 = vmatprep.mubr.f32.mxu1 %v3008_v9  ;;  %v323_v33 = vadd.f32 %v3111_v46, %v284_v17  ;;  %v589_v17 = vrot.slane %v3493_v57, 1 }
  0x51   : > { %2633 = vmatpush1.bf16.msra.mxu0 %v2632_v13  ;;  %1242 = vmatprep.mubr.f32.mxu0 %v3271_v1  ;;  %v3410_v13 = vsel %vm410_vm0, %v3380_v59, %v418_v55  ;;  %v2647_v55 = vpack.c.bf16 %v879_v35, %v878_v34  ;;  %v915_v34 = vld [vmem:[%s4915_s3 + $0x378] sm:$0xff] }
  0x52   : > { %2634 = vmatprep.subr.bf16.mxu0 %v4920_v3  ;;  %2775 = vmatpush1.bf16.msra.mxu1 %v3300_v22  ;;  %5014 = vst [vmem:[#allocation7_spill] sm:$0xff] %v3410_v13  ;;  %v584_v28 = vrot.slane %v3410_v13, 1  ;;  %v355_v61 = vmax.f32 %v323_v33, 0.0  ;;  %v914_v33 = vld [vmem:[%s4915_s3 + $0x370] sm:$0xff] }
  0x53   : > { %1018 = vmatmul.mubr.f32.gmra.mrb[2].mxu1 %v4918_v8  ;;  %2760 = vmatprep.subr.bf16.mxu1 %v4920_v3  ;;  %v3587_v63 = vpack.c.bf16 %v915_v34, %v914_v33  ;;  %v887_v33 = vld [vmem:[%s4915_s3 + $0x298] sm:$0xff]  ;;  %v889_v8 = vld [vmem:[%s4915_s3 + $0x2a8] sm:$0xff] }
  0x54   : > { %1243 = vmatmul.mubr.f32.gmra.mrb[2].mxu0 %v3284_v11  ;;  %1022 = vmatprep.mubr.f32.mxu1 %v3318_v30  ;;  %v3485_v53 = vsel %vm570_vm2, %v583_v25, %v584_v28  ;;  %v3521_v14 = vsel %vm570_vm2, %v584_v28, %v586_v50  ;;  %v883_v25 = vld [vmem:[%s4915_s3 + $0x278] sm:$0xff] }
  0x55   : > { %2344 = vmatprep.mubr.msk.f32.mxu0 %vm3129_vm1, %v3312_v26  ;;  %2636 = vmatpush1.bf16.msra.mxu0 %v2635_v27  ;;  %v3443_v27 = vsel %vm570_vm2, %v579_v51, %v581_v10  ;;  %v246_v51 = vld [vmem:[%s3085_s25 + $0x50] sm:$0xff]  ;;  %v913_v10 = vld [vmem:[%s4915_s3 + $0x368] sm:$0xff]  ;;  %5020 = vst [vmem:[#allocation13_spill] sm:$0xff] %v3587_v63 }
  0x56   : > { %2637 = vmatprep.subr.bf16.mxu0 %v4920_v3  ;;  %2776 = vmatpush1.bf16.msra.mxu1 %v3338_v39  ;;  %v3541_v28 = vpack.c.bf16 %v913_v10, %v912_v5  ;;  %v917_v5 = vld [vmem:[%s4915_s3 + $0x388] sm:$0xff] }
  0x57   : > { %2312 = vmatmul.mubr.msk.f32.gmra.mrb[4].mxu1 %vm3129_vm1, %v3140_v60  ;;  %2761 = vmatprep.subr.bf16.mxu1 %v4920_v3  ;;  %v687_v60 = vrot.slane %v3335_v37, 2  ;;  %v3458_v37 = vpack.c.bf16 %v909_v23, %v908_v21  ;;  %v424_v21 = vrot.slane %v355_v61, 7  ;;  %v325_v23 = vadd.f32 %v3111_v46, %v286_v62  ;;  %v885_v62 = vld [vmem:[%s4915_s3 + $0x288] sm:$0xff] }
  0x58   : > { %1248 = vmatmul.mubr.f32.gmra.mrb[4].mxu0 %v3356_v48  ;;  %1027 = vmatprep.mubr.f32.mxu1 %v3359_v49  ;;  %5017 = vst [vmem:[#allocation10_spill] sm:$0xff] %v3541_v28  ;;  %v288_v61 = vmul.f32 %v3105_v44, %v249_v32  ;;  %v250_v32 = vld [vmem:[%s3085_s25 + $0x70] sm:$0xff] }
  0x59   : > { %1252 = vmatprep.mubr.f32.mxu0 %v3331_v36  ;;  %2639 = vmatpush1.bf16.msra.mxu0 %v2638_v47  ;;  %v3435_v24 = vsel %vm679_vm3, %v687_v60, %v688_v2  ;;  %v693_v47 = vrot.slane %v3410_v13, 2  ;;  %v3504_v60 = vpack.c.bf16 %v911_v43, %v910_v42  ;;  %v248_v42 = vld [vmem:[%s3085_s25 + $0x60] sm:$0xff] }
  0x5a   : > { %2640 = vmatprep.subr.bf16.mxu0 %v4920_v3  ;;  %2777 = vmatpush1.bf16.msra.mxu1 %v3375_v58 }
  0x5b   : > { %1028 = vmatmul.mubr.f32.gmra.mrb[6].mxu1 %v3271_v1  ;;  %2762 = vmatprep.subr.bf16.mxu1 %v4920_v3  ;;  %v690_v1 = vrot.slane %v3371_v54, 2  ;;  %v3489_v54 = vsel %vm410_vm0, 0.0, %v3463_v38  ;;  %v3518_v12 = vsel %vm679_vm3, %v692_v45, %v693_v47  ;;  %v3565_v43 = vsel %vm679_vm3, %v693_v47, %v695_v15  ;;  %v884_v47 = vld [vmem:[%s4915_s3 + $0x280] sm:$0xff] }
  0x5c   : > { %1253 = vmatmul.mubr.f32.gmra.mrb[6].mxu0 %v3398_v6  ;;  %1032 = vmatprep.mubr.f32.mxu1 %v3401_v7  ;;  %v588_v16 = vrot.slane %v3489_v54, 1  ;;  %v697_v35 = vrot.slane %v3489_v54, 2  ;;  %v3604_v15 = vsel %vm570_vm2, %v589_v17, %v591_v41  ;;  %v251_v41 = vld [vmem:[%s3085_s25 + $0x78] sm:$0xff] }
  0x5d   : > { %2346 = vmatprep.mubr.msk.f32.mxu0 %vm3129_vm1, %v3380_v59  ;;  %2642 = vmatpush1.bf16.msra.mxu0 %v2641_v4  ;;  %v3482_v52 = vsel %vm679_vm3, %v688_v2, %v690_v1  ;;  %v354_v2 = vmax.f32 %v322_v40, 0.0  ;;  %v285_v4 = vmul.f32 %v3105_v44, %v246_v51  ;;  %v882_v1 = vld [vmem:[%s4915_s3 + $0x270] sm:$0xff]  ;;  %v698_v40 = vrot.slane %v3493_v57, 2  ;;  %5021 = vst [vmem:[#allocation14_spill] sm:$0xff] %v3604_v15 }
  0x5e   : > { %2643 = vmatprep.subr.bf16.mxu0 %v4920_v3  ;;  %2778 = vmatpush1.bf16.msra.mxu1 %v3421_v18  ;;  %v3568_v45 = vsel %vm570_vm2, %v588_v16, %v589_v17  ;;  %v2653_v51 = vpack.c.bf16 %v883_v25, %v882_v1  ;;  %v700_v16 = vrot.slane %v3530_v19, 2  ;;  %v3613_v1 = vsel %vm410_vm0, %v424_v21, 0.0  ;;  %v886_v19 = vld [vmem:[%s4915_s3 + $0x290] sm:$0xff] }
  0x5f   : > { %2314 = vmatmul.mubr.msk.f32.gmra.mrb[8].mxu1 %vm3129_vm1, %v3312_v26  ;;  %2763 = vmatprep.subr.bf16.mxu1 %v4920_v3  ;;  %v3546_v29 = vrot.slane %v354_v2, 7  ;;  %v287_v2 = vmul.f32 %v3105_v44, %v248_v42  ;;  %v3601_v10 = vsel %vm679_vm3, %v697_v35, %v698_v40  ;;  %v2656_v25 = vpack.c.bf16 %v885_v62, %v884_v47  ;;  %v918_v42 = vld [vmem:[%s4915_s3 + $0x390] sm:$0xff]  ;;  %v893_v26 = vld [vmem:[%s4915_s3 + $0x2c8] sm:$0xff] }
  0x60   : > { %1258 = vmatmul.mubr.f32.gmra.mrb[8].mxu0 %v3435_v24  ;;  %1037 = vmatprep.mubr.f32.mxu1 %v3443_v27  ;;  %v327_v17 = vadd.f32 %v3111_v46, %v288_v61  ;;  %v596_v62 = vrot.slane %v3613_v1, 1 }
  0x61   : > { %1262 = vmatprep.mubr.f32.mxu0 %v3410_v13  ;;  %2645 = vmatpush1.bf16.msra.mxu0 %v2644_v31  ;;  %5018 = vst [vmem:[#allocation11_spill] sm:$0xff] %v3546_v29  ;;  %v324_v31 = vadd.f32 %v3111_v46, %v285_v4  ;;  %v3572_v50 = vsel %vm410_vm0, 0.0, %v3546_v29  ;;  %v3576_v54 = vsel %vm410_vm0, %v3546_v29, %v424_v21  ;;  %v916_v4 = vld [vmem:[%s4915_s3 + $0x380] sm:$0xff] }
  0x62   : > { %2646 = vmatprep.subr.bf16.mxu0 %v4920_v3  ;;  %2779 = vmatpush1.bf16.msra.mxu1 %v3458_v37  ;;  %5019 = vst [vmem:[#allocation12_spill] sm:$0xff] %v3576_v54  ;;  %v3625_v21 = vpack.c.bf16 %v917_v5, %v916_v4  ;;  %v326_v35 = vadd.f32 %v3111_v46, %v287_v2  ;;  %v702_v61 = vrot.slane %v3572_v50, 2  ;;  %v703_v47 = vrot.slane %v3576_v54, 2 }
  0x63   : > { %1038 = vmatmul.mubr.f32.gmra.mrb[10].mxu1 %v3331_v36  ;;  %2764 = vmatprep.subr.bf16.mxu1 %v4920_v3  ;;  %v356_v0 = vmax.f32 %v324_v31, 0.0  ;;  %v289_v4 = vmul.f32 %v3105_v44, %v250_v32  ;;  %v359_v5 = vmax.f32 %v327_v17, 0.0  ;;  %v920_v17 = vld [vmem:[%s4915_s3 + $0x3a0] sm:$0xff] }
  0x64   : > { %1263 = vmatmul.mubr.f32.gmra.mrb[10].mxu0 %v3482_v52  ;;  %1042 = vmatprep.mubr.f32.mxu1 %v3485_v53  ;;  %5022 = vst [vmem:[#allocation15_spill] sm:$0xff] %v3625_v21  ;;  %v358_v32 = vmax.f32 %v326_v35, 0.0  ;;  %v705_v35 = vrot.slane %v3613_v1, 2  ;;  %v5028_v1 = vmov 0.0|0.0  }
  0x65   : > { %2348 = vmatprep.mubr.msk.f32.mxu0 %vm3129_vm1, %v3463_v38  ;;  %2648 = vmatpush1.bf16.msra.mxu0 %v2647_v55  ;;  %v357_v55 = vmax.f32 %v325_v23, 0.0  ;;  %v594_v23 = vrot.slane %v3576_v54, 1  ;;  %v3630_v34 = vrot.slane %v356_v0, 7 }
  0x66   : > { %2649 = vmatprep.subr.bf16.mxu0 %v4920_v3  ;;  %2780 = vmatpush1.bf16.msra.mxu1 %v3504_v60 }
  0x67   : > { %2316 = vmatmul.mubr.msk.f32.gmra.mrb[12].mxu1 %vm3129_vm1, %v3380_v59  ;;  %2765 = vmatprep.subr.bf16.mxu1 %v4920_v3  ;;  %v427_v31 = vrot.slane %v357_v55, 7  ;;  %v3644_v55 = vsel %vm679_vm3, %v698_v40, %v700_v16  ;;  %v3655_v2 = vsel %vm410_vm0, 0.0, %v3630_v34  ;;  %v2659_v40 = vpack.c.bf16 %v887_v33, %v886_v19  ;;  %v921_v19 = vld [vmem:[%s4915_s3 + $0x3a8] sm:$0xff] }
  0x68   : > { %1268 = vmatmul.mubr.f32.gmra.mrb[12].mxu0 %v3518_v12  ;;  %1047 = vmatprep.mubr.f32.mxu1 %v3521_v14  ;;  %5023 = vst [vmem:[#allocation16_spill] sm:$0xff] %v3644_v55  ;;  %v290_v16 = vmul.f32 %v3105_v44, %v251_v41  ;;  %v3684_v33 = vsel %vm679_vm3, %v702_v61, %v703_v47 }
  0x69   : > { %1272 = vmatprep.mubr.f32.mxu0 %v3493_v57  ;;  %2651 = vmatpush1.bf16.msra.mxu0 %v2650_v20  ;;  %v593_v20 = vrot.slane %v3572_v50, 1  ;;  %v3660_v50 = vsel %vm410_vm0, %v3630_v34, %v427_v31  ;;  %5026 = vst [vmem:[#allocation19_spill] sm:$0xff] %v3684_v33  ;;  %v3687_v41 = vsel %vm570_vm2, %v594_v23, %v596_v62 }
  0x6a   : > { %2652 = vmatprep.subr.bf16.mxu0 %v4920_v3  ;;  %2781 = vmatpush1.bf16.msra.mxu1 %v3541_v28  ;;  %5027 = vst [vmem:[#allocation20_spill] sm:$0xff] %v3687_v41  ;;  %v328_v61 = vadd.f32 %v3111_v46, %v289_v4  ;;  %v329_v62 = vadd.f32 %v3111_v46, %v290_v16  ;;  %v253_v4 = vld [vmem:[%s3085_s25 + $0x88] sm:$0xff]  ;;  %v260_v28 = vld [vmem:[%s3085_s25 + $0xc0] sm:$0xff] }
  0x6b   : > { %1048 = vmatmul.mubr.f32.gmra.mrb[14].mxu1 %v3410_v13  ;;  %2766 = vmatprep.subr.bf16.mxu1 %v4920_v3  ;;  %v3651_v0 = vsel %vm570_vm2, %v593_v20, %v594_v23  ;;  %v888_v20 = vld [vmem:[%s4915_s3 + $0x2a0] sm:$0xff]  ;;  %v430_v23 = vrot.slane %v359_v5, 7  ;;  %v923_v5 = vld [vmem:[%s4915_s3 + $0x3b8] sm:$0xff]  ;;  %v3726_v16 = vsel %vm679_vm3, %v703_v47, %v705_v35  ;;  %v292_v36 = vmul.f32 %v3105_v44, %v253_v4 }
  0x6c   : > { %1273 = vmatmul.mubr.f32.gmra.mrb[14].mxu0 %v3565_v43  ;;  %1052 = vmatprep.mubr.f32.mxu1 %v3568_v45  ;;  %5024 = vst [vmem:[#allocation17_spill] sm:$0xff] %v3651_v0  ;;  %v2662_v11 = vpack.c.bf16 %v889_v8, %v888_v20  ;;  %v3713_v8 = vrot.slane %v358_v32, 7  ;;  %5030 = vst [vmem:[#allocation22_spill] sm:$0xff] %v3726_v16  ;;  %v707_v20 = vrot.slane %v3655_v2, 2  ;;  %v708_v32 = vrot.slane %v3660_v50, 2 }
  0x6d   : > { %2350 = vmatprep.mubr.msk.f32.mxu0 %vm3129_vm1, %v3546_v29  ;;  %2654 = vmatpush1.bf16.msra.mxu0 %v2653_v51  ;;  %v919_v51 = vld [vmem:[%s4915_s3 + $0x398] sm:$0xff]  ;;  %v360_v59 = vmax.f32 %v328_v61, 0.0  ;;  %v361_v35 = vmax.f32 %v329_v62, 0.0  ;;  %v925_v61 = vld [vmem:[%s4915_s3 + $0x3c8] sm:$0xff] }
  0x6e   : > { %2655 = vmatprep.subr.bf16.mxu0 %v4920_v3  ;;  %2782 = vmatpush1.bf16.msra.mxu1 %v3587_v63  ;;  %v3738_v13 = vsel %vm410_vm0, 0.0, %v3713_v8  ;;  %v3767_v62 = vsel %vm679_vm3, %v707_v20, %v708_v32  ;;  %v3781_v20 = vsel %vm410_vm0, %v430_v23, 0.0 }
  0x6f   : > { %2318 = vmatmul.mubr.msk.f32.gmra.mrb[16].mxu1 %vm3129_vm1, %v3463_v38  ;;  %2767 = vmatprep.subr.bf16.mxu1 %v4920_v3  ;;  %v891_v38 = vld [vmem:[%s4915_s3 + $0x2b8] sm:$0xff]  ;;  %5032 = vst [vmem:[#allocation24_spill] sm:$0xff] %v3767_v62 }
  0x70   : > { %1278 = vmatmul.mubr.f32.gmra.mrb[16].mxu0 %v3601_v10  ;;  %1057 = vmatprep.mubr.f32.mxu1 %v3604_v15 }
  0x71   : > { %1282 = vmatprep.mubr.f32.mxu0 %v3576_v54  ;;  %2657 = vmatpush1.bf16.msra.mxu0 %v2656_v25  ;;  %v3671_v25 = vpack.c.bf16 %v919_v51, %v918_v42  ;;  %v598_v42 = vrot.slane %v3655_v2, 1  ;;  %v599_v51 = vrot.slane %v3660_v50, 1  ;;  %v3742_v2 = vsel %vm410_vm0, %v3713_v8, %v430_v23  ;;  %v926_v23 = vld [vmem:[%s4915_s3 + $0x3d0] sm:$0xff] }
  0x72   : > { %2658 = vmatprep.subr.bf16.mxu0 %v4920_v3  ;;  %2783 = vmatpush1.bf16.msra.mxu1 %v3625_v21 }
  0x73   : > { %5025 = vst [vmem:[#allocation18_spill] sm:$0xff] %v3671_v25  ;;  %1058 = vmatmul.mubr.f32.gmra.mrb[18].mxu1 %v3493_v57  ;;  %2768 = vmatprep.subr.bf16.mxu1 %v4920_v3  ;;  %v3696_v3 = vsel %vm410_vm0, %v427_v31, 0.0  ;;  %v890_v57 = vld [vmem:[%s4915_s3 + $0x2b0] sm:$0xff]  ;;  %v3708_v31 = vpack.c.bf16 %v921_v19, %v920_v17  ;;  %v252_v19 = vld [vmem:[%s3085_s25 + $0x80] sm:$0xff] }
  0x74   : > { %1283 = vmatmul.mubr.f32.gmra.mrb[18].mxu0 %v3644_v55  ;;  %1062 = vmatprep.mubr.f32.mxu1 %v3651_v0  ;;  %v601_v17 = vrot.slane %v3696_v3, 1  ;;  %v2665_v47 = vpack.c.bf16 %v891_v38, %v890_v57  ;;  %v291_v38 = vmul.f32 %v3105_v44, %v252_v19  ;;  %v924_v57 = vld [vmem:[%s4915_s3 + $0x3c0] sm:$0xff]  ;;  %v604_v19 = vrot.slane %v3742_v2, 1 }
  0x75   : > { %2352 = vmatprep.mubr.msk.f32.mxu0 %vm3129_vm1, %v3630_v34  ;;  %2660 = vmatpush1.bf16.msra.mxu0 %v2659_v40  ;;  %5029 = vst [vmem:[#allocation21_spill] sm:$0xff] %v3708_v31  ;;  %v922_v40 = vld [vmem:[%s4915_s3 + $0x3b0] sm:$0xff]  ;;  %v3917_v0 = vld [vmem:[%s4913_s1] ss:$0 sm:$0xff] }
  0x76   : > { %2661 = vmatprep.subr.bf16.mxu0 %v5028_v1  ;;  %2784 = vmatpush1.bf16.msra.mxu1 %v3671_v25  ;;  %v3770_v4 = vsel %vm570_vm2, %v599_v51, %v601_v17  ;;  %v331_v17 = vadd.f32 %v3111_v46, %v292_v36  ;;  %v255_v36 = vld [vmem:[%s3085_s25 + $0x98] sm:$0xff]  ;;  %v254_v25 = vld [vmem:[%s3085_s25 + $0x90] sm:$0xff] }
  0x77   : > { %2320 = vmatmul.mubr.msk.f32.gmra.mrb[20].mxu1 %vm3129_vm1, %v3546_v29  ;;  %2769 = vmatprep.subr.bf16.mxu1 %v5028_v1  ;;  %v3734_v29 = vsel %vm570_vm2, %v598_v42, %v599_v51  ;;  %v892_v42 = vld [vmem:[%s4915_s3 + $0x2c0] sm:$0xff]  ;;  %v433_v51 = vrot.slane %v361_v35, 7 }
  0x78   : > { %1288 = vmatmul.mubr.f32.gmra.mrb[20].mxu0 %v3684_v33  ;;  %1067 = vmatprep.mubr.f32.mxu1 %v3687_v41  ;;  %v2668_v9 = vpack.c.bf16 %v893_v26, %v892_v42  ;;  %v330_v26 = vadd.f32 %v3111_v46, %v291_v38  ;;  %v712_v42 = vrot.slane %v3738_v13, 2  ;;  %v897_v41 = vld [vmem:[%s4915_s3 + $0x2e8] sm:$0xff] }
  0x79   : > { %1292 = vmatprep.mubr.f32.mxu0 %v3660_v50  ;;  %2663 = vmatpush1.bf16.msra.mxu0 %v2662_v11  ;;  %v3753_v11 = vpack.c.bf16 %v923_v5, %v922_v40  ;;  %v710_v40 = vrot.slane %v3696_v3, 2  ;;  %v603_v5 = vrot.slane %v3738_v13, 1  ;;  %v894_v3 = vld [vmem:[%s4915_s3 + $0x2d0] sm:$0xff]  ;;  %v363_v13 = vmax.f32 %v331_v17, 0.0  ;;  %v928_v17 = vld [vmem:[%s4915_s3 + $0x3e0] sm:$0xff] }
  0x7a   : > { %2664 = vmatprep.subr.bf16.mxu0 %v5028_v1  ;;  %2785 = vmatpush1.bf16.msra.mxu1 %v3708_v31  ;;  %v895_v31 = vld [vmem:[%s4915_s3 + $0x2d8] sm:$0xff] }
  0x7b   : > { %5031 = vst [vmem:[#allocation23_spill] sm:$0xff] %v3753_v11  ;;  %1068 = vmatmul.mubr.f32.gmra.mrb[22].mxu1 %v3576_v54  ;;  %2770 = vmatprep.subr.bf16.mxu1 %v5028_v1  ;;  %v3778_v54 = vrot.slane %v360_v59, 7  ;;  %v3792_v59 = vpack.c.bf16 %v925_v61, %v924_v57  ;;  %v3809_v35 = vsel %vm679_vm3, %v708_v32, %v710_v40  ;;  %v713_v61 = vrot.slane %v3742_v2, 2 }
  0x7c   : > { %1293 = vmatmul.mubr.f32.gmra.mrb[22].mxu0 %v3726_v16  ;;  %1072 = vmatprep.mubr.f32.mxu1 %v3734_v29  ;;  %5034 = vst [vmem:[#allocation26_spill] sm:$0xff] %v3809_v35  ;;  %v3818_v57 = vsel %vm570_vm2, %v603_v5, %v604_v19  ;;  %v294_v40 = vmul.f32 %v3105_v44, %v255_v36  ;;  %v896_v5 = vld [vmem:[%s4915_s3 + $0x2e0] sm:$0xff]  ;;  %v715_v36 = vrot.slane %v3781_v20, 2  ;;  %v436_v16 = vrot.slane %v363_v13, 7 }
  0x7d   : > { %2354 = vmatprep.mubr.msk.f32.mxu0 %vm3129_vm1, %v3713_v8  ;;  %2666 = vmatpush1.bf16.msra.mxu0 %v2665_v47  ;;  %5033 = vst [vmem:[#allocation25_spill] sm:$0xff] %v3792_v59  ;;  %v927_v47 = vld [vmem:[%s4915_s3 + $0x3d8] sm:$0xff]  ;;  %v3814_v38 = vsel %vm410_vm0, 0.0, %v3778_v54  ;;  %v3825_v32 = vsel %vm410_vm0, %v3778_v54, %v433_v51  ;;  %v2674_v21 = vpack.c.bf16 %v897_v41, %v896_v5 }
  0x7e   : > { %2667 = vmatprep.subr.bf16.mxu0 %v5028_v1  ;;  %2786 = vmatpush1.bf16.msra.mxu1 %v3753_v11  ;;  %v606_v11 = vrot.slane %v3781_v20, 1  ;;  %v3862_v20 = vsel %vm410_vm0, %v433_v51, 0.0  ;;  %v930_v51 = vld [vmem:[%s4915_s3 + $0x3f0] sm:$0xff]  ;;  %v3891_v13 = vsel %vm679_vm3, %v713_v61, %v715_v36  ;;  %v718_v5 = vrot.slane %v3825_v32, 2  ;;  %v256_v36 = vld [vmem:[%s3085_s25 + $0xa0] sm:$0xff] }
  0x7f   : > { %2322 = vmatmul.mubr.msk.f32.gmra.mrb[24].mxu1 %vm3129_vm1, %v3630_v34  ;;  %2771 = vmatprep.subr.bf16.mxu1 %v5028_v1  ;;  %5038 = vst [vmem:[#allocation30_spill] sm:$0xff] %v3891_v13 }
  0x80   : > { %1298 = vmatmul.mubr.f32.gmra.mrb[24].mxu0 %v3767_v62  ;;  %1077 = vmatprep.mubr.f32.mxu1 %v3770_v4  ;;  %v2671_v62 = vpack.c.bf16 %v895_v31, %v894_v3  ;;  %v362_v31 = vmax.f32 %v330_v26, 0.0  ;;  %v929_v3 = vld [vmem:[%s4915_s3 + $0x3e8] sm:$0xff]  ;;  %v293_v26 = vmul.f32 %v3105_v44, %v254_v25  ;;  %v333_v44 = vadd.f32 %v3111_v46, %v294_v40  ;;  %v898_v25 = vld [vmem:[%s4915_s3 + $0x2f0] sm:$0xff] }
  0x81   : > { %1302 = vmatprep.mubr.f32.mxu0 %v3742_v2  ;;  %2669 = vmatpush1.bf16.msra.mxu0 %v2668_v9  ;;  %v3836_v9 = vpack.c.bf16 %v927_v47, %v926_v23  ;;  %v608_v23 = vrot.slane %v3814_v38, 1  ;;  %v3855_v47 = vsel %vm679_vm3, %v712_v42, %v713_v61  ;;  %v931_v42 = vld [vmem:[%s4915_s3 + $0x3f8] sm:$0xff]  ;;  %v717_v40 = vrot.slane %v3814_v38, 2 }
  0x82   : > { %2670 = vmatprep.subr.bf16.mxu0 %v5028_v1  ;;  %2787 = vmatpush1.bf16.msra.mxu1 %v3792_v59  ;;  %5036 = vst [vmem:[#allocation28_spill] sm:$0xff] %v3855_v47  ;;  %v3858_v59 = vsel %vm570_vm2, %v604_v19, %v606_v11  ;;  %v899_v11 = vld [vmem:[%s4915_s3 + $0x2f8] sm:$0xff]  ;;  %v3878_v41 = vrot.slane %v362_v31, 7  ;;  %v257_v19 = vld [vmem:[%s3085_s25 + $0xa8] sm:$0xff]  ;;  %v332_v31 = vadd.f32 %v3111_v46, %v293_v26  ;;  %v611_v61 = vrot.slane %v3862_v20, 1 }
  0x83   : > { %5035 = vst [vmem:[#allocation27_spill] sm:$0xff] %v3836_v9  ;;  %1078 = vmatmul.mubr.f32.gmra.mrb[26].mxu1 %v3660_v50  ;;  %2772 = vmatprep.subr.bf16.mxu1 %v5028_v1  ;;  %v2677_v46 = vpack.c.bf16 %v899_v11, %v898_v25  ;;  %v3922_v63 = vpack.c.bf16 %v931_v42, %v930_v51 }
  0x84   : > { %1303 = vmatmul.mubr.f32.gmra.mrb[26].mxu0 %v3809_v35  ;;  %1082 = vmatprep.mubr.f32.mxu1 %v3818_v57  ;;  %v609_v35 = vrot.slane %v3825_v32, 1  ;;  %v515_v38 = vsel %vm410_vm0, 0.0, %v3878_v41  ;;  %v3912_v26 = vsel %vm410_vm0, %v3878_v41, %v436_v16  ;;  %v364_v25 = vmax.f32 %v332_v31, 0.0  ;;  %v3946_v31 = vld [vmem:[%s4914_s2] ss:$0 sm:$0xff] }
  0x85   : > { %2356 = vmatprep.mubr.msk.f32.mxu0 %vm3129_vm1, %v3778_v54  ;;  %2672 = vmatpush1.bf16.msra.mxu0 %v2671_v62  ;;  %v3873_v62 = vpack.c.bf16 %v929_v3, %v928_v17  ;;  %v932_v17 = vld [vmem:[%s4915_s3 + $0x400] sm:$0xff]  ;;  %v933_v3 = vld [vmem:[%s4915_s3 + $0x408] sm:$0xff]  ;;  %5039 = vst [vmem:[#allocation31_spill] sm:$0xff] %v3912_v26  ;;  %5040 = vst [vmem:[#allocation32_spill] sm:$0xff] %v3922_v63  ;;  %v295_v11 = vmul.f32 %v3917_v0, %v256_v36  ;;  %v613_v42 = vrot.slane %v515_v38, 1 }
  0x86   : > { %2673 = vmatprep.subr.bf16.mxu0 %v5028_v1  ;;  %2788 = vmatpush1.bf16.msra.mxu1 %v3836_v9  ;;  %v3904_v9 = vsel %vm570_vm2, %v608_v23, %v609_v35  ;;  %v296_v23 = vmul.f32 %v3917_v0, %v257_v19  ;;  %v3936_v19 = vsel %vm679_vm3, %v717_v40, %v718_v5 }
  0x87   : > { %5037 = vst [vmem:[#allocation29_spill] sm:$0xff] %v3873_v62  ;;  %2324 = vmatmul.mubr.msk.f32.gmra.mrb[28].mxu1 %vm3129_vm1, %v3713_v8  ;;  %2773 = vmatprep.subr.bf16.mxu1 %v5028_v1  ;;  %5041 = vst [vmem:[#allocation33_spill] sm:$0xff] %v3936_v19  ;;  %v3939_v51 = vsel %vm570_vm2, %v609_v35, %v611_v61  ;;  %v259_v35 = vld [vmem:[%s3085_s25 + $0xb8] sm:$0xff]  ;;  %v334_v40 = vadd.f32 %v3946_v31, %v295_v11 }
  0x88   : > { %1308 = vmatmul.mubr.f32.gmra.mrb[28].mxu0 %v3855_v47  ;;  %1087 = vmatprep.mubr.f32.mxu1 %v3858_v59  ;;  %v365_v47 = vmax.f32 %v333_v44, 0.0  ;;  %v720_v44 = vrot.slane %v3862_v20, 2  ;;  %v531_v20 = vsel %vm410_vm0, %v436_v16, 0.0  ;;  %v335_v36 = vadd.f32 %v3946_v31, %v296_v23 }
  0x89   : > { %1312 = vmatprep.mubr.f32.mxu0 %v3825_v32  ;;  %2675 = vmatpush1.bf16.msra.mxu0 %v2674_v21  ;;  %v3926_v21 = vpack.c.bf16 %v933_v3, %v932_v17  ;;  %v614_v17 = vrot.slane %v3912_v26, 1  ;;  %v723_v23 = vrot.slane %v3912_v26, 2  ;;  %v366_v11 = vmax.f32 %v334_v40, 0.0 }
  0x8a   : > { %2676 = vmatprep.subr.bf16.mxu0 %v5028_v1  ;;  %2789 = vmatpush1.bf16.msra.mxu1 %v3873_v62  ;;  %v439_v3 = vrot.slane %v365_v47, 7  ;;  %v3959_v16 = vsel %vm679_vm3, %v718_v5, %v720_v44  ;;  %v3961_v47 = vrot.slane %v364_v25, 7  ;;  %v258_v62 = vld [vmem:[%s3085_s25 + $0xb0] sm:$0xff]  ;;  %v367_v44 = vmax.f32 %v335_v36, 0.0 }
  0x8b   : > { %1088 = vmatmul.mubr.f32.gmra.mrb[30].mxu1 %v3742_v2  ;;  %2774 = vmatprep.subr.bf16.mxu1 %v5028_v1  ;;  %5042 = vst [vmem:[#allocation34_spill] sm:$0xff] %v3959_v16  ;;  %v3966_v61 = vsel %vm570_vm2, %v613_v42, %v614_v17  ;;  %v298_v25 = vmul.f32 %v3917_v0, %v259_v35 }
  0x8c   : > { %1313 = vmatmul.mubr.f32.gmra.mrb[30].mxu0 %v3891_v13  ;;  %1092 = vmatprep.mubr.f32.mxu1 %v3904_v9  ;;  %5043 = vst [vmem:[#allocation35_spill] sm:$0xff] %v3961_v47  ;;  %v516_v5 = vsel %vm410_vm0, 0.0, %v3961_v47  ;;  %v297_v42 = vmul.f32 %v3917_v0, %v258_v62  ;;  %v261_v62 = vld [vmem:[%s3085_s25 + $0xc8] sm:$0xff] }
  0x8d   : > { %2358 = vmatprep.mubr.msk.f32.mxu0 %vm3129_vm1, %v3878_v41  ;;  %2678 = vmatpush1.bf16.msra.mxu0 %v2677_v46  ;;  %v722_v46 = vrot.slane %v515_v38, 2  ;;  %v725_v38 = vrot.slane %v531_v20, 2  ;;  %v618_v35 = vrot.slane %v516_v5, 1  ;;  %v337_v40 = vadd.f32 %v3946_v31, %v298_v25 }
  0x8e   : > { %2790 = vmatpush1.bf16.msra.mxu1 %v3922_v63  ;;  %2679 = vmatprep.subr.bf16.mxu0 %v5028_v1  ;;  %v616_v63 = vrot.slane %v531_v20, 1  ;;  %v442_v20 = vrot.slane %v367_v44, 7  ;;  %v727_v44 = vrot.slane %v516_v5, 2 }
  0x8f   : > { %2326 = vmatmul.mubr.msk.f32.gmra.mrb[32].mxu1 %vm3129_vm1, %v3778_v54  ;;  %2728 = vmatprep.subr.bf16.mxu1 %v3926_v21  ;;  %v3985_v13 = vsel %vm679_vm3, %v722_v46, %v723_v23  ;;  %v336_v46 = vadd.f32 %v3946_v31, %v297_v42 }
  0x90   : > { %1318 = vmatmul.mubr.f32.gmra.mrb[32].mxu0 %v3936_v19  ;;  %1097 = vmatprep.mubr.f32.mxu1 %v3939_v51  ;;  %v3972_v19 = vsel %vm410_vm0, %v3961_v47, %v439_v3  ;;  %5045 = vst [vmem:[#allocation37_spill] sm:$0xff] %v3985_v13  ;;  %v3988_v36 = vsel %vm570_vm2, %v614_v17, %v616_v63  ;;  %v4002_v17 = vrot.slane %v366_v11, 7 }
  0x91   : > { %1322 = vmatprep.mubr.f32.mxu0 %v3912_v26  ;;  %5044 = vst [vmem:[#allocation36_spill] sm:$0xff] %v3972_v19  ;;  %v619_v33 = vrot.slane %v3972_v19, 1  ;;  %v4000_v63 = vsel %vm679_vm3, %v723_v23, %v725_v38  ;;  %v728_v25 = vrot.slane %v3972_v19, 2  ;;  %v369_v38 = vmax.f32 %v337_v40, 0.0 }
  0x92   : > { %5046 = vst [vmem:[#allocation38_spill] sm:$0xff] %v4000_v63  ;;  %5047 = vst [vmem:[#allocation39_spill] sm:$0xff] %v4002_v17  ;;  %v517_v23 = vsel %vm410_vm0, 0.0, %v4002_v17  ;;  %v300_v11 = vmul.f32 %v3917_v0, %v261_v62  ;;  %v368_v42 = vmax.f32 %v336_v46, 0.0 }
  0x93   : > { %1098 = vmatmul.mubr.f32.gmra.mrb[34].mxu1 %v3825_v32  ;;  %v4026_v55 = vsel %vm679_vm3, %v727_v44, %v728_v25  ;;  %v623_v62 = vrot.slane %v517_v23, 1 }
  0x94   : > { %1323 = vmatmul.mubr.f32.gmra.mrb[34].mxu0 %v3959_v16  ;;  %1102 = vmatprep.mubr.f32.mxu1 %v3966_v61  ;;  %v532_v16 = vsel %vm410_vm0, %v439_v3, 0.0  ;;  %v4007_v3 = vsel %vm570_vm2, %v618_v35, %v619_v33  ;;  %v299_v35 = vmul.f32 %v3917_v0, %v260_v28  ;;  %5050 = vst [vmem:[#allocation42_spill] sm:$0xff] %v4026_v55  ;;  %v263_v28 = vld [vmem:[%s3085_s25 + $0xd8] sm:$0xff] }
  0x95   : > { %2360 = vmatprep.mubr.msk.f32.mxu0 %vm3129_vm1, %v3961_v47  ;;  %5048 = vst [vmem:[#allocation40_spill] sm:$0xff] %v4007_v3  ;;  %v621_v15 = vrot.slane %v532_v16, 1  ;;  %v730_v5 = vrot.slane %v532_v16, 2  ;;  %v445_v16 = vrot.slane %v369_v38, 7  ;;  %v339_v46 = vadd.f32 %v3946_v31, %v300_v11 }
  0x96   : > { %v338_v44 = vadd.f32 %v3946_v31, %v299_v35  ;;  %v732_v38 = vrot.slane %v517_v23, 2 }
  0x97   : > { %2328 = vmatmul.mubr.msk.f32.gmra.mrb[36].mxu1 %vm3129_vm1, %v3878_v41  ;;  %v4029_v40 = vsel %vm570_vm2, %v619_v33, %v621_v15  ;;  %v4041_v15 = vsel %vm679_vm3, %v728_v25, %v730_v5  ;;  %v4043_v33 = vrot.slane %v368_v42, 7  ;;  %v371_v5 = vmax.f32 %v339_v46, 0.0 }
  0x98   : > { %1328 = vmatmul.mubr.f32.gmra.mrb[36].mxu0 %v3985_v13  ;;  %1107 = vmatprep.mubr.f32.mxu1 %v3988_v36  ;;  %v4013_v13 = vsel %vm410_vm0, %v4002_v17, %v442_v20  ;;  %5051 = vst [vmem:[#allocation43_spill] sm:$0xff] %v4029_v40  ;;  %5052 = vst [vmem:[#allocation44_spill] sm:$0xff] %v4041_v15  ;;  %v302_v42 = vmul.f32 %v3917_v0, %v263_v28  ;;  %v370_v35 = vmax.f32 %v338_v44, 0.0 }
  0x99   : > { %1332 = vmatprep.mubr.f32.mxu0 %v3972_v19  ;;  %5049 = vst [vmem:[#allocation41_spill] sm:$0xff] %v4013_v13  ;;  %5053 = vst [vmem:[#allocation45_spill] sm:$0xff] %v4043_v33  ;;  %v733_v11 = vrot.slane %v4013_v13, 2  ;;  %v518_v25 = vsel %vm410_vm0, 0.0, %v4043_v33 }
  0x9a   : > { %v628_v28 = vrot.slane %v518_v25, 1  ;;  %v341_v44 = vadd.f32 %v3946_v31, %v302_v42 }
  0x9b   : > { %1108 = vmatmul.mubr.f32.gmra.mrb[38].mxu1 %v3912_v26  ;;  %v624_v26 = vrot.slane %v4013_v13, 1 }
  0x9c   : > { %1333 = vmatmul.mubr.f32.gmra.mrb[38].mxu0 %v4000_v63  ;;  %1112 = vmatprep.mubr.f32.mxu1 %v4007_v3  ;;  %v533_v63 = vsel %vm410_vm0, %v442_v20, 0.0  ;;  %v262_v3 = vld [vmem:[%s3085_s25 + $0xd0] sm:$0xff] }
  0x9d   : > { %2362 = vmatprep.mubr.msk.f32.mxu0 %vm3129_vm1, %v4002_v17  ;;  %v4048_v20 = vsel %vm570_vm2, %v623_v62, %v624_v26  ;;  %v735_v23 = vrot.slane %v533_v63, 2  ;;  %v301_v62 = vmul.f32 %v3917_v0, %v262_v3  ;;  %v265_v3 = vld [vmem:[%s3085_s25 + $0xe8] sm:$0xff] }
  0x9e   : > { %5054 = vst [vmem:[#allocation46_spill] sm:$0xff] %v4048_v20 }
  0x9f   : > { %2330 = vmatmul.mubr.msk.f32.gmra.mrb[40].mxu1 %vm3129_vm1, %v3961_v47  ;;  %v626_v47 = vrot.slane %v533_v63, 1  ;;  %v448_v63 = vrot.slane %v371_v5, 7 }
  0xa0   : > { %1338 = vmatmul.mubr.f32.gmra.mrb[40].mxu0 %v4026_v55  ;;  %1117 = vmatprep.mubr.f32.mxu1 %v4029_v40  ;;  %v4054_v55 = vsel %vm410_vm0, %v4043_v33, %v445_v16  ;;  %v4067_v40 = vsel %vm679_vm3, %v732_v38, %v733_v11 }
  0xa1   : > { %1342 = vmatprep.mubr.f32.mxu0 %v4013_v13  ;;  %5055 = vst [vmem:[#allocation47_spill] sm:$0xff] %v4054_v55  ;;  %5056 = vst [vmem:[#allocation48_spill] sm:$0xff] %v4067_v40  ;;  %v4070_v46 = vsel %vm570_vm2, %v624_v26, %v626_v47  ;;  %v4081_v26 = vrot.slane %v370_v35, 7  ;;  %v737_v47 = vrot.slane %v518_v25, 2  ;;  %v738_v38 = vrot.slane %v4054_v55, 2 }
  0xa2   : > { %5057 = vst [vmem:[#allocation49_spill] sm:$0xff] %v4070_v46  ;;  %v373_v35 = vmax.f32 %v341_v44, 0.0 }
  0xa3   : > { %1118 = vmatmul.mubr.f32.gmra.mrb[42].mxu1 %v3972_v19  ;;  %v629_v19 = vrot.slane %v4054_v55, 1  ;;  %v519_v25 = vsel %vm410_vm0, 0.0, %v4081_v26 }
  0xa4   : > { %1343 = vmatmul.mubr.f32.gmra.mrb[42].mxu0 %v4041_v15  ;;  %1122 = vmatprep.mubr.f32.mxu1 %v4048_v20  ;;  %v534_v15 = vsel %vm410_vm0, %v445_v16, 0.0  ;;  %v340_v20 = vadd.f32 %v3946_v31, %v301_v62  ;;  %v4087_v16 = vsel %vm679_vm3, %v733_v11, %v735_v23  ;;  %v304_v62 = vmul.f32 %v3917_v0, %v265_v3 }
  0xa5   : > { %2364 = vmatprep.mubr.msk.f32.mxu0 %vm3129_vm1, %v4043_v33  ;;  %5058 = vst [vmem:[#allocation50_spill] sm:$0xff] %v4087_v16  ;;  %v4090_v5 = vsel %vm570_vm2, %v628_v28, %v629_v19  ;;  %v631_v42 = vrot.slane %v534_v15, 1  ;;  %v4104_v11 = vsel %vm679_vm3, %v737_v47, %v738_v38  ;;  %v740_v3 = vrot.slane %v534_v15, 2 }
  0xa6   : > { %5059 = vst [vmem:[#allocation51_spill] sm:$0xff] %v4090_v5  ;;  %5060 = vst [vmem:[#allocation52_spill] sm:$0xff] %v4104_v11  ;;  %v372_v23 = vmax.f32 %v340_v20, 0.0  ;;  %v343_v47 = vadd.f32 %v3946_v31, %v304_v62 }
  0xa7   : > { %2332 = vmatmul.mubr.msk.f32.gmra.mrb[44].mxu1 %vm3129_vm1, %v4002_v17  ;;  %v264_v17 = vld [vmem:[%s3085_s25 + $0xe0] sm:$0xff]  ;;  %v4111_v44 = vsel %vm570_vm2, %v629_v19, %v631_v42 }
  0xa8   : > { %1348 = vmatmul.mubr.f32.gmra.mrb[44].mxu0 %v4067_v40  ;;  %1127 = vmatprep.mubr.f32.mxu1 %v4070_v46  ;;  %v4095_v40 = vsel %vm410_vm0, %v4081_v26, %v448_v63  ;;  %v303_v28 = vmul.f32 %v3917_v0, %v264_v17  ;;  %5061 = vst [vmem:[#allocation53_spill] sm:$0xff] %v4111_v44  ;;  %v633_v46 = vrot.slane %v519_v25, 1  ;;  %v4121_v19 = vrot.slane %v372_v23, 7 }
  0xa9   : > { %1352 = vmatprep.mubr.f32.mxu0 %v4054_v55  ;;  %v742_v17 = vrot.slane %v519_v25, 2  ;;  %v743_v15 = vrot.slane %v4095_v40, 2  ;;  %v375_v23 = vmax.f32 %v343_v47, 0.0 }
  0xaa   : > { %v342_v20 = vadd.f32 %v3946_v31, %v303_v28  ;;  %v520_v25 = vsel %vm410_vm0, 0.0, %v4121_v19  ;;  %v267_v28 = vld [vmem:[%s3085_s25 + $0xf8] sm:$0xff] }
  0xab   : > { %1128 = vmatmul.mubr.f32.gmra.mrb[46].mxu1 %v4013_v13  ;;  %v634_v13 = vrot.slane %v4095_v40, 1  ;;  %v638_v47 = vrot.slane %v520_v25, 1 }
  0xac   : > { %1353 = vmatmul.mubr.f32.gmra.mrb[46].mxu0 %v4087_v16  ;;  %1132 = vmatprep.mubr.f32.mxu1 %v4090_v5  ;;  %v535_v16 = vsel %vm410_vm0, %v448_v63, 0.0  ;;  %v451_v5 = vrot.slane %v373_v35, 7  ;;  %v4127_v63 = vsel %vm679_vm3, %v738_v38, %v740_v3  ;;  %v374_v3 = vmax.f32 %v342_v20, 0.0 }
  0xad   : > { %2366 = vmatprep.mubr.msk.f32.mxu0 %vm3129_vm1, %v4081_v26  ;;  %5062 = vst [vmem:[#allocation54_spill] sm:$0xff] %v4127_v63  ;;  %v4130_v42 = vsel %vm570_vm2, %v633_v46, %v634_v13  ;;  %v636_v35 = vrot.slane %v535_v16, 1  ;;  %v4144_v46 = vsel %vm679_vm3, %v742_v17, %v743_v15  ;;  %v745_v38 = vrot.slane %v535_v16, 2 }
  0xae   : > { %5063 = vst [vmem:[#allocation55_spill] sm:$0xff] %v4130_v42  ;;  %v4134_v62 = vsel %vm410_vm0, %v4121_v19, %v451_v5  ;;  %v306_v17 = vmul.f32 %v3917_v0, %v267_v28  ;;  %v747_v16 = vrot.slane %v520_v25, 2 }
  0xaf   : > { %2334 = vmatmul.mubr.msk.f32.gmra.mrb[48].mxu1 %vm3129_vm1, %v4043_v33  ;;  %v748_v20 = vrot.slane %v4134_v62, 2 }
  0xb0   : > { %1358 = vmatmul.mubr.f32.gmra.mrb[48].mxu0 %v4104_v11  ;;  %1137 = vmatprep.mubr.f32.mxu1 %v4111_v44  ;;  %v266_v11 = vld [vmem:[%s3085_s25 + $0xf0] sm:$0xff]  ;;  %v4150_v44 = vsel %vm570_vm2, %v634_v13, %v636_v35  ;;  %v4161_v13 = vrot.slane %v374_v3, 7  ;;  %v345_v28 = vadd.f32 %v3946_v31, %v306_v17 }
  0xb1   : > { %1362 = vmatprep.mubr.f32.mxu0 %v4095_v40  ;;  %v305_v33 = vmul.f32 %v3917_v0, %v266_v11 }
  0xb2   : > { %v521_v25 = vsel %vm410_vm0, 0.0, %v4161_v13 }
  0xb3   : > { %1138 = vmatmul.mubr.f32.gmra.mrb[50].mxu1 %v4054_v55  ;;  %v639_v55 = vrot.slane %v4134_v62, 1  ;;  %v344_v35 = vadd.f32 %v3946_v31, %v305_v33  ;;  %v643_v3 = vrot.slane %v521_v25, 1 }
  0xb4   : > { %1363 = vmatmul.mubr.f32.gmra.mrb[50].mxu0 %v4127_v63  ;;  %1142 = vmatprep.mubr.f32.mxu1 %v4130_v42  ;;  %v536_v63 = vsel %vm410_vm0, %v451_v5, 0.0  ;;  %v454_v42 = vrot.slane %v375_v23, 7  ;;  %v4166_v5 = vsel %vm679_vm3, %v743_v15, %v745_v38  ;;  %v4183_v15 = vsel %vm679_vm3, %v747_v16, %v748_v20 }
  0xb5   : > { %2368 = vmatprep.mubr.msk.f32.mxu0 %vm3129_vm1, %v4121_v19  ;;  %5064 = vst [vmem:[#allocation56_spill] sm:$0xff] %v4166_v5  ;;  %v4169_v0 = vsel %vm570_vm2, %v638_v47, %v639_v55  ;;  %v641_v11 = vrot.slane %v536_v63, 1  ;;  %v750_v38 = vrot.slane %v536_v63, 2  ;;  %v376_v47 = vmax.f32 %v344_v35, 0.0 }
  0xb6   : > { %v4174_v23 = vsel %vm410_vm0, %v4161_v13, %v454_v42  ;;  %v537_v17 = vsel %vm410_vm0, %v454_v42, 0.0 }
  0xb7   : > { %2336 = vmatmul.mubr.msk.f32.gmra.mrb[52].mxu1 %vm3129_vm1, %v4081_v26  ;;  %v4189_v33 = vsel %vm570_vm2, %v639_v55, %v641_v11  ;;  %v644_v31 = vrot.slane %v4174_v23, 1  ;;  %v4199_v63 = vsel %vm679_vm3, %v748_v20, %v750_v38  ;;  %v752_v55 = vrot.slane %v521_v25, 2 }
  0xb8   : > { %1368 = vmatmul.mubr.f32.gmra.mrb[52].mxu0 %v4144_v46  ;;  %1147 = vmatprep.mubr.f32.mxu1 %v4150_v44  ;;  %v4205_v11 = vrot.slane %v376_v47, 7  ;;  %v753_v42 = vrot.slane %v4174_v23, 2  ;;  %v646_v35 = vrot.slane %v537_v17, 1  ;;  %v755_v38 = vrot.slane %v537_v17, 2  ;;  %v935_v47 = vld [vmem:[%s4915_s3 + $0x418] sm:$0xff] }
  0xb9   : > { %1372 = vmatprep.mubr.f32.mxu0 %v4134_v62  ;;  %v4203_v16 = vsel %vm570_vm2, %v643_v3, %v644_v31 }
  0xba   : > { %v4217_v20 = vsel %vm679_vm3, %v752_v55, %v753_v42  ;;  %v4220_v25 = vsel %vm570_vm2, %v644_v31, %v646_v35  ;;  %v4234_v3 = vsel %vm679_vm3, %v753_v42, %v755_v38  ;;  %v934_v31 = vld [vmem:[%s4915_s3 + $0x410] sm:$0xff]  ;;  %v936_v55 = vld [vmem:[%s4915_s3 + $0x420] sm:$0xff]  ;;  %v937_v42 = vld [vmem:[%s4915_s3 + $0x428] sm:$0xff] }
  0xbb   : > { %1148 = vmatmul.mubr.f32.gmra.mrb[54].mxu1 %v4095_v40  ;;  %v2731_v17 = vpack.c.bf16 %v935_v47, %v934_v31  ;;  %v947_v35 = vld [vmem:[%s4915_s3 + $0x478] sm:$0xff]  ;;  %v5066_v38 = vld [vmem:[#allocation10_spill] sm:$0xff]  ;;  %v5069_v47 = vld [vmem:[#allocation40_spill] sm:$0xff] }
  0xbc   : > { %1373 = vmatmul.mubr.f32.gmra.mrb[54].mxu0 %v4166_v5  ;;  %1152 = vmatprep.mubr.f32.mxu1 %v4169_v0  ;;  %v377_v5 = vmax.f32 %v345_v28, 0.0  ;;  %v5068_v31 = vld [vmem:[#allocation14_spill] sm:$0xff] }
  0xbd   : > { %2370 = vmatprep.mubr.msk.f32.mxu0 %vm3129_vm1, %v4161_v13 }
  0xbe   : > { %v4208_v28 = vrot.slane %v377_v5, 7 }
  0xbf   : > { %2338 = vmatmul.mubr.msk.f32.gmra.mrb[56].mxu1 %vm3129_vm1, %v4121_v19 }
  0xc0   : > { %1378 = vmatmul.mubr.f32.gmra.mrb[56].mxu0 %v4183_v15  ;;  %1157 = vmatprep.mubr.f32.mxu1 %v4189_v33  ;;  %v4225_v5 = vsel %vm410_vm0, %v4205_v11, %v4208_v28 }
  0xc1   : > { %1382 = vmatprep.mubr.f32.mxu0 %v4174_v23 }
  0xc3   : > { %1158 = vmatmul.mubr.f32.gmra.mrb[58].mxu1 %v4134_v62 }
  0xc4   : > { %1383 = vmatmul.mubr.f32.gmra.mrb[58].mxu0 %v4199_v63  ;;  %1162 = vmatprep.mubr.f32.mxu1 %v4203_v16 }
  0xc5   : > { %2372 = vmatprep.mubr.msk.f32.mxu0 %vm3129_vm1, %v4205_v11 }
  0xc7   : > { %2340 = vmatmul.mubr.msk.f32.gmra.mrb[60].mxu1 %vm3129_vm1, %v4161_v13 }
  0xc8   : > { %1388 = vmatmul.mubr.f32.gmra.mrb[60].mxu0 %v4217_v20  ;;  %1167 = vmatprep.mubr.f32.mxu1 %v4220_v25 }
  0xc9   : > { %1392 = vmatprep.mubr.f32.mxu0 %v4225_v5 }
  0xcb   : > { %1168 = vmatmul.mubr.f32.gmra.mrb[62].mxu1 %v4174_v23 }
  0xcc   : > { %1393 = vmatmul.mubr.f32.gmra.mrb[62].mxu0 %v4234_v3  ;;  %1727 = vmatprep.mubr.f32.mxu1 %v3734_v29 }
  0xcd   : > { %1462 = vmatprep.mubr.f32.mxu0 %v3356_v48  ;;  %v938_v48 = vld [vmem:[%s4915_s3 + $0x430] sm:$0xff] }
  0xcf   : > { %2382 = vmatmul.mubr.msk.f32.vlgmr.msra.gmra.mrb[64].mxu1 %vm3129_vm1, %v3630_v34 }
  0xd0   : > { %1463 = vmatmul.mubr.f32.vlgmr.msra.gmra.mrb[0].mxu0 %v3318_v30  ;;  %1732 = vmatprep.mubr.f32.mxu1 %v3770_v4  ;;  %v2735_v30 = vpack.c.bf16 %v937_v42, %v936_v55  ;;  %v5072_v55 = vld [vmem:[#allocation35_spill] sm:$0xff]  ;;  %v5073_v42 = vld [vmem:[#allocation17_spill] sm:$0xff] }
  0xd1   : > { %2681 = vmatpush1.bf16.msra.mxu0 %v3300_v22  ;;  %1467 = vmatprep.mubr.f32.mxu0 %v3398_v6  ;;  %v939_v22 = vld [vmem:[%s4915_s3 + $0x438] sm:$0xff]  ;;  %v940_v6 = vld [vmem:[%s4915_s3 + $0x440] sm:$0xff] }
  0xd2   : > { %2682 = vmatprep.subr.bf16.mxu0 %v5028_v1  ;;  %2730 = vmatpush3.bf16.msra.mxu1 %v3926_v21  ;;  %v946_v21 = vld [vmem:[%s4915_s3 + $0x470] sm:$0xff] }
  0xd3   : > { %1733 = vmatmul.mubr.f32.gmra.mrb[66].mxu1 %v3660_v50  ;;  %2732 = vmatprep.subr.bf16.mxu1 %v2731_v17  ;;  %v942_v50 = vld [vmem:[%s4915_s3 + $0x450] sm:$0xff] }
  0xd4   : > { %1468 = vmatmul.mubr.f32.gmra.mrb[2].mxu0 %v3359_v49  ;;  %1737 = vmatprep.mubr.f32.mxu1 %v3818_v57  ;;  %v2739_v49 = vpack.c.bf16 %v939_v22, %v938_v48  ;;  %v5075_v48 = vld [vmem:[#allocation22_spill] sm:$0xff]  ;;  %v5076_v22 = vld [vmem:[#allocation15_spill] sm:$0xff] }
  0xd5   : > { %1472 = vmatprep.mubr.f32.mxu0 %v3435_v24  ;;  %2684 = vmatpush1.bf16.msra.mxu0 %v3338_v39  ;;  %v941_v39 = vld [vmem:[%s4915_s3 + $0x448] sm:$0xff] }
  0xd6   : > { %2685 = vmatprep.subr.bf16.mxu0 %v5028_v1  ;;  %2734 = vmatpush3.bf16.msra.mxu1 %v2731_v17  ;;  %v2743_v34 = vpack.c.bf16 %v941_v39, %v940_v6  ;;  %v5071_v17 = vld [vmem:[#allocation13_spill] sm:$0xff]  ;;  %v5078_v6 = vld [vmem:[#allocation20_spill] sm:$0xff]  ;;  %v5079_v39 = vld [vmem:[#allocation46_spill] sm:$0xff] }
  0xd7   : > { %2384 = vmatmul.mubr.msk.f32.gmra.mrb[68].mxu1 %vm3129_vm1, %v3713_v8  ;;  %2736 = vmatprep.subr.bf16.mxu1 %v2735_v30  ;;  %v943_v8 = vld [vmem:[%s4915_s3 + $0x458] sm:$0xff] }
  0xd8   : > { %1473 = vmatmul.mubr.f32.gmra.mrb[4].mxu0 %v3401_v7  ;;  %1742 = vmatprep.mubr.f32.mxu1 %v3858_v59 }
  0xd9   : > { %1477 = vmatprep.mubr.f32.mxu0 %v3482_v52  ;;  %2687 = vmatpush1.bf16.msra.mxu0 %v3375_v58  ;;  %v2747_v58 = vpack.c.bf16 %v943_v8, %v942_v50  ;;  %v5081_v50 = vld [vmem:[#allocation18_spill] sm:$0xff]  ;;  %v5082_v8 = vld [vmem:[#allocation39_spill] sm:$0xff] }
  0xda   : > { %2688 = vmatprep.subr.bf16.mxu0 %v5028_v1  ;;  %2738 = vmatpush3.bf16.msra.mxu1 %v2735_v30  ;;  %v5074_v30 = vld [vmem:[#allocation43_spill] sm:$0xff] }
  0xdb   : > { %1743 = vmatmul.mubr.f32.gmra.mrb[70].mxu1 %v3742_v2  ;;  %2740 = vmatprep.subr.bf16.mxu1 %v2739_v49  ;;  %v944_v2 = vld [vmem:[%s4915_s3 + $0x460] sm:$0xff] }
  0xdc   : > { %1478 = vmatmul.mubr.f32.gmra.mrb[6].mxu0 %v3443_v27  ;;  %1747 = vmatprep.mubr.f32.mxu1 %v3904_v9 }
  0xdd   : > { %1482 = vmatprep.mubr.f32.mxu0 %v3518_v12  ;;  %2690 = vmatpush1.bf16.msra.mxu0 %v3421_v18  ;;  %v945_v18 = vld [vmem:[%s4915_s3 + $0x468] sm:$0xff] }
  0xde   : > { %2691 = vmatprep.subr.bf16.mxu0 %v5028_v1  ;;  %2742 = vmatpush3.bf16.msra.mxu1 %v2739_v49  ;;  %v5077_v49 = vld [vmem:[#allocation36_spill] sm:$0xff] }
  0xdf   : > { %2386 = vmatmul.mubr.msk.f32.gmra.mrb[72].mxu1 %vm3129_vm1, %v3778_v54  ;;  %2744 = vmatprep.subr.bf16.mxu1 %v2743_v34  ;;  %v2751_v54 = vpack.c.bf16 %v945_v18, %v944_v2  ;;  %v5084_v2 = vld [vmem:[#allocation26_spill] sm:$0xff]  ;;  %v5085_v18 = vld [vmem:[#allocation21_spill] sm:$0xff] }
  0xe0   : > { %1483 = vmatmul.mubr.f32.gmra.mrb[8].mxu0 %v3485_v53  ;;  %1752 = vmatprep.mubr.f32.mxu1 %v3939_v51 }
  0xe1   : > { %1487 = vmatprep.mubr.f32.mxu0 %v3565_v43  ;;  %2693 = vmatpush1.bf16.msra.mxu0 %v3458_v37  ;;  %v2755_v37 = vpack.c.bf16 %v947_v35, %v946_v21  ;;  %v5087_v21 = vld [vmem:[#allocation51_spill] sm:$0xff]  ;;  %v5088_v35 = vld [vmem:[#allocation28_spill] sm:$0xff] }
  0xe2   : > { %2694 = vmatprep.subr.bf16.mxu0 %v5028_v1  ;;  %2746 = vmatpush3.bf16.msra.mxu1 %v2743_v34  ;;  %v5080_v34 = vld [vmem:[#allocation24_spill] sm:$0xff] }
  0xe3   : > { %1753 = vmatmul.mubr.f32.gmra.mrb[74].mxu1 %v3825_v32  ;;  %2748 = vmatprep.subr.bf16.mxu1 %v2747_v58  ;;  %v5065_v32 = vld [vmem:[#allocation16_spill] sm:$0xff] }
  0xe4   : > { %1488 = vmatmul.mubr.f32.gmra.mrb[10].mxu0 %v3521_v14  ;;  %1757 = vmatprep.mubr.f32.mxu1 %v3966_v61 }
  0xe5   : > { %1492 = vmatprep.mubr.f32.mxu0 %v3601_v10  ;;  %2696 = vmatpush1.bf16.msra.mxu0 %v3504_v60  ;;  %v5067_v60 = vld [vmem:[#allocation31_spill] sm:$0xff] }
  0xe6   : > { %2697 = vmatprep.subr.bf16.mxu0 %v5028_v1  ;;  %2750 = vmatpush3.bf16.msra.mxu1 %v2747_v58  ;;  %v5083_v58 = vld [vmem:[#allocation49_spill] sm:$0xff] }
  0xe7   : > { %2388 = vmatmul.mubr.msk.f32.gmra.mrb[76].mxu1 %vm3129_vm1, %v3878_v41  ;;  %2752 = vmatprep.subr.bf16.mxu1 %v2751_v54  ;;  %v5070_v41 = vld [vmem:[#allocation19_spill] sm:$0xff] }
  0xe8   : > { %1493 = vmatmul.mubr.f32.gmra.mrb[12].mxu0 %v3568_v45  ;;  %1762 = vmatprep.mubr.f32.mxu1 %v3988_v36 }
  0xe9   : > { %1497 = vmatprep.mubr.f32.mxu0 %v5065_v32  ;;  %2699 = vmatpush1.bf16.msra.mxu0 %v5066_v38  ;;  %v5091_v38 = vld [vmem:[#allocation53_spill] sm:$0xff] }
  0xea   : > { %2700 = vmatprep.subr.bf16.mxu0 %v5028_v1  ;;  %2754 = vmatpush3.bf16.msra.mxu1 %v2751_v54  ;;  %v5086_v54 = vld [vmem:[#allocation41_spill] sm:$0xff] }
  0xeb   : > { %1763 = vmatmul.mubr.f32.gmra.mrb[78].mxu1 %v5067_v60  ;;  %2756 = vmatprep.subr.bf16.mxu1 %v2755_v37  ;;  %v5092_v60 = vld [vmem:[#allocation30_spill] sm:$0xff] }
  0xec   : > { %1498 = vmatmul.mubr.f32.gmra.mrb[14].mxu0 %v5068_v31  ;;  %1767 = vmatprep.mubr.f32.mxu1 %v5069_v47 }
  0xed   : > { %1502 = vmatprep.mubr.f32.mxu0 %v5070_v41  ;;  %2702 = vmatpush1.bf16.msra.mxu0 %v5071_v17  ;;  %v5093_v17 = vld [vmem:[#allocation25_spill] sm:$0xff] }
  0xee   : > { %2703 = vmatprep.subr.bf16.mxu0 %v5028_v1  ;;  %2758 = vmatpush3.bf16.msra.mxu1 %v2755_v37  ;;  %v5089_v37 = vld [vmem:[#allocation23_spill] sm:$0xff] }
  0xef   : > { %2390 = vmatmul.mubr.msk.f32.gmra.mrb[80].mxu1 %vm3129_vm1, %v5072_v55  ;;  %v5095_v55 = vld [vmem:[#allocation55_spill] sm:$0xff] }
  0xf0   : > { %1503 = vmatmul.mubr.f32.gmra.mrb[16].mxu0 %v5073_v42  ;;  %1772 = vmatprep.mubr.f32.mxu1 %v5074_v30 }
  0xf1   : > { %1507 = vmatprep.mubr.f32.mxu0 %v5075_v48  ;;  %2705 = vmatpush1.bf16.msra.mxu0 %v5076_v22  ;;  %v5096_v22 = vld [vmem:[#allocation33_spill] sm:$0xff] }
  0xf2   : > { %2706 = vmatprep.subr.bf16.mxu0 %v5028_v1 }
  0xf3   : > { %1773 = vmatmul.mubr.f32.gmra.mrb[82].mxu1 %v5077_v49  ;;  %v5097_v49 = vld [vmem:[#allocation27_spill] sm:$0xff] }
  0xf4   : > { %1508 = vmatmul.mubr.f32.gmra.mrb[18].mxu0 %v5078_v6  ;;  %1777 = vmatprep.mubr.f32.mxu1 %v5079_v39 }
  0xf5   : > { %1512 = vmatprep.mubr.f32.mxu0 %v5080_v34  ;;  %2708 = vmatpush1.bf16.msra.mxu0 %v5081_v50  ;;  %v5099_v50 = vld [vmem:[#allocation29_spill] sm:$0xff] }
  0xf6   : > { %2709 = vmatprep.subr.bf16.mxu0 %v5028_v1 }
  0xf7   : > { %2392 = vmatmul.mubr.msk.f32.gmra.mrb[84].mxu1 %vm3129_vm1, %v5082_v8  ;;  %v5101_v8 = vld [vmem:[#allocation32_spill] sm:$0xff] }
  0xf8   : > { %1513 = vmatmul.mubr.f32.gmra.mrb[20].mxu0 %v3734_v29  ;;  %1782 = vmatprep.mubr.f32.mxu1 %v5083_v58  ;;  %v5090_v29 = vld [vmem:[#allocation45_spill] sm:$0xff] }
  0xf9   : > { %1517 = vmatprep.mubr.f32.mxu0 %v5084_v2  ;;  %2711 = vmatpush1.bf16.msra.mxu0 %v5085_v18  ;;  %v5107_v18 = vld [vmem:[#allocation2_spill] sm:$0xff] }
  0xfa   : > { %2712 = vmatprep.subr.bf16.mxu0 %v5028_v1 }
  0xfb   : > { %1783 = vmatmul.mubr.f32.gmra.mrb[86].mxu1 %v5086_v54  ;;  %v5108_v54 = vld [vmem:[#allocation52_spill] sm:$0xff] }
  0xfc   : > { %1518 = vmatmul.mubr.f32.gmra.mrb[22].mxu0 %v3770_v4  ;;  %1787 = vmatprep.mubr.f32.mxu1 %v5087_v21  ;;  %v5094_v4 = vld [vmem:[#allocation47_spill] sm:$0xff] }
  0xfd   : > { %1522 = vmatprep.mubr.f32.mxu0 %v5088_v35  ;;  %2714 = vmatpush1.bf16.msra.mxu0 %v5089_v37 }
  0xfe   : > { %2715 = vmatprep.subr.bf16.mxu0 %v5028_v1 }
  0xff   : > { %2394 = vmatmul.mubr.msk.f32.gmra.mrb[88].mxu1 %vm3129_vm1, %v5090_v29  ;;  %v5110_v29 = vld [vmem:[#allocation54_spill] sm:$0xff] }
 0x100   : > { %1523 = vmatmul.mubr.f32.gmra.mrb[24].mxu0 %v3818_v57  ;;  %1792 = vmatprep.mubr.f32.mxu1 %v5091_v38  ;;  %v5098_v57 = vld [vmem:[#allocation34_spill] sm:$0xff] }
 0x101   : > { %1527 = vmatprep.mubr.f32.mxu0 %v5092_v60  ;;  %2717 = vmatpush1.bf16.msra.mxu0 %v5093_v17 }
 0x102   : > { %2718 = vmatprep.subr.bf16.mxu0 %v5028_v1 }
 0x103   : > { %1793 = vmatmul.mubr.f32.gmra.mrb[90].mxu1 %v5094_v4 }
 0x104   : > { %1528 = vmatmul.mubr.f32.gmra.mrb[26].mxu0 %v3858_v59  ;;  %1797 = vmatprep.mubr.f32.mxu1 %v5095_v55  ;;  %v5100_v59 = vld [vmem:[#allocation37_spill] sm:$0xff] }
 0x105   : > { %1532 = vmatprep.mubr.f32.mxu0 %v5096_v22  ;;  %2720 = vmatpush1.bf16.msra.mxu0 %v5097_v49  ;;  %v5111_v49 = vld [vmem:[#allocation56_spill] sm:$0xff] }
 0x106   : > { %2721 = vmatprep.subr.bf16.mxu0 %v5028_v1 }
 0x107   : > { %2396 = vmatmul.mubr.msk.f32.gmra.mrb[92].mxu1 %vm3129_vm1, %v4081_v26  ;;  %v4412_v26 = vsel %vm410_vm0, %v4208_v28, 0.0  ;;  %v5105_v28 = vld [vmem:[#allocation48_spill] sm:$0xff] }
 0x108   : > { %1533 = vmatmul.mubr.f32.gmra.mrb[28].mxu0 %v3904_v9  ;;  %1802 = vmatprep.mubr.f32.mxu1 %v4150_v44  ;;  %v5102_v9 = vld [vmem:[#allocation38_spill] sm:$0xff] }
 0x109   : > { %1537 = vmatprep.mubr.f32.mxu0 %v5098_v57  ;;  %2723 = vmatpush1.bf16.msra.mxu0 %v5099_v50 }
 0x10a   : > { %2724 = vmatprep.subr.bf16.mxu0 %v5028_v1  ;;  %v4402_v1 = vsel %vm410_vm0, 0.0, %v4205_v11 }
 0x10b   : > { %1803 = vmatmul.mubr.f32.gmra.mrb[94].mxu1 %v4095_v40  ;;  %v790_v40 = vrot.slane %v4402_v1, 1 }
 0x10c   : > { %1538 = vmatmul.mubr.f32.gmra.mrb[30].mxu0 %v3939_v51  ;;  %1807 = vmatprep.mubr.f32.mxu1 %v4169_v0  ;;  %v5103_v51 = vld [vmem:[#allocation42_spill] sm:$0xff] }
 0x10d   : > { %1542 = vmatprep.mubr.f32.mxu0 %v5100_v59  ;;  %2726 = vmatpush1.bf16.msra.mxu0 %v5101_v8  ;;  %v5113_v8 = vld [vmem:[#allocation5_spill] sm:$0xff] }
 0x10f   : > { %2398 = vmatmul.mubr.msk.f32.gmra.mrb[96].mxu1 %vm3129_vm1, %v4121_v19 }
 0x110   : > { %1543 = vmatmul.mubr.f32.gmra.mrb[32].mxu0 %v3966_v61  ;;  %1812 = vmatprep.mubr.f32.mxu1 %v4189_v33  ;;  %v791_v61 = vrot.slane %v4225_v5, 1 }
 0x111   : > { %1547 = vmatprep.mubr.f32.mxu0 %v5102_v9 }
 0x112   : > { %v4421_v19 = vsel %vm570_vm2, %v790_v40, %v791_v61  ;;  %v5115_v40 = vld [vmem:[#allocation7_spill] sm:$0xff] }
 0x113   : > { %1813 = vmatmul.mubr.f32.gmra.mrb[98].mxu1 %v4134_v62  ;;  %v793_v62 = vrot.slane %v4412_v26, 1 }
 0x114   : > { %1548 = vmatmul.mubr.f32.gmra.mrb[34].mxu0 %v3988_v36  ;;  %1817 = vmatprep.mubr.f32.mxu1 %v4203_v16  ;;  %v5104_v36 = vld [vmem:[#allocation44_spill] sm:$0xff] }
 0x115   : > { %1552 = vmatprep.mubr.f32.mxu0 %v5103_v51 }
 0x117   : > { %2400 = vmatmul.mubr.msk.f32.gmra.mrb[100].mxu1 %vm3129_vm1, %v4161_v13  ;;  %v4429_v13 = vsel %vm570_vm2, %v791_v61, %v793_v62 }
 0x118   : > { %1553 = vmatmul.mubr.f32.gmra.mrb[36].mxu0 %v5069_v47  ;;  %1822 = vmatprep.mubr.f32.mxu1 %v4220_v25  ;;  %v5106_v47 = vld [vmem:[#allocation50_spill] sm:$0xff] }
 0x119   : > { %1557 = vmatprep.mubr.f32.mxu0 %v5104_v36 }
 0x11b   : > { %1823 = vmatmul.mubr.f32.gmra.mrb[102].mxu1 %v4174_v23 }
 0x11c   : > { %1558 = vmatmul.mubr.f32.gmra.mrb[38].mxu0 %v5074_v30  ;;  %1827 = vmatprep.mubr.f32.mxu1 %v4421_v19 }
 0x11d   : > { %1562 = vmatprep.mubr.f32.mxu0 %v5105_v28 }
 0x11f   : > { %2402 = vmatmul.mubr.msk.f32.gmra.mrb[104].mxu1 %vm3129_vm1, %v4205_v11  ;;  %v5109_v11 = vmov 0.0  }
 0x120   : > { %1563 = vmatmul.mubr.f32.gmra.mrb[40].mxu0 %v5079_v39  ;;  %1832 = vmatprep.mubr.f32.mxu1 %v4429_v13 }
 0x121   : > { %1567 = vmatprep.mubr.f32.mxu0 %v5106_v47 }
 0x122   : > { %v4437_v23 = vpop.f32.mrb[0].mxu1 }
 0x123   : > { %1833 = vmatmul.mubr.f32.gmra.mrb[106].mxu1 %v4225_v5  ;;  %v1016_v30 = vpop.f32.mrb[1].mxu1 }
 0x124   : > { %1568 = vmatmul.mubr.f32.gmra.mrb[42].mxu0 %v5083_v58  ;;  %1837 = vmatprep.mubr.f32.mxu1 %v5107_v18 }
 0x125   : > { %1572 = vmatprep.mubr.f32.mxu0 %v5108_v54 }
 0x126   : > { %v4443_v37 = vpop.f32.mrb[2].mxu1 }
 0x127   : > { %1838 = vmatmul.mubr.f32.gmra.mrb[108].mxu1 %v5109_v11  ;;  %v1021_v39 = vpop.f32.mrb[3].mxu1 }
 0x128   : > { %1573 = vmatmul.mubr.f32.gmra.mrb[44].mxu0 %v5087_v21  ;;  %1842 = vmatprep.mubr.f32.mxu1 %v5107_v18 }
 0x129   : > { %1577 = vmatprep.mubr.f32.mxu0 %v5110_v29 }
 0x12a   : > { %v4449_v17 = vpop.f32.mrb[4].mxu1 }
 0x12b   : > { %1843 = vmatmul.mubr.f32.gmra.mrb[110].mxu1 %v5109_v11  ;;  %v1026_v58 = vpop.f32.mrb[5].mxu1 }
 0x12c   : > { %1578 = vmatmul.mubr.f32.gmra.mrb[46].mxu0 %v5091_v38  ;;  %2487 = vmatprep.mubr.f32.mxu1 %v3435_v24 }
 0x12d   : > { %1582 = vmatprep.mubr.f32.mxu0 %v4144_v46 }
 0x12e   : > { %v4455_v4 = vpop.f32.mrb[6].mxu1 }
 0x12f   : > { %2488 = vmatmul.mubr.f32.vlgmr.msra.gmra.mrb[112].mxu1 %v3482_v52  ;;  %v1031_v21 = vpop.f32.mrb[7].mxu1 }
 0x130   : > { %1583 = vmatmul.mubr.f32.gmra.mrb[48].mxu0 %v5095_v55  ;;  %2490 = vmatprep.mubr.f32.mxu1 %v3518_v12 }
 0x131   : > { %1587 = vmatprep.mubr.f32.mxu0 %v5111_v49 }
 0x132   : > { %v4461_v50 = vpop.f32.mrb[8].mxu1 }
 0x133   : > { %2491 = vmatmul.mubr.f32.gmra.mrb[114].mxu1 %v3565_v43  ;;  %v1036_v38 = vpop.f32.mrb[9].mxu1 }
 0x134   : > { %1588 = vmatmul.mubr.f32.gmra.mrb[50].mxu0 %v4150_v44  ;;  %2493 = vmatprep.mubr.f32.mxu1 %v3601_v10  ;;  %v797_v10 = vrot.slane %v4402_v1, 2  ;;  %v798_v44 = vrot.slane %v4225_v5, 2  ;;  %v5114_v1 = vld [vmem:[#allocation6_spill] sm:$0xff] }
 0x135   : > { %1592 = vmatprep.mubr.f32.mxu0 %v4183_v15 }
 0x136   : > { %v4467_v24 = vpop.f32.mrb[10].mxu1 }
 0x137   : > { %2494 = vmatmul.mubr.f32.gmra.mrb[116].mxu1 %v5065_v32  ;;  %v1041_v52 = vpop.f32.mrb[11].mxu1 }
 0x138   : > { %1593 = vmatmul.mubr.f32.gmra.mrb[52].mxu0 %v4169_v0  ;;  %2496 = vmatprep.mubr.f32.mxu1 %v5070_v41  ;;  %v800_v41 = vrot.slane %v4412_v26, 2  ;;  %v5116_v26 = vld [vmem:[#allocation8_spill] sm:$0xff] }
 0x139   : > { %1597 = vmatprep.mubr.f32.mxu0 %v4199_v63 }
 0x13a   : > { %v4473_v12 = vpop.f32.mrb[12].mxu1 }
 0x13b   : > { %2497 = vmatmul.mubr.f32.gmra.mrb[118].mxu1 %v5075_v48  ;;  %v1046_v43 = vpop.f32.mrb[13].mxu1 }
 0x13c   : > { %1598 = vmatmul.mubr.f32.gmra.mrb[54].mxu0 %v4189_v33  ;;  %2499 = vmatprep.mubr.f32.mxu1 %v5080_v34  ;;  %v799_v33 = vsel %vm679_vm3, %v797_v10, %v798_v44 }
 0x13d   : > { %1602 = vmatprep.mubr.f32.mxu0 %v4217_v20 }
 0x13e   : > { %v4481_v0 = vpop.f32.mrb[14].mxu1 }
 0x13f   : > { %2500 = vmatmul.mubr.f32.gmra.mrb[120].mxu1 %v5084_v2  ;;  %v1051_v32 = vpop.f32.mrb[15].mxu1 }
 0x140   : > { %1603 = vmatmul.mubr.f32.gmra.mrb[56].mxu0 %v4203_v16  ;;  %2502 = vmatprep.mubr.f32.mxu1 %v5088_v35  ;;  %v801_v16 = vsel %vm679_vm3, %v798_v44, %v800_v41 }
 0x141   : > { %1607 = vmatprep.mubr.f32.mxu0 %v4234_v3 }
 0x142   : > { %v4489_v48 = vpop.f32.mrb[16].mxu1 }
 0x143   : > { %2503 = vmatmul.mubr.f32.gmra.mrb[122].mxu1 %v5092_v60  ;;  %v1056_v5 = vpop.f32.mrb[17].mxu1 }
 0x144   : > { %1608 = vmatmul.mubr.f32.gmra.mrb[58].mxu0 %v4220_v25  ;;  %2505 = vmatprep.mubr.f32.mxu1 %v5096_v22  ;;  %v5112_v22 = vld [vmem:[#allocation4_spill] sm:$0xff] }
 0x145   : > { %1612 = vmatprep.mubr.f32.mxu0 %v799_v33 }
 0x146   : > { %v4495_v34 = vpop.f32.mrb[18].mxu1 }
 0x147   : > { %2506 = vmatmul.mubr.f32.gmra.mrb[124].mxu1 %v5098_v57  ;;  %v1061_v2 = vpop.f32.mrb[19].mxu1 }
 0x148   : > { %1613 = vmatmul.mubr.f32.gmra.mrb[60].mxu0 %v4421_v19  ;;  %2508 = vmatprep.mubr.f32.mxu1 %v5100_v59  ;;  %v5120_v19 = vld [vmem:[#allocation12_spill] sm:$0xff] }
 0x149   : > { %1617 = vmatprep.mubr.f32.mxu0 %v801_v16 }
 0x14a   : > { %v4500_v35 = vpop.f32.mrb[20].mxu1 }
 0x14b   : > { %2509 = vmatmul.mubr.f32.gmra.mrb[126].mxu1 %v5102_v9  ;;  %v1066_v25 = vpop.f32.mrb[21].mxu1 }
 0x14c   : > { %1618 = vmatmul.mubr.f32.gmra.mrb[62].mxu0 %v4429_v13  ;;  %2511 = vmatprep.mubr.f32.mxu1 %v5103_v51 }
 0x14d   : > { %1687 = vmatprep.mubr.f32.mxu0 %v3401_v7 }
 0x14e   : > { %v4506_v60 = vpop.f32.mrb[22].mxu1 }
 0x14f   : > { %2512 = vmatmul.mubr.f32.gmra.mrb[128].mxu1 %v5104_v36  ;;  %v1071_v55 = vpop.f32.mrb[23].mxu1  ;;  %v5118_v36 = vld [vmem:[#allocation11_spill] sm:$0xff] }
 0x150   : > { %2374 = vmatmul.mubr.msk.f32.vlgmr.msra.gmra.mrb[0].mxu0 %vm3129_vm1, %v5112_v22  ;;  %2514 = vmatprep.mubr.f32.mxu1 %v5105_v28 }
 0x151   : > { %1692 = vmatprep.mubr.f32.mxu0 %v3443_v27 }
 0x152   : > { %v4514_v57 = vpop.f32.mrb[24].mxu1 }
 0x153   : > { %2515 = vmatmul.mubr.f32.gmra.mrb[130].mxu1 %v5106_v47  ;;  %v1076_v59 = vpop.f32.mrb[25].mxu1 }
 0x154   : > { %1693 = vmatmul.mubr.f32.gmra.mrb[2].mxu0 %v5113_v8  ;;  %2517 = vmatprep.mubr.f32.mxu1 %v5108_v54 }
 0x155   : > { %1697 = vmatprep.mubr.f32.mxu0 %v3485_v53 }
 0x156   : > { %v4520_v7 = vpop.f32.mrb[26].mxu1 }
 0x157   : > { %2518 = vmatmul.mubr.f32.gmra.mrb[132].mxu1 %v5110_v29  ;;  %v1081_v9 = vpop.f32.mrb[27].mxu1 }
 0x158   : > { %2376 = vmatmul.mubr.msk.f32.gmra.mrb[4].mxu0 %vm3129_vm1, %v5114_v1  ;;  %2520 = vmatprep.mubr.f32.mxu1 %v4144_v46 }
 0x159   : > { %1702 = vmatprep.mubr.f32.mxu0 %v3521_v14 }
 0x15a   : > { %v4528_v27 = vpop.f32.mrb[28].mxu1 }
 0x15b   : > { %2521 = vmatmul.mubr.f32.gmra.mrb[134].mxu1 %v5111_v49  ;;  %v1086_v51 = vpop.f32.mrb[29].mxu1 }
 0x15c   : > { %1703 = vmatmul.mubr.f32.gmra.mrb[6].mxu0 %v5115_v40  ;;  %2523 = vmatprep.mubr.f32.mxu1 %v4183_v15  ;;  %v5117_v15 = vld [vmem:[#allocation9_spill] sm:$0xff] }
 0x15d   : > { %1707 = vmatprep.mubr.f32.mxu0 %v3568_v45 }
 0x15e   : > { %v4534_v53 = vpop.f32.mrb[30].mxu1 }
 0x15f   : > { %2524 = vmatmul.mubr.f32.gmra.mrb[136].mxu1 %v4199_v63  ;;  %v1091_v61 = vpop.f32.mrb[31].mxu1 }
 0x160   : > { %2378 = vmatmul.mubr.msk.f32.gmra.mrb[8].mxu0 %vm3129_vm1, %v5116_v26  ;;  %2526 = vmatprep.mubr.f32.mxu1 %v4217_v20  ;;  %v5119_v20 = vld [vmem:[#allocation3_spill] sm:$0xff] }
 0x161   : > { %1712 = vmatprep.mubr.f32.mxu0 %v5068_v31 }
 0x162   : > { %v4542_v14 = vpop.f32.mrb[32].mxu1 }
 0x163   : > { %2527 = vmatmul.mubr.f32.gmra.mrb[138].mxu1 %v4234_v3  ;;  %v1096_v46 = vpop.f32.mrb[33].mxu1 }
 0x164   : > { %1713 = vmatmul.mubr.f32.gmra.mrb[10].mxu0 %v5117_v15  ;;  %2529 = vmatprep.mubr.f32.mxu1 %v799_v33 }
 0x165   : > { %1717 = vmatprep.mubr.f32.mxu0 %v5073_v42 }
 0x166   : > { %v4547_v45 = vpop.f32.mrb[34].mxu1 }
 0x167   : > { %2530 = vmatmul.mubr.f32.gmra.mrb[140].mxu1 %v801_v16  ;;  %v1101_v63 = vpop.f32.mrb[35].mxu1 }
 0x168   : > { %2380 = vmatmul.mubr.msk.f32.gmra.mrb[12].mxu0 %vm3129_vm1, %v5118_v36  ;;  %2532 = vmatprep.mubr.f32.mxu1 %v5119_v20 }
 0x169   : > { %1722 = vmatprep.mubr.f32.mxu0 %v5078_v6 }
 0x16a   : > { %v4554_v31 = vpop.f32.mrb[36].mxu1 }
 0x16b   : > { %2533 = vmatmul.mubr.f32.gmra.mrb[142].mxu1 %v5119_v20  ;;  %v1106_v3 = vpop.f32.mrb[37].mxu1 }
 0x16c   : > { %1723 = vmatmul.mubr.f32.gmra.mrb[14].mxu0 %v5120_v19 }
 0x16e   : > { %v4558_v42 = vpop.f32.mrb[38].mxu1 }
 0x16f   : > { %v1111_v62 = vpop.f32.mrb[39].mxu1 }
 0x172   : > { %v4560_v28 = vpop.f32.mrb[40].mxu1 }
 0x173   : > { %v1116_v13 = vpop.f32.mrb[41].mxu1 }
 0x176   : > { %v4562_v47 = vpop.f32.mrb[42].mxu1 }
 0x177   : > { %v1121_v56 = vpop.f32.mrb[43].mxu1 }
 0x17a   : > { %v4564_v30 = vpop.f32.mrb[44].mxu1 }
 0x17b   : > { %v1126_v18 = vpop.f32.mrb[45].mxu1 }
 0x17e   : > { %v4566_v6 = vpop.f32.mrb[46].mxu1 }
 0x17f   : > { %v1131_v54 = vpop.f32.mrb[47].mxu1 }
 0x182   : > { %v4568_v11 = vpop.f32.mrb[48].mxu1 }
 0x183   : > { %v1136_v39 = vpop.f32.mrb[49].mxu1 }
 0x186   : > { %v4570_v29 = vpop.f32.mrb[50].mxu1 }
 0x187   : > { %v1141_v58 = vpop.f32.mrb[51].mxu1 }
 0x18a   : > { %v4572_v21 = vpop.f32.mrb[52].mxu1 }
 0x18b   : > { %v1146_v49 = vpop.f32.mrb[53].mxu1 }
 0x18e   : > { %v4574_v38 = vpop.f32.mrb[54].mxu1 }
 0x18f   : > { %v1151_v52 = vpop.f32.mrb[55].mxu1 }
 0x192   : > { %v4576_v43 = vpop.f32.mrb[56].mxu1 }
 0x193   : > { %v1156_v10 = vpop.f32.mrb[57].mxu1 }
 0x196   : > { %v4578_v44 = vpop.f32.mrb[58].mxu1 }
 0x197   : > { %v1161_v32 = vpop.f32.mrb[59].mxu1 }
 0x19a   : > { %v4580_v33 = vpop.f32.mrb[60].mxu1 }
 0x19b   : > { %v1166_v41 = vpop.f32.mrb[61].mxu1 }
 0x19e   : > { %v4582_v5 = vpop.f32.mrb[62].mxu1 }
 0x19f   : > { %v1171_v16 = vpop.f32.mrb[63].mxu1 }
 0x1a2   : > { %v1729_v2 = vpop.f32.mrb[64].mxu1 }
 0x1a3   : > { %v1731_v25 = vpop.f32.mrb[65].mxu1 }
 0x1a6   : > { %v1734_v55 = vpop.f32.mrb[66].mxu1 }
 0x1a7   : > { %v1736_v22 = vpop.f32.mrb[67].mxu1 }
 0x1aa   : > { %v1739_v59 = vpop.f32.mrb[68].mxu1 }
 0x1ab   : > { %v1741_v8 = vpop.f32.mrb[69].mxu1 }
 0x1ae   : > { %v1744_v9 = vpop.f32.mrb[70].mxu1 }
 0x1af   : > { %v1746_v1 = vpop.f32.mrb[71].mxu1 }
 0x1b2   : > { %v1749_v51 = vpop.f32.mrb[72].mxu1 }
 0x1b3   : > { %v1751_v40 = vpop.f32.mrb[73].mxu1 }
 0x1b6   : > { %v1754_v61 = vpop.f32.mrb[74].mxu1 }
 0x1b7   : > { %v1756_v26 = vpop.f32.mrb[75].mxu1 }
 0x1ba   : > { %v1759_v46 = vpop.f32.mrb[76].mxu1 }
 0x1bb   : > { %v1761_v15 = vpop.f32.mrb[77].mxu1 }
 0x1be   : > { %v1764_v63 = vpop.f32.mrb[78].mxu1 }
 0x1bf   : > { %v1766_v36 = vpop.f32.mrb[79].mxu1 }
 0x1c2   : > { %v1769_v20 = vpop.f32.mrb[80].mxu1 }
 0x1c3   : > { %v1504_v3 = vpop.f32.mrb[16].mxu0  ;;  %v1771_v19 = vpop.f32.mrb[81].mxu1 }
 0x1c4   : > { %v2799_v62 = vadd.f32 %v1504_v3, %v4489_v48  ;;  %v1506_v13 = vpop.f32.mrb[17].mxu0 }
 0x1c6   : > { %v4585_v56 = vadd.f32 %v2799_v62, %v1729_v2  ;;  %v1774_v18 = vpop.f32.mrb[82].mxu1 }
 0x1c7   : > { %v1509_v54 = vpop.f32.mrb[18].mxu0  ;;  %v1776_v39 = vpop.f32.mrb[83].mxu1 }
 0x1c8   : > { %v2801_v58 = vadd.f32 %v1509_v54, %v4495_v34  ;;  %v1511_v49 = vpop.f32.mrb[19].mxu0 }
 0x1ca   : > { %v4588_v52 = vadd.f32 %v2801_v58, %v1734_v55  ;;  %v1779_v10 = vpop.f32.mrb[84].mxu1 }
 0x1cb   : > { %v1514_v32 = vpop.f32.mrb[20].mxu0  ;;  %v1781_v41 = vpop.f32.mrb[85].mxu1 }
 0x1cc   : > { %v2803_v16 = vadd.f32 %v1514_v32, %v4500_v35  ;;  %v1516_v25 = vpop.f32.mrb[21].mxu0 }
 0x1ce   : > { %v4591_v22 = vadd.f32 %v2803_v16, %v1739_v59  ;;  %v1784_v48 = vpop.f32.mrb[86].mxu1 }
 0x1cf   : > { %v1519_v8 = vpop.f32.mrb[22].mxu0  ;;  %v1786_v2 = vpop.f32.mrb[87].mxu1 }
 0x1d0   : > { %v2805_v1 = vadd.f32 %v1519_v8, %v4506_v60  ;;  %v1521_v40 = vpop.f32.mrb[23].mxu0 }
 0x1d2   : > { %v4594_v26 = vadd.f32 %v2805_v1, %v1744_v9  ;;  %v1789_v34 = vpop.f32.mrb[88].mxu1 }
 0x1d3   : > { %v1524_v15 = vpop.f32.mrb[24].mxu0  ;;  %v1791_v55 = vpop.f32.mrb[89].mxu1 }
 0x1d4   : > { %v2807_v36 = vadd.f32 %v1524_v15, %v4514_v57  ;;  %v1526_v3 = vpop.f32.mrb[25].mxu0 }
 0x1d6   : > { %v4597_v19 = vadd.f32 %v2807_v36, %v1749_v51  ;;  %v1794_v35 = vpop.f32.mrb[90].mxu1 }
 0x1d7   : > { %v1529_v62 = vpop.f32.mrb[26].mxu0  ;;  %v1796_v59 = vpop.f32.mrb[91].mxu1 }
 0x1d8   : > { %v2809_v13 = vadd.f32 %v1529_v62, %v4520_v7  ;;  %v1531_v54 = vpop.f32.mrb[27].mxu0 }
 0x1da   : > { %v4600_v39 = vadd.f32 %v2809_v13, %v1754_v61  ;;  %v1799_v60 = vpop.f32.mrb[92].mxu1 }
 0x1db   : > { %v1534_v58 = vpop.f32.mrb[28].mxu0  ;;  %v1801_v9 = vpop.f32.mrb[93].mxu1 }
 0x1dc   : > { %v2811_v49 = vadd.f32 %v1534_v58, %v4528_v27  ;;  %v1536_v32 = vpop.f32.mrb[29].mxu0 }
 0x1de   : > { %v4603_v41 = vadd.f32 %v2811_v49, %v1759_v46  ;;  %v1804_v57 = vpop.f32.mrb[94].mxu1 }
 0x1df   : > { %v1539_v16 = vpop.f32.mrb[30].mxu0  ;;  %v1806_v51 = vpop.f32.mrb[95].mxu1 }
 0x1e0   : > { %v2813_v25 = vadd.f32 %v1539_v16, %v4534_v53  ;;  %v1541_v8 = vpop.f32.mrb[31].mxu0 }
 0x1e2   : > { %v4606_v2 = vadd.f32 %v2813_v25, %v1764_v63  ;;  %v1809_v7 = vpop.f32.mrb[96].mxu1 }
 0x1e3   : > { %v1544_v1 = vpop.f32.mrb[32].mxu0  ;;  %v1811_v61 = vpop.f32.mrb[97].mxu1 }
 0x1e4   : > { %v2815_v40 = vadd.f32 %v1544_v1, %v4542_v14  ;;  %v1546_v15 = vpop.f32.mrb[33].mxu0 }
 0x1e6   : > { %v4609_v55 = vadd.f32 %v2815_v40, %v1769_v20  ;;  %v1814_v27 = vpop.f32.mrb[98].mxu1 }
 0x1e7   : > { %v1549_v36 = vpop.f32.mrb[34].mxu0  ;;  %v1816_v46 = vpop.f32.mrb[99].mxu1 }
 0x1e8   : > { %v2817_v3 = vadd.f32 %v1549_v36, %v4547_v45  ;;  %v1551_v62 = vpop.f32.mrb[35].mxu0 }
 0x1ea   : > { %v4612_v59 = vadd.f32 %v2817_v3, %v1774_v18  ;;  %v1819_v53 = vpop.f32.mrb[100].mxu1 }
 0x1eb   : > { %v1554_v13 = vpop.f32.mrb[36].mxu0  ;;  %v1821_v63 = vpop.f32.mrb[101].mxu1 }
 0x1ec   : > { %v2819_v54 = vadd.f32 %v1554_v13, %v4554_v31  ;;  %v1556_v58 = vpop.f32.mrb[37].mxu0 }
 0x1ee   : > { %v4615_v9 = vadd.f32 %v2819_v54, %v1779_v10  ;;  %v1824_v14 = vpop.f32.mrb[102].mxu1 }
 0x1ef   : > { %v1559_v49 = vpop.f32.mrb[38].mxu0  ;;  %v1826_v20 = vpop.f32.mrb[103].mxu1 }
 0x1f0   : > { %v2821_v32 = vadd.f32 %v1559_v49, %v4558_v42  ;;  %v1561_v16 = vpop.f32.mrb[39].mxu0 }
 0x1f2   : > { %v4618_v51 = vadd.f32 %v2821_v32, %v1784_v48  ;;  %v1829_v45 = vpop.f32.mrb[104].mxu1 }
 0x1f3   : > { %v1564_v25 = vpop.f32.mrb[40].mxu0  ;;  %v1831_v18 = vpop.f32.mrb[105].mxu1 }
 0x1f4   : > { %v2823_v8 = vadd.f32 %v1564_v25, %v4560_v28  ;;  %v1566_v1 = vpop.f32.mrb[41].mxu0 }
 0x1f6   : > { %v4621_v61 = vadd.f32 %v2823_v8, %v1789_v34  ;;  %v4623_v31 = vpop.f32.mrb[106].mxu1 }
 0x1f7   : > { %v1569_v10 = vpop.f32.mrb[42].mxu0  ;;  %v1836_v40 = vpop.f32.mrb[107].mxu1 }
 0x1f8   : > { %v2825_v15 = vadd.f32 %v1569_v10, %v4562_v47  ;;  %v1571_v36 = vpop.f32.mrb[43].mxu0 }
 0x1fa   : > { %v4626_v46 = vpop.f32.mrb[108].mxu1  ;;  %v4628_v42 = vadd.f32 %v2825_v15, %v1794_v35 }
 0x1fb   : > { %v1574_v48 = vpop.f32.mrb[44].mxu0  ;;  %v1841_v3 = vpop.f32.mrb[109].mxu1 }
 0x1fc   : > { %v2827_v62 = vadd.f32 %v1574_v48, %v4564_v30  ;;  %v1576_v13 = vpop.f32.mrb[45].mxu0 }
 0x1fe   : > { %v4631_v28 = vpop.f32.mrb[110].mxu1  ;;  %v4633_v34 = vadd.f32 %v2827_v62, %v1799_v60 }
 0x1ff   : > { %v1579_v63 = vpop.f32.mrb[46].mxu0  ;;  %v1846_v54 = vpop.f32.mrb[111].mxu1 }
 0x200   : > { %v2829_v58 = vadd.f32 %v1579_v63, %v4566_v6  ;;  %v1581_v49 = vpop.f32.mrb[47].mxu0 }
 0x202   : > { %v4636_v47 = vpop.f32.mrb[112].mxu1  ;;  %v4638_v20 = vadd.f32 %v2829_v58, %v1804_v57 }
 0x203   : > { %v1584_v35 = vpop.f32.mrb[48].mxu0  ;;  %v4640_v32 = vpop.f32.mrb[113].mxu1 }
 0x204   : > { %v2831_v16 = vadd.f32 %v1584_v35, %v4568_v11  ;;  %v1586_v30 = vpop.f32.mrb[49].mxu0 }
 0x206   : > { %v4643_v25 = vpop.f32.mrb[114].mxu1  ;;  %v4645_v18 = vadd.f32 %v2831_v16, %v1809_v7 }
 0x207   : > { %v1589_v60 = vpop.f32.mrb[50].mxu0  ;;  %v4647_v8 = vpop.f32.mrb[115].mxu1 }
 0x208   : > { %v2833_v6 = vadd.f32 %v1589_v60, %v4570_v29  ;;  %v1591_v1 = vpop.f32.mrb[51].mxu0 }
 0x20a   : > { %v4650_v10 = vpop.f32.mrb[116].mxu1  ;;  %v4652_v57 = vadd.f32 %v2833_v6, %v1814_v27 }
 0x20b   : > { %v1594_v40 = vpop.f32.mrb[52].mxu0  ;;  %v4654_v15 = vpop.f32.mrb[117].mxu1 }
 0x20c   : > { %v2835_v11 = vadd.f32 %v1594_v40, %v4572_v21  ;;  %v1596_v36 = vpop.f32.mrb[53].mxu0 }
 0x20e   : > { %v4657_v48 = vpop.f32.mrb[118].mxu1  ;;  %v4659_v7 = vadd.f32 %v2835_v11, %v1819_v53 }
 0x20f   : > { %v1599_v3 = vpop.f32.mrb[54].mxu0  ;;  %v4661_v62 = vpop.f32.mrb[119].mxu1 }
 0x210   : > { %v2837_v29 = vadd.f32 %v1599_v3, %v4574_v38  ;;  %v1601_v13 = vpop.f32.mrb[55].mxu0 }
 0x212   : > { %v2501_v21 = vpop.f32.mrb[120].mxu1  ;;  %v4671_v27 = vadd.f32 %v2837_v29, %v1824_v14 }
 0x213   : > { %v1604_v63 = vpop.f32.mrb[56].mxu0  ;;  %v4674_v53 = vadd.f32 %v4588_v52, %v2501_v21  ;;  %v1954_v54 = vpop.f32.mrb[121].mxu1 }
 0x214   : > { %v2839_v38 = vadd.f32 %v1604_v63, %v4576_v43  ;;  %v1606_v58 = vpop.f32.mrb[57].mxu0  ;;  %v4678_v49 = vadd.f32 %v4585_v56, %v1954_v54 }
 0x215   : > { %2082 = vst [vmem:[%s4669_s21 + $0x48] sm:$0xff] %v4674_v53 }
 0x216   : > { %2081 = vst [vmem:[%s4669_s21 + $0x40] sm:$0xff] %v4678_v49  ;;  %v2504_v35 = vpop.f32.mrb[122].mxu1  ;;  %v4684_v14 = vadd.f32 %v2839_v38, %v1829_v45 }
 0x217   : > { %v1609_v16 = vpop.f32.mrb[58].mxu0  ;;  %v4687_v52 = vadd.f32 %v4594_v26, %v2504_v35  ;;  %v1964_v30 = vpop.f32.mrb[123].mxu1 }
 0x218   : > { %v2841_v43 = vadd.f32 %v1609_v16, %v4578_v44  ;;  %v1611_v60 = vpop.f32.mrb[59].mxu0  ;;  %v4691_v56 = vadd.f32 %v4591_v22, %v1964_v30 }
 0x219   : > { %2084 = vst [vmem:[%s4669_s21 + $0x58] sm:$0xff] %v4687_v52 }
 0x21a   : > { %2083 = vst [vmem:[%s4669_s21 + $0x50] sm:$0xff] %v4691_v56  ;;  %v2507_v6 = vpop.f32.mrb[124].mxu1  ;;  %v4698_v45 = vadd.f32 %v2841_v43, %v4623_v31 }
 0x21b   : > { %v1614_v1 = vpop.f32.mrb[60].mxu0  ;;  %v4701_v26 = vadd.f32 %v4600_v39, %v2507_v6  ;;  %v1974_v40 = vpop.f32.mrb[125].mxu1 }
 0x21c   : > { %v2843_v44 = vadd.f32 %v1614_v1, %v4580_v33  ;;  %v1616_v11 = vpop.f32.mrb[61].mxu0  ;;  %v4705_v22 = vadd.f32 %v4597_v19, %v1974_v40 }
 0x21d   : > { %2086 = vst [vmem:[%s4669_s21 + $0x68] sm:$0xff] %v4701_v26 }
 0x21e   : > { %2085 = vst [vmem:[%s4669_s21 + $0x60] sm:$0xff] %v4705_v22  ;;  %v2510_v36 = vpop.f32.mrb[126].mxu1  ;;  %v4712_v31 = vadd.f32 %v2843_v44, %v4626_v46 }
 0x21f   : > { %v1619_v3 = vpop.f32.mrb[62].mxu0  ;;  %v4715_v39 = vadd.f32 %v4606_v2, %v2510_v36  ;;  %v1984_v29 = vpop.f32.mrb[127].mxu1 }
 0x220   : > { %v2845_v33 = vadd.f32 %v1619_v3, %v4582_v5  ;;  %v1621_v13 = vpop.f32.mrb[63].mxu0  ;;  %v4719_v19 = vadd.f32 %v4603_v41, %v1984_v29 }
 0x221   : > { %2088 = vst [vmem:[%s4669_s21 + $0x78] sm:$0xff] %v4715_v39 }
 0x222   : > { %2087 = vst [vmem:[%s4669_s21 + $0x70] sm:$0xff] %v4719_v19  ;;  %v2513_v46 = vpop.f32.mrb[128].mxu1  ;;  %v4726_v21 = vadd.f32 %v2845_v33, %v4631_v28 }
 0x223   : > { %v1689_v63 = vpop.f32.mrb[0].mxu0  ;;  %v4729_v2 = vadd.f32 %v4612_v59, %v2513_v46  ;;  %v1994_v54 = vpop.f32.mrb[129].mxu1 }
 0x224   : > { %v2791_v5 = vadd.f32 %v1689_v63, %v4437_v23  ;;  %v1691_v41 = vpop.f32.mrb[1].mxu0  ;;  %v4733_v38 = vadd.f32 %v4609_v55, %v1994_v54 }
 0x225   : > { %2090 = vst [vmem:[%s4669_s21 + $0x88] sm:$0xff] %v4729_v2 }
 0x226   : > { %v1915_v58 = vadd.f32 %v2791_v5, %v4640_v32  ;;  %2089 = vst [vmem:[%s4669_s21 + $0x80] sm:$0xff] %v4733_v38  ;;  %v2516_v28 = vpop.f32.mrb[130].mxu1 }
 0x227   : > { %v1694_v35 = vpop.f32.mrb[2].mxu0  ;;  %v4741_v59 = vadd.f32 %v4618_v51, %v2516_v28  ;;  %v2004_v16 = vpop.f32.mrb[131].mxu1 }
 0x228   : > { %2073 = vst [vmem:[%s4669_s21] sm:$0xff] %v1915_v58  ;;  %v2792_v23 = vadd.f32 %v1694_v35, %v4443_v37  ;;  %v1696_v30 = vpop.f32.mrb[3].mxu0  ;;  %v4746_v55 = vadd.f32 %v4615_v9, %v2004_v16  ;;  %v2142_v60 = vmul.f32 %v1915_v58, %v1915_v58 }
 0x229   : > { %2092 = vst [vmem:[%s4669_s21 + $0x98] sm:$0xff] %v4741_v59 }
 0x22a   : > { %v1920_v32 = vadd.f32 %v2792_v23, %v4636_v47  ;;  %2091 = vst [vmem:[%s4669_s21 + $0x90] sm:$0xff] %v4746_v55  ;;  %v2519_v43 = vpop.f32.mrb[132].mxu1 }
 0x22b   : > { %v1699_v51 = vpop.f32.mrb[4].mxu0  ;;  %v4754_v6 = vadd.f32 %v4628_v42, %v2519_v43  ;;  %v2014_v37 = vpop.f32.mrb[133].mxu1 }
 0x22c   : > { %2074 = vst [vmem:[%s4669_s21 + $0x8] sm:$0xff] %v1920_v32  ;;  %v2105_v1 = vadd.f32 %v1920_v32, %v1915_v58  ;;  %v2143_v40 = vmul.f32 %v1920_v32, %v1920_v32  ;;  %v2793_v9 = vadd.f32 %v1699_v51, %v4449_v17  ;;  %v1701_v44 = vpop.f32.mrb[5].mxu0  ;;  %v4759_v47 = vadd.f32 %v4621_v61, %v2014_v37 }
 0x22d   : > { %2094 = vst [vmem:[%s4669_s21 + $0xa8] sm:$0xff] %v4754_v6 }
 0x22e   : > { %v2174_v11 = vadd.f32 %v2143_v40, %v2142_v60  ;;  %v1925_v36 = vadd.f32 %v2793_v9, %v4647_v8  ;;  %2093 = vst [vmem:[%s4669_s21 + $0xa0] sm:$0xff] %v4759_v47  ;;  %v2522_v42 = vpop.f32.mrb[134].mxu1 }
 0x22f   : > { %v1704_v3 = vpop.f32.mrb[6].mxu0  ;;  %v4767_v29 = vadd.f32 %v4638_v20, %v2522_v42  ;;  %v2024_v17 = vpop.f32.mrb[135].mxu1 }
 0x230   : > { %2075 = vst [vmem:[%s4669_s21 + $0x10] sm:$0xff] %v1925_v36  ;;  %v2106_v33 = vadd.f32 %v2105_v1, %v1925_v36  ;;  %v2144_v13 = vmul.f32 %v1925_v36, %v1925_v36  ;;  %v2794_v61 = vadd.f32 %v1704_v3, %v4455_v4  ;;  %v1706_v46 = vpop.f32.mrb[7].mxu0  ;;  %v4772_v63 = vadd.f32 %v4633_v34, %v2024_v17 }
 0x231   : > { %2096 = vst [vmem:[%s4669_s21 + $0xb8] sm:$0xff] %v4767_v29 }
 0x232   : > { %v2175_v8 = vadd.f32 %v2174_v11, %v2144_v13  ;;  %v1930_v54 = vadd.f32 %v2794_v61, %v4643_v25  ;;  %2095 = vst [vmem:[%s4669_s21 + $0xb0] sm:$0xff] %v4772_v63  ;;  %v2525_v20 = vpop.f32.mrb[136].mxu1 }
 0x233   : > { %v1709_v5 = vpop.f32.mrb[8].mxu0  ;;  %v4780_v41 = vadd.f32 %v4652_v57, %v2525_v20  ;;  %v2034_v4 = vpop.f32.mrb[137].mxu1 }
 0x234   : > { %2076 = vst [vmem:[%s4669_s21 + $0x18] sm:$0xff] %v1930_v54  ;;  %v2107_v58 = vadd.f32 %v2106_v33, %v1930_v54  ;;  %v2145_v28 = vmul.f32 %v1930_v54, %v1930_v54  ;;  %v2795_v34 = vadd.f32 %v1709_v5, %v4461_v50  ;;  %v1711_v35 = vpop.f32.mrb[9].mxu0  ;;  %v4785_v16 = vadd.f32 %v4645_v18, %v2034_v4 }
 0x235   : > { %2098 = vst [vmem:[%s4669_s21 + $0xc8] sm:$0xff] %v4780_v41  ;;  %v2150_v5 = vmul.f32 %v4678_v49, %v4678_v49 }
 0x236   : > { %v2176_v25 = vadd.f32 %v2175_v8, %v2145_v28  ;;  %v1935_v23 = vadd.f32 %v2795_v34, %v4654_v15  ;;  %2097 = vst [vmem:[%s4669_s21 + $0xc0] sm:$0xff] %v4785_v16  ;;  %v2528_v57 = vpop.f32.mrb[138].mxu1 }
 0x237   : > { %v1714_v30 = vpop.f32.mrb[10].mxu0  ;;  %v4793_v32 = vadd.f32 %v4671_v27, %v2528_v57  ;;  %v2044_v50 = vpop.f32.mrb[139].mxu1 }
 0x238   : > { %2077 = vst [vmem:[%s4669_s21 + $0x20] sm:$0xff] %v1935_v23  ;;  %v2108_v43 = vadd.f32 %v2107_v58, %v1935_v23  ;;  %v2146_v60 = vmul.f32 %v1935_v23, %v1935_v23  ;;  %v2796_v18 = vadd.f32 %v1714_v30, %v4467_v24  ;;  %v1716_v51 = vpop.f32.mrb[11].mxu0  ;;  %v4798_v37 = vadd.f32 %v4659_v7, %v2044_v50 }
 0x239   : > { %2100 = vst [vmem:[%s4669_s21 + $0xd8] sm:$0xff] %v4793_v32 }
 0x23a   : > { %v2177_v15 = vadd.f32 %v2176_v25, %v2146_v60  ;;  %v1940_v1 = vadd.f32 %v2796_v18, %v4650_v10  ;;  %2099 = vst [vmem:[%s4669_s21 + $0xd0] sm:$0xff] %v4798_v37  ;;  %v2531_v27 = vpop.f32.mrb[140].mxu1  ;;  %v2153_v25 = vmul.f32 %v4687_v52, %v4687_v52 }
 0x23b   : > { %v1719_v40 = vpop.f32.mrb[12].mxu0  ;;  %v4806_v9 = vadd.f32 %v4698_v45, %v2531_v27  ;;  %v2054_v24 = vpop.f32.mrb[141].mxu1 }
 0x23c   : > { %2078 = vst [vmem:[%s4669_s21 + $0x28] sm:$0xff] %v1940_v1  ;;  %v2109_v44 = vadd.f32 %v2108_v43, %v1940_v1  ;;  %v2147_v11 = vmul.f32 %v1940_v1, %v1940_v1  ;;  %v2797_v7 = vadd.f32 %v1719_v40, %v4473_v12  ;;  %v1721_v36 = vpop.f32.mrb[13].mxu0  ;;  %v4811_v42 = vadd.f32 %v4684_v14, %v2054_v24 }
 0x23d   : > { %2102 = vst [vmem:[%s4669_s21 + $0xe8] sm:$0xff] %v4806_v9 }
 0x23e   : > { %v2178_v10 = vadd.f32 %v2177_v15, %v2147_v11  ;;  %v1945_v3 = vadd.f32 %v2797_v7, %v4661_v62  ;;  %2101 = vst [vmem:[%s4669_s21 + $0xe0] sm:$0xff] %v4811_v42  ;;  %v2534_v45 = vpop.f32.mrb[142].mxu1 }
 0x23f   : > { %v1724_v17 = vpop.f32.mrb[14].mxu0  ;;  %v4819_v33 = vadd.f32 %v4726_v21, %v2534_v45  ;;  %v2064_v12 = vpop.f32.mrb[143].mxu1 }
 0x240   : > { %2079 = vst [vmem:[%s4669_s21 + $0x30] sm:$0xff] %v1945_v3  ;;  %v2110_v13 = vadd.f32 %v2109_v44, %v1945_v3  ;;  %v2148_v61 = vmul.f32 %v1945_v3, %v1945_v3  ;;  %v2798_v14 = vadd.f32 %v1724_v17, %v4481_v0  ;;  %v1726_v46 = vpop.f32.mrb[15].mxu0  ;;  %v4824_v8 = vadd.f32 %v4712_v31, %v2064_v12 }
 0x241   : > { %2104 = vst [vmem:[%s4669_s21 + $0xf8] sm:$0xff] %v4819_v33  ;;  %v2151_v31 = vmul.f32 %v4674_v53, %v4674_v53 }
 0x242   : > { %v2179_v62 = vadd.f32 %v2178_v10, %v2148_v61  ;;  %v1950_v54 = vadd.f32 %v2798_v14, %v4657_v48  ;;  %2103 = vst [vmem:[%s4669_s21 + $0xf0] sm:$0xff] %v4824_v8  ;;  %v2152_v48 = vmul.f32 %v4691_v56, %v4691_v56 }
 0x244   : > { %2080 = vst [vmem:[%s4669_s21 + $0x38] sm:$0xff] %v1950_v54  ;;  %v2111_v21 = vadd.f32 %v2110_v13, %v1950_v54  ;;  %v2149_v20 = vmul.f32 %v1950_v54, %v1950_v54 }
 0x246   : > { %v2112_v4 = vadd.f32 %v2111_v21, %v4678_v49  ;;  %v2180_v0 = vadd.f32 %v2179_v62, %v2149_v20  ;;  %v2154_v49 = vmul.f32 %v4705_v22, %v4705_v22 }
 0x248   : > { %v2113_v58 = vadd.f32 %v2112_v4, %v4674_v53  ;;  %v2181_v28 = vadd.f32 %v2180_v0, %v2150_v5  ;;  %v2155_v53 = vmul.f32 %v4701_v26, %v4701_v26 }
 0x24a   : > { %v2114_v34 = vadd.f32 %v2113_v58, %v4691_v56  ;;  %v2182_v35 = vadd.f32 %v2181_v28, %v2151_v31  ;;  %v2156_v56 = vmul.f32 %v4719_v19, %v4719_v19 }
 0x24c   : > { %v2115_v23 = vadd.f32 %v2114_v34, %v4687_v52  ;;  %v2183_v57 = vadd.f32 %v2182_v35, %v2152_v48  ;;  %v2157_v52 = vmul.f32 %v4715_v39, %v4715_v39  ;;  %v2172_v35 = vmul.f32 %v4824_v8, %v4824_v8 }
 0x24e   : > { %v2116_v30 = vadd.f32 %v2115_v23, %v4705_v22  ;;  %v2184_v50 = vadd.f32 %v2183_v57, %v2153_v25  ;;  %v2158_v22 = vmul.f32 %v4733_v38, %v4733_v38  ;;  %v2173_v25 = vmul.f32 %v4819_v33, %v4819_v33 }
 0x250   : > { %v2117_v43 = vadd.f32 %v2116_v30, %v4701_v26  ;;  %v2185_v60 = vadd.f32 %v2184_v50, %v2154_v49  ;;  %v2159_v26 = vmul.f32 %v4729_v2, %v4729_v2 }
 0x252   : > { %v2118_v18 = vadd.f32 %v2117_v43, %v4719_v19  ;;  %v2186_v51 = vadd.f32 %v2185_v60, %v2155_v53  ;;  %v2160_v19 = vmul.f32 %v4746_v55, %v4746_v55 }
 0x254   : > { %v2119_v15 = vadd.f32 %v2118_v18, %v4715_v39  ;;  %v2187_v1 = vadd.f32 %v2186_v51, %v2156_v56  ;;  %v2161_v39 = vmul.f32 %v4741_v59, %v4741_v59 }
 0x256   : > { %v2120_v27 = vadd.f32 %v2119_v15, %v4733_v38  ;;  %v2188_v40 = vadd.f32 %v2187_v1, %v2157_v52  ;;  %v2162_v38 = vmul.f32 %v4759_v47, %v4759_v47 }
 0x258   : > { %v2121_v24 = vadd.f32 %v2120_v27, %v4729_v2  ;;  %v2189_v44 = vadd.f32 %v2188_v40, %v2158_v22  ;;  %v2163_v2 = vmul.f32 %v4754_v6, %v4754_v6 }
 0x25a   : > { %v2190_v11 = vadd.f32 %v2189_v44, %v2159_v26  ;;  %v2122_v7 = vadd.f32 %v2121_v24, %v4746_v55  ;;  %v2164_v55 = vmul.f32 %v4772_v63, %v4772_v63 }
 0x25c   : > { %v2123_v36 = vadd.f32 %v2122_v7, %v4741_v59  ;;  %v2191_v10 = vadd.f32 %v2190_v11, %v2160_v19  ;;  %v2165_v59 = vmul.f32 %v4767_v29, %v4767_v29 }
 0x25e   : > { %v2124_v3 = vadd.f32 %v2123_v36, %v4759_v47  ;;  %v2192_v45 = vadd.f32 %v2191_v10, %v2161_v39  ;;  %v2166_v47 = vmul.f32 %v4785_v16, %v4785_v16 }
 0x260   : > { %v2125_v17 = vadd.f32 %v2124_v3, %v4754_v6  ;;  %v2193_v12 = vadd.f32 %v2192_v45, %v2162_v38  ;;  %v2167_v6 = vmul.f32 %v4780_v41, %v4780_v41 }
 0x262   : > { %v2126_v13 = vadd.f32 %v2125_v17, %v4772_v63  ;;  %v2194_v61 = vadd.f32 %v2193_v12, %v2163_v2  ;;  %v2168_v63 = vmul.f32 %v4798_v37, %v4798_v37 }
 0x264   : > { %v2127_v14 = vadd.f32 %v2126_v13, %v4767_v29  ;;  %v2195_v46 = vadd.f32 %v2194_v61, %v2164_v55  ;;  %v2169_v29 = vmul.f32 %v4793_v32, %v4793_v32 }
 0x266   : > { %v2128_v62 = vadd.f32 %v2127_v14, %v4785_v16  ;;  %v2196_v54 = vadd.f32 %v2195_v46, %v2165_v59  ;;  %v2170_v16 = vmul.f32 %v4811_v42, %v4811_v42 }
 0x268   : > { %v2129_v21 = vadd.f32 %v2128_v62, %v4780_v41  ;;  %v2197_v20 = vadd.f32 %v2196_v54, %v2166_v47  ;;  %v2171_v41 = vmul.f32 %v4806_v9, %v4806_v9 }
 0x26a   : > { %v2130_v5 = vadd.f32 %v2129_v21, %v4798_v37  ;;  %v2198_v4 = vadd.f32 %v2197_v20, %v2167_v6 }
 0x26c   : > { %v2131_v0 = vadd.f32 %v2130_v5, %v4793_v32  ;;  %v2199_v31 = vadd.f32 %v2198_v4, %v2168_v63 }
 0x26e   : > { %v2132_v58 = vadd.f32 %v2131_v0, %v4811_v42  ;;  %v2200_v28 = vadd.f32 %v2199_v31, %v2169_v29 }
 0x270   : > { %v2133_v48 = vadd.f32 %v2132_v58, %v4806_v9  ;;  %v2201_v34 = vadd.f32 %v2200_v28, %v2170_v16 }
 0x272   : > { %v2134_v37 = vadd.f32 %v2133_v48, %v4824_v8  ;;  %v2202_v32 = vadd.f32 %v2201_v34, %v2171_v41 }
 0x274   : > { %v2135_v23 = vadd.f32 %v2134_v37, %v4819_v33  ;;  %v2203_v42 = vadd.f32 %v2202_v32, %v2172_v35 }
 0x276   : > { %v2136_v57 = vrot.slane %v2135_v23, 4  ;;  %v2204_v49 = vadd.f32 %v2203_v42, %v2173_v25 }
 0x278   : > { %v2137_v30 = vadd.f32 %v2136_v57, %v2135_v23  ;;  %v2205_v50 = vrot.slane %v2204_v49, 4 }
 0x27a   : > { %v2138_v53 = vrot.slane %v2137_v30, 2  ;;  %v2206_v9 = vadd.f32 %v2205_v50, %v2204_v49 }
 0x27c   : > { %v2139_v43 = vadd.f32 %v2138_v53, %v2137_v30  ;;  %v2207_v60 = vrot.slane %v2206_v9, 2 }
 0x27e   : > { %v2140_v56 = vrot.slane %v2139_v43, 1  ;;  %v2208_v18 = vadd.f32 %v2207_v60, %v2206_v9 }
 0x280   : > { %v2209_v51 = vrot.slane %v2208_v18, 1  ;;  %v2141_v8 = vadd.f32 %v2140_v56, %v2139_v43 }
 0x282   : > { %v2210_v52 = vadd.f32 %v2209_v51, %v2208_v18 }
 0x284   : > { %v2211_v33 = vsel %vm410_vm0, %v2141_v8, %v2210_v52 }
 0x285   : > { %2212 = vst [vmem:[%s235_s24] sm:$0x3] %v2211_v33 }
 0x286 PF: > { %s16_s18 = sadd.s32 1, %s2945_s18  }
 0x287   : > { %p13_p4 = scmp.ge.s32.totalorder %s16_s18, 4  }
 0x289   :  { %15 = sbr.rel (!%p13_p4) target bundleno = 1 (0x1), region = 78 }

</bundles_post_ra>
